<compile_context>
chip_gen: v6e
topology: v6e:2x2x1
jax: 0.10.0
libtpu: 0.0.40
codegen_flags: <defaults>
</compile_context>

<pallas_src>
import jax
import jax.numpy as jnp
import numpy as np
from jax.experimental import pallas as pl
from jax.experimental.pallas import tpu as pltpu


# ------------------------------ Pallas kernel -------------------------------
# One grid step == TB images.  Feature maps are 2-D (rows, W*C) f32 slabs,
# rows = image_index * stride + h (stride 32 / 16 / 16 / 8 per stage).

def _lenet_kernel(x_ref,                        # (TB*32, 32) stacked input rows
                  bw1_ref, b1_ref,              # conv1 banded W (5,32,168), bias (1,168)
                  s1_ref, sw1_ref,              # pool1 row-select, col-select
                  bw2_ref, b2_ref,              # conv2 banded W (5,84,160), bias (1,160)
                  s2sel_ref, sw2_ref,           # pool2 row-select(+regroup), col-select
                  w1_ref, fb1_ref,              # fc1 permuted (5,80,120), (1,120)
                  w2_ref, fb2_ref,              # fc2 (120,84), (1,84)
                  w3_ref, fb3_ref,              # fc3 padded (84,128), (1,128)
                  out_ref):                     # (TB, 128) lane-dense logits
    f32 = jnp.float32
    tb = out_ref.shape[0]

    # ---- conv1 (5x5, 1->6) + bias + ReLU: 5 banded dots, row-shifted sum ----
    m1 = tb * 32 - 4
    acc1 = jnp.zeros((m1, 28 * 6), f32)
    for kh in range(5):
        acc1 = acc1 + jnp.dot(x_ref[kh:kh + m1, :], bw1_ref[kh],
                              preferred_element_type=f32)
    c1 = jnp.maximum(acc1 + b1_ref[...], 0.0)                       # (tb*32-4, 168)

    # ---- max-pool 2x2/2: adjacent-row pair-max -> block-diag row-select dot,
    #      adjacent-channel-block pair-max -> col-select dot ----
    pm1 = jnp.maximum(c1[:m1 - 1, :], c1[1:, :])                    # (tb*32-5, 168)
    p1 = jnp.dot(s1_ref[...], pm1, preferred_element_type=f32)      # (tb*16, 168)
    pmw1 = jnp.maximum(p1[:, :27 * 6], p1[:, 6:])                   # (tb*16, 162)
    s2 = jnp.dot(pmw1, sw1_ref[...], preferred_element_type=f32)    # (tb*16, 84)

    # ---- conv2 (5x5, 6->16) + bias + ReLU: 5 banded dots ----
    m2 = tb * 16 - 4
    acc2 = jnp.zeros((m2, 10 * 16), f32)
    for kh in range(5):
        acc2 = acc2 + jnp.dot(s2[kh:kh + m2, :], bw2_ref[kh],
                              preferred_element_type=f32)
    c3 = jnp.maximum(acc2 + b2_ref[...], 0.0)                       # (tb*16-4, 160)

    # ---- max-pool 2x2/2; row-select also regroups rows to (h*tb + b) ----
    pm2 = jnp.maximum(c3[:m2 - 1, :], c3[1:, :])                    # (tb*16-5, 160)
    p2 = jnp.dot(s2sel_ref[...], pm2, preferred_element_type=f32)   # (5*tb, 160)
    pmw2 = jnp.maximum(p2[:, :9 * 16], p2[:, 16:])                  # (5*tb, 144)
    s4 = jnp.dot(pmw2, sw2_ref[...], preferred_element_type=f32)    # (5*tb, 80)

    # ---- fc1 (400->120): 5 aligned row-block dots (weights pre-permuted so
    #      PyTorch's (c,h,w) flatten order is free) ----
    f5 = fb1_ref[...]                                               # (1, 120)
    for h in range(5):
        f5 = f5 + jnp.dot(s4[h * tb:(h + 1) * tb, :], w1_ref[h],
                          preferred_element_type=f32)
    f5 = jnp.maximum(f5, 0.0)                                       # (tb, 120)

    # ---- fc2 (120->84) + ReLU, fc3 (84->10, zero-padded to 128 lanes) ----
    f6 = jnp.maximum(jnp.dot(f5, w2_ref[...], preferred_element_type=f32)
                     + fb2_ref[...], 0.0)                           # (tb, 84)
    out = jnp.dot(f6, w3_ref[...], preferred_element_type=f32) + fb3_ref[...]
    out_ref[...] = out.astype(out_ref.dtype)                        # (tb, 128)


# ------------------------- one-time parameter prep --------------------------

def _banded_conv_weights(w_oihw, w_out):
    """(Cout,Cin,5,5) -> (5, (w_out+4)*Cin, w_out*Cout) banded matrices.

    For row tap kh, a slab X laid out (rows, W_in*Cin) contributes
    X[r+kh] @ BW[kh] to conv-output row r laid out (rows, W_out*Cout):
    BW[kh][wi*Cin+ci, wo*Cout+co] = w[co,ci,kh,wi-wo] for 0 <= wi-wo < 5.
    """
    w = np.asarray(w_oihw, np.float32)
    cout, cin, khs, kws = w.shape
    w_in = w_out + kws - 1
    bw = np.zeros((khs, w_in * cin, w_out * cout), np.float32)
    for kh in range(khs):
        for kw in range(kws):
            blk = w[:, :, kh, kw].T                     # (cin, cout)
            for wo in range(w_out):
                wi = wo + kw
                bw[kh, wi * cin:(wi + 1) * cin, wo * cout:(wo + 1) * cout] = blk
    return jnp.asarray(bw)


def _col_pool_select(w_in, c):
    """0/1 right-multiply matrix subsampling channel blocks by 2 after pair-max."""
    hp = w_in // 2
    sw = np.zeros(((w_in - 1) * c, hp * c), np.float32)
    for j in range(hp):
        for cc in range(c):
            sw[(2 * j) * c + cc, j * c + cc] = 1.0
    return jnp.asarray(sw)


def prepare_params(params, tb):
    """One-time re-layout of the PyTorch-style params for the fused kernel.

    `tb` (images per grid step) is baked into the block-diagonal pool
    row-selection matrices.
    """
    n = tb
    m1 = n * 32 - 4
    m2 = n * 16 - 4

    # pool1 row-select: pair-maxed row b*32+2j  ->  output row b*16+j (j<14)
    s1 = np.zeros((n * 16, m1 - 1), np.float32)
    for b in range(n):
        for j in range(14):
            s1[b * 16 + j, b * 32 + 2 * j] = 1.0

    # pool2 row-select + regroup: pair-maxed row b*16+2h -> output row h*n+b (h<5)
    s2sel = np.zeros((5 * n, m2 - 1), np.float32)
    for b in range(n):
        for h in range(5):
            s2sel[h * n + b, b * 16 + 2 * h] = 1.0

    sw1 = _col_pool_select(28, 6)                  # (162, 84)
    sw2 = _col_pool_select(10, 16)                 # (144, 80)

    # fc1 weights re-indexed to [h, w*16+c, out] so torch's (c,h,w) flatten is free.
    w1p = jnp.transpose(jnp.asarray(params["fc1_w"]).reshape(120, 16, 5, 5),
                        (2, 3, 1, 0)).reshape(5, 80, 120)
    w3p = jnp.pad(params["fc3_w"].T, ((0, 0), (0, 118)))   # (84, 128) lane-dense
    b3p = jnp.pad(params["fc3_b"], (0, 118))

    return (
        _banded_conv_weights(params["conv1_w"], 28),        # (5, 32, 168)
        jnp.tile(params["conv1_b"], 28).reshape(1, 168),
        jnp.asarray(s1), sw1,
        _banded_conv_weights(params["conv2_w"], 10),        # (5, 84, 160)
        jnp.tile(params["conv2_b"], 10).reshape(1, 160),
        jnp.asarray(s2sel), sw2,
        w1p, params["fc1_b"].reshape(1, 120),
        params["fc2_w"].T, params["fc2_b"].reshape(1, 84),
        w3p, b3p.reshape(1, 128),
    )


# ------------------------------ forward wrapper ------------------------------

@jax.jit
def net_forward(prep, x_nchw):
    tb = prep[2].shape[0] // 16                  # TB baked into the pool1 selector
    b = x_nchw.shape[0]
    bp = ((b + tb - 1) // tb) * tb               # pad ragged batches with zero images

    x = x_nchw.reshape(b, 32, 32)                # Cin == 1
    if bp != b:
        x = jnp.pad(x, ((0, bp - b), (0, 0), (0, 0)))
    x = x.reshape(bp * 32, 32)                   # contiguous row-stacked slab

    in_specs = [pl.BlockSpec((tb * 32, 32), lambda i: (i, 0))]
    in_specs += [pl.BlockSpec(p.shape, lambda i, z=(0,) * p.ndim: z) for p in prep]

    out = pl.pallas_call(
        _lenet_kernel,
        out_shape=jax.ShapeDtypeStruct((bp, 128), jnp.float32),
        grid=(bp // tb,),
        in_specs=in_specs,
        out_specs=pl.BlockSpec((tb, 128), lambda i: (i, 0)),
        compiler_params=pltpu.CompilerParams(
            dimension_semantics=("parallel",),
            vmem_limit_bytes=32 * 1024 * 1024),
    )(x, *prep)
    return out[:b, :10]                          # drop lane padding + batch padding


# --------------------------- params / reference -----------------------------

def init_params(key):
    # deterministic PyTorch-style uniform(-1/sqrt(fan_in), 1/sqrt(fan_in))
    def uniform(k, shape, fan_in):
        bound = 1.0 / np.sqrt(fan_in)
        return jax.random.uniform(k, shape, jnp.float32, -bound, bound)

    ks = jax.random.split(key, 10)
    return {
        "conv1_w": uniform(ks[0], (6, 1, 5, 5), 1 * 5 * 5),
        "conv1_b": uniform(ks[1], (6,), 1 * 5 * 5),
        "conv2_w": uniform(ks[2], (16, 6, 5, 5), 6 * 5 * 5),
        "conv2_b": uniform(ks[3], (16,), 6 * 5 * 5),
        "fc1_w": uniform(ks[4], (120, 400), 400),
        "fc1_b": uniform(ks[5], (120,), 400),
        "fc2_w": uniform(ks[6], (84, 120), 120),
        "fc2_b": uniform(ks[7], (84,), 120),
        "fc3_w": uniform(ks[8], (10, 84), 84),
        "fc3_b": uniform(ks[9], (10,), 84),
    }


def net_reference(params, x_nchw):
    # pure-JAX reference reproducing the PyTorch forward exactly
    def conv(x, w, b):
        y = jax.lax.conv_general_dilated(
            x, w, window_strides=(1, 1), padding="VALID",
            dimension_numbers=("NCHW", "OIHW", "NCHW"))
        return jax.nn.relu(y + b[None, :, None, None])

    def pool(x):
        return jax.lax.reduce_window(x, -jnp.inf, jax.lax.max,
                                     (1, 1, 2, 2), (1, 1, 2, 2), "VALID")

    c1 = conv(x_nchw, params["conv1_w"], params["conv1_b"])
    s2 = pool(c1)
    c3 = conv(s2, params["conv2_w"], params["conv2_b"])
    s4 = pool(c3)
    flat = s4.reshape(s4.shape[0], -1)
    f5 = jax.nn.relu(flat @ params["fc1_w"].T + params["fc1_b"])
    f6 = jax.nn.relu(f5 @ params["fc2_w"].T + params["fc2_b"])
    return f6 @ params["fc3_w"].T + params["fc3_b"]


# ----------------------------------- main -----------------------------------

if __name__ == "__main__":
    key = jax.random.PRNGKey(0)
    pkey, xkey = jax.random.split(key)
    params = init_params(pkey)

    TB = 8                                  # images per grid step
    prep = prepare_params(params, TB)       # one-time weight re-layout

    # Batch of 16 -> grid=(2,): both v7x TensorCores get a step.
    x = jax.random.normal(xkey, (16, 1, 32, 32), jnp.float32)

    out = jax.block_until_ready(net_forward(prep, x))
    assert out.shape == (16, 10), out.shape
    assert bool(jnp.all(jnp.isfinite(out)))

    ref = net_reference(params, x)
    # Both paths run their conv/matmul work on the MXU at default precision,
    # which may round operands to bf16 differently for lax.conv vs. in-kernel
    # dots; 2e-2 comfortably bounds that while still catching any layout /
    # ordering regression (those produce O(1) errors).
    if not bool(jnp.allclose(out, ref, rtol=2e-2, atol=2e-2)):
        raise AssertionError(
            f"mismatch vs reference, max abs diff="
            f"{float(jnp.max(jnp.abs(out - ref)))}")

    # Ragged-batch path (batch not a multiple of TB): zero-padded to TB inside.
    out_small = jax.block_until_ready(net_forward(prep, x[:2]))
    assert out_small.shape == (2, 10)
    if not bool(jnp.allclose(out_small, ref[:2], rtol=2e-2, atol=2e-2)):
        raise AssertionError("ragged-batch mismatch vs reference")

    print("KERNEL_OK")
</pallas_src>

<mosaic_0001>
module attributes {stable_mosaic.version = 11 : i64} {
  func.func @_lenet_kernel(%arg0: i32, %arg1: memref<256x32xf32, #tpu.memory_space<vmem>>, %arg2: memref<5x32x168xf32, #tpu.memory_space<vmem>>, %arg3: memref<1x168xf32, #tpu.memory_space<vmem>>, %arg4: memref<128x251xf32, #tpu.memory_space<vmem>>, %arg5: memref<162x84xf32, #tpu.memory_space<vmem>>, %arg6: memref<5x84x160xf32, #tpu.memory_space<vmem>>, %arg7: memref<1x160xf32, #tpu.memory_space<vmem>>, %arg8: memref<40x123xf32, #tpu.memory_space<vmem>>, %arg9: memref<144x80xf32, #tpu.memory_space<vmem>>, %arg10: memref<5x80x120xf32, #tpu.memory_space<vmem>>, %arg11: memref<1x120xf32, #tpu.memory_space<vmem>>, %arg12: memref<120x84xf32, #tpu.memory_space<vmem>>, %arg13: memref<1x84xf32, #tpu.memory_space<vmem>>, %arg14: memref<84x128xf32, #tpu.memory_space<vmem>>, %arg15: memref<1x128xf32, #tpu.memory_space<vmem>>, %arg16: memref<8x128xf32, #tpu.memory_space<vmem>>) attributes {dimension_semantics = [#tpu.dimension_semantics<parallel>], iteration_bounds = array<i64: 2>, scalar_prefetch = 0 : i64, scratch_operands = 0 : i64, tpu.core_type = #tpu.core_type<tc>, window_params = [{transform_indices = @transform_0, window_bounds = array<i64: 256, 32>}, {pipeline_mode = #tpu.pipeline_mode<synchronous>, transform_indices = @transform_1, window_bounds = array<i64: 5, 32, 168>}, {pipeline_mode = #tpu.pipeline_mode<synchronous>, transform_indices = @transform_2, window_bounds = array<i64: 1, 168>}, {pipeline_mode = #tpu.pipeline_mode<synchronous>, transform_indices = @transform_3, window_bounds = array<i64: 128, 251>}, {pipeline_mode = #tpu.pipeline_mode<synchronous>, transform_indices = @transform_4, window_bounds = array<i64: 162, 84>}, {pipeline_mode = #tpu.pipeline_mode<synchronous>, transform_indices = @transform_5, window_bounds = array<i64: 5, 84, 160>}, {pipeline_mode = #tpu.pipeline_mode<synchronous>, transform_indices = @transform_6, window_bounds = array<i64: 1, 160>}, {pipeline_mode = #tpu.pipeline_mode<synchronous>, transform_indices = @transform_7, window_bounds = array<i64: 40, 123>}, {pipeline_mode = #tpu.pipeline_mode<synchronous>, transform_indices = @transform_8, window_bounds = array<i64: 144, 80>}, {pipeline_mode = #tpu.pipeline_mode<synchronous>, transform_indices = @transform_9, window_bounds = array<i64: 5, 80, 120>}, {pipeline_mode = #tpu.pipeline_mode<synchronous>, transform_indices = @transform_10, window_bounds = array<i64: 1, 120>}, {pipeline_mode = #tpu.pipeline_mode<synchronous>, transform_indices = @transform_11, window_bounds = array<i64: 120, 84>}, {pipeline_mode = #tpu.pipeline_mode<synchronous>, transform_indices = @transform_12, window_bounds = array<i64: 1, 84>}, {pipeline_mode = #tpu.pipeline_mode<synchronous>, transform_indices = @transform_13, window_bounds = array<i64: 84, 128>}, {pipeline_mode = #tpu.pipeline_mode<synchronous>, transform_indices = @transform_14, window_bounds = array<i64: 1, 128>}, {transform_indices = @transform_15, window_bounds = array<i64: 8, 128>}]} {
    %cst = arith.constant 0.000000e+00 : f32
    %0 = vector.broadcast %cst : f32 to vector<252x168xf32>
    %c0 = arith.constant 0 : index
    %c0_0 = arith.constant 0 : index
    %1 = vector.load %arg1[%c0, %c0_0] : memref<256x32xf32, #tpu.memory_space<vmem>>, vector<252x32xf32>
    %c0_1 = arith.constant 0 : index
    %c0_2 = arith.constant 0 : index
    %c0_3 = arith.constant 0 : index
    %2 = vector.load %arg2[%c0_1, %c0_2, %c0_3] : memref<5x32x168xf32, #tpu.memory_space<vmem>>, vector<1x32x168xf32>
    %3 = vector.shape_cast %2 : vector<1x32x168xf32> to vector<32x168xf32>
    %cst_4 = arith.constant dense<0.000000e+00> : vector<252x168xf32>
    %4 = tpu.matmul %1, %3, %cst_4 {dimension_numbers = #tpu.dot_dimension_numbers<[1], [0], [0], [1], [0, 0, 1, 1], [], []>} : vector<252x32xf32>, vector<32x168xf32>, vector<252x168xf32> -> vector<252x168xf32>
    %5 = arith.addf %0, %4 : vector<252x168xf32>
    %c1 = arith.constant 1 : index
    %c0_5 = arith.constant 0 : index
    %6 = vector.load %arg1[%c1, %c0_5] : memref<256x32xf32, #tpu.memory_space<vmem>>, vector<252x32xf32>
    %c1_6 = arith.constant 1 : index
    %c0_7 = arith.constant 0 : index
    %c0_8 = arith.constant 0 : index
    %7 = vector.load %arg2[%c1_6, %c0_7, %c0_8] : memref<5x32x168xf32, #tpu.memory_space<vmem>>, vector<1x32x168xf32>
    %8 = vector.shape_cast %7 : vector<1x32x168xf32> to vector<32x168xf32>
    %cst_9 = arith.constant dense<0.000000e+00> : vector<252x168xf32>
    %9 = tpu.matmul %6, %8, %cst_9 {dimension_numbers = #tpu.dot_dimension_numbers<[1], [0], [0], [1], [0, 0, 1, 1], [], []>} : vector<252x32xf32>, vector<32x168xf32>, vector<252x168xf32> -> vector<252x168xf32>
    %10 = arith.addf %5, %9 : vector<252x168xf32>
    %c2 = arith.constant 2 : index
    %c0_10 = arith.constant 0 : index
    %11 = vector.load %arg1[%c2, %c0_10] : memref<256x32xf32, #tpu.memory_space<vmem>>, vector<252x32xf32>
    %c2_11 = arith.constant 2 : index
    %c0_12 = arith.constant 0 : index
    %c0_13 = arith.constant 0 : index
    %12 = vector.load %arg2[%c2_11, %c0_12, %c0_13] : memref<5x32x168xf32, #tpu.memory_space<vmem>>, vector<1x32x168xf32>
    %13 = vector.shape_cast %12 : vector<1x32x168xf32> to vector<32x168xf32>
    %cst_14 = arith.constant dense<0.000000e+00> : vector<252x168xf32>
    %14 = tpu.matmul %11, %13, %cst_14 {dimension_numbers = #tpu.dot_dimension_numbers<[1], [0], [0], [1], [0, 0, 1, 1], [], []>} : vector<252x32xf32>, vector<32x168xf32>, vector<252x168xf32> -> vector<252x168xf32>
    %15 = arith.addf %10, %14 : vector<252x168xf32>
    %c3 = arith.constant 3 : index
    %c0_15 = arith.constant 0 : index
    %16 = vector.load %arg1[%c3, %c0_15] : memref<256x32xf32, #tpu.memory_space<vmem>>, vector<252x32xf32>
    %c3_16 = arith.constant 3 : index
    %c0_17 = arith.constant 0 : index
    %c0_18 = arith.constant 0 : index
    %17 = vector.load %arg2[%c3_16, %c0_17, %c0_18] : memref<5x32x168xf32, #tpu.memory_space<vmem>>, vector<1x32x168xf32>
    %18 = vector.shape_cast %17 : vector<1x32x168xf32> to vector<32x168xf32>
    %cst_19 = arith.constant dense<0.000000e+00> : vector<252x168xf32>
    %19 = tpu.matmul %16, %18, %cst_19 {dimension_numbers = #tpu.dot_dimension_numbers<[1], [0], [0], [1], [0, 0, 1, 1], [], []>} : vector<252x32xf32>, vector<32x168xf32>, vector<252x168xf32> -> vector<252x168xf32>
    %20 = arith.addf %15, %19 : vector<252x168xf32>
    %c4 = arith.constant 4 : index
    %c0_20 = arith.constant 0 : index
    %21 = vector.load %arg1[%c4, %c0_20] : memref<256x32xf32, #tpu.memory_space<vmem>>, vector<252x32xf32>
    %c4_21 = arith.constant 4 : index
    %c0_22 = arith.constant 0 : index
    %c0_23 = arith.constant 0 : index
    %22 = vector.load %arg2[%c4_21, %c0_22, %c0_23] : memref<5x32x168xf32, #tpu.memory_space<vmem>>, vector<1x32x168xf32>
    %23 = vector.shape_cast %22 : vector<1x32x168xf32> to vector<32x168xf32>
    %cst_24 = arith.constant dense<0.000000e+00> : vector<252x168xf32>
    %24 = tpu.matmul %21, %23, %cst_24 {dimension_numbers = #tpu.dot_dimension_numbers<[1], [0], [0], [1], [0, 0, 1, 1], [], []>} : vector<252x32xf32>, vector<32x168xf32>, vector<252x168xf32> -> vector<252x168xf32>
    %25 = arith.addf %20, %24 : vector<252x168xf32>
    %c0_25 = arith.constant 0 : index
    %c0_26 = arith.constant 0 : index
    %26 = vector.load %arg3[%c0_25, %c0_26] : memref<1x168xf32, #tpu.memory_space<vmem>>, vector<1x168xf32>
    %27 = vector.broadcast %26 : vector<1x168xf32> to vector<252x168xf32>
    %28 = arith.addf %25, %27 : vector<252x168xf32>
    %cst_27 = arith.constant 0.000000e+00 : f32
    %29 = vector.broadcast %cst_27 : f32 to vector<252x168xf32>
    %30 = arith.maximumf %28, %29 : vector<252x168xf32>
    %31 = vector.extract_strided_slice %30 {offsets = [0, 0], sizes = [251, 168], strides = [1, 1]} : vector<252x168xf32> to vector<251x168xf32>
    %32 = vector.extract_strided_slice %30 {offsets = [1, 0], sizes = [251, 168], strides = [1, 1]} : vector<252x168xf32> to vector<251x168xf32>
    %33 = arith.maximumf %31, %32 : vector<251x168xf32>
    %c0_28 = arith.constant 0 : index
    %c0_29 = arith.constant 0 : index
    %34 = vector.load %arg4[%c0_28, %c0_29] : memref<128x251xf32, #tpu.memory_space<vmem>>, vector<128x251xf32>
    %cst_30 = arith.constant dense<0.000000e+00> : vector<128x168xf32>
    %35 = tpu.matmul %34, %33, %cst_30 {dimension_numbers = #tpu.dot_dimension_numbers<[1], [0], [0], [1], [0, 0, 1, 1], [], []>} : vector<128x251xf32>, vector<251x168xf32>, vector<128x168xf32> -> vector<128x168xf32>
    %36 = vector.extract_strided_slice %35 {offsets = [0, 0], sizes = [128, 162], strides = [1, 1]} : vector<128x168xf32> to vector<128x162xf32>
    %37 = vector.extract_strided_slice %35 {offsets = [0, 6], sizes = [128, 162], strides = [1, 1]} : vector<128x168xf32> to vector<128x162xf32>
    %38 = arith.maximumf %36, %37 : vector<128x162xf32>
    %c0_31 = arith.constant 0 : index
    %c0_32 = arith.constant 0 : index
    %39 = vector.load %arg5[%c0_31, %c0_32] : memref<162x84xf32, #tpu.memory_space<vmem>>, vector<162x84xf32>
    %cst_33 = arith.constant dense<0.000000e+00> : vector<128x84xf32>
    %40 = tpu.matmul %38, %39, %cst_33 {dimension_numbers = #tpu.dot_dimension_numbers<[1], [0], [0], [1], [0, 0, 1, 1], [], []>} : vector<128x162xf32>, vector<162x84xf32>, vector<128x84xf32> -> vector<128x84xf32>
    %cst_34 = arith.constant 0.000000e+00 : f32
    %41 = vector.broadcast %cst_34 : f32 to vector<124x160xf32>
    %42 = vector.extract_strided_slice %40 {offsets = [0, 0], sizes = [124, 84], strides = [1, 1]} : vector<128x84xf32> to vector<124x84xf32>
    %c0_35 = arith.constant 0 : index
    %c0_36 = arith.constant 0 : index
    %c0_37 = arith.constant 0 : index
    %43 = vector.load %arg6[%c0_35, %c0_36, %c0_37] : memref<5x84x160xf32, #tpu.memory_space<vmem>>, vector<1x84x160xf32>
    %44 = vector.shape_cast %43 : vector<1x84x160xf32> to vector<84x160xf32>
    %cst_38 = arith.constant dense<0.000000e+00> : vector<124x160xf32>
    %45 = tpu.matmul %42, %44, %cst_38 {dimension_numbers = #tpu.dot_dimension_numbers<[1], [0], [0], [1], [0, 0, 1, 1], [], []>} : vector<124x84xf32>, vector<84x160xf32>, vector<124x160xf32> -> vector<124x160xf32>
    %46 = arith.addf %41, %45 : vector<124x160xf32>
    %47 = vector.extract_strided_slice %40 {offsets = [1, 0], sizes = [124, 84], strides = [1, 1]} : vector<128x84xf32> to vector<124x84xf32>
    %c1_39 = arith.constant 1 : index
    %c0_40 = arith.constant 0 : index
    %c0_41 = arith.constant 0 : index
    %48 = vector.load %arg6[%c1_39, %c0_40, %c0_41] : memref<5x84x160xf32, #tpu.memory_space<vmem>>, vector<1x84x160xf32>
    %49 = vector.shape_cast %48 : vector<1x84x160xf32> to vector<84x160xf32>
    %cst_42 = arith.constant dense<0.000000e+00> : vector<124x160xf32>
    %50 = tpu.matmul %47, %49, %cst_42 {dimension_numbers = #tpu.dot_dimension_numbers<[1], [0], [0], [1], [0, 0, 1, 1], [], []>} : vector<124x84xf32>, vector<84x160xf32>, vector<124x160xf32> -> vector<124x160xf32>
    %51 = arith.addf %46, %50 : vector<124x160xf32>
    %52 = vector.extract_strided_slice %40 {offsets = [2, 0], sizes = [124, 84], strides = [1, 1]} : vector<128x84xf32> to vector<124x84xf32>
    %c2_43 = arith.constant 2 : index
    %c0_44 = arith.constant 0 : index
    %c0_45 = arith.constant 0 : index
    %53 = vector.load %arg6[%c2_43, %c0_44, %c0_45] : memref<5x84x160xf32, #tpu.memory_space<vmem>>, vector<1x84x160xf32>
    %54 = vector.shape_cast %53 : vector<1x84x160xf32> to vector<84x160xf32>
    %cst_46 = arith.constant dense<0.000000e+00> : vector<124x160xf32>
    %55 = tpu.matmul %52, %54, %cst_46 {dimension_numbers = #tpu.dot_dimension_numbers<[1], [0], [0], [1], [0, 0, 1, 1], [], []>} : vector<124x84xf32>, vector<84x160xf32>, vector<124x160xf32> -> vector<124x160xf32>
    %56 = arith.addf %51, %55 : vector<124x160xf32>
    %57 = vector.extract_strided_slice %40 {offsets = [3, 0], sizes = [124, 84], strides = [1, 1]} : vector<128x84xf32> to vector<124x84xf32>
    %c3_47 = arith.constant 3 : index
    %c0_48 = arith.constant 0 : index
    %c0_49 = arith.constant 0 : index
    %58 = vector.load %arg6[%c3_47, %c0_48, %c0_49] : memref<5x84x160xf32, #tpu.memory_space<vmem>>, vector<1x84x160xf32>
    %59 = vector.shape_cast %58 : vector<1x84x160xf32> to vector<84x160xf32>
    %cst_50 = arith.constant dense<0.000000e+00> : vector<124x160xf32>
    %60 = tpu.matmul %57, %59, %cst_50 {dimension_numbers = #tpu.dot_dimension_numbers<[1], [0], [0], [1], [0, 0, 1, 1], [], []>} : vector<124x84xf32>, vector<84x160xf32>, vector<124x160xf32> -> vector<124x160xf32>
    %61 = arith.addf %56, %60 : vector<124x160xf32>
    %62 = vector.extract_strided_slice %40 {offsets = [4, 0], sizes = [124, 84], strides = [1, 1]} : vector<128x84xf32> to vector<124x84xf32>
    %c4_51 = arith.constant 4 : index
    %c0_52 = arith.constant 0 : index
    %c0_53 = arith.constant 0 : index
    %63 = vector.load %arg6[%c4_51, %c0_52, %c0_53] : memref<5x84x160xf32, #tpu.memory_space<vmem>>, vector<1x84x160xf32>
    %64 = vector.shape_cast %63 : vector<1x84x160xf32> to vector<84x160xf32>
    %cst_54 = arith.constant dense<0.000000e+00> : vector<124x160xf32>
    %65 = tpu.matmul %62, %64, %cst_54 {dimension_numbers = #tpu.dot_dimension_numbers<[1], [0], [0], [1], [0, 0, 1, 1], [], []>} : vector<124x84xf32>, vector<84x160xf32>, vector<124x160xf32> -> vector<124x160xf32>
    %66 = arith.addf %61, %65 : vector<124x160xf32>
    %c0_55 = arith.constant 0 : index
    %c0_56 = arith.constant 0 : index
    %67 = vector.load %arg7[%c0_55, %c0_56] : memref<1x160xf32, #tpu.memory_space<vmem>>, vector<1x160xf32>
    %68 = vector.broadcast %67 : vector<1x160xf32> to vector<124x160xf32>
    %69 = arith.addf %66, %68 : vector<124x160xf32>
    %cst_57 = arith.constant 0.000000e+00 : f32
    %70 = vector.broadcast %cst_57 : f32 to vector<124x160xf32>
    %71 = arith.maximumf %69, %70 : vector<124x160xf32>
    %72 = vector.extract_strided_slice %71 {offsets = [0, 0], sizes = [123, 160], strides = [1, 1]} : vector<124x160xf32> to vector<123x160xf32>
    %73 = vector.extract_strided_slice %71 {offsets = [1, 0], sizes = [123, 160], strides = [1, 1]} : vector<124x160xf32> to vector<123x160xf32>
    %74 = arith.maximumf %72, %73 : vector<123x160xf32>
    %c0_58 = arith.constant 0 : index
    %c0_59 = arith.constant 0 : index
    %75 = vector.load %arg8[%c0_58, %c0_59] : memref<40x123xf32, #tpu.memory_space<vmem>>, vector<40x123xf32>
    %cst_60 = arith.constant dense<0.000000e+00> : vector<40x160xf32>
    %76 = tpu.matmul %75, %74, %cst_60 {dimension_numbers = #tpu.dot_dimension_numbers<[1], [0], [0], [1], [0, 0, 1, 1], [], []>} : vector<40x123xf32>, vector<123x160xf32>, vector<40x160xf32> -> vector<40x160xf32>
    %77 = vector.extract_strided_slice %76 {offsets = [0, 0], sizes = [40, 144], strides = [1, 1]} : vector<40x160xf32> to vector<40x144xf32>
    %78 = vector.extract_strided_slice %76 {offsets = [0, 16], sizes = [40, 144], strides = [1, 1]} : vector<40x160xf32> to vector<40x144xf32>
    %79 = arith.maximumf %77, %78 : vector<40x144xf32>
    %c0_61 = arith.constant 0 : index
    %c0_62 = arith.constant 0 : index
    %80 = vector.load %arg9[%c0_61, %c0_62] : memref<144x80xf32, #tpu.memory_space<vmem>>, vector<144x80xf32>
    %cst_63 = arith.constant dense<0.000000e+00> : vector<40x80xf32>
    %81 = tpu.matmul %79, %80, %cst_63 {dimension_numbers = #tpu.dot_dimension_numbers<[1], [0], [0], [1], [0, 0, 1, 1], [], []>} : vector<40x144xf32>, vector<144x80xf32>, vector<40x80xf32> -> vector<40x80xf32>
    %c0_64 = arith.constant 0 : index
    %c0_65 = arith.constant 0 : index
    %82 = vector.load %arg11[%c0_64, %c0_65] : memref<1x120xf32, #tpu.memory_space<vmem>>, vector<1x120xf32>
    %83 = vector.extract_strided_slice %81 {offsets = [0, 0], sizes = [8, 80], strides = [1, 1]} : vector<40x80xf32> to vector<8x80xf32>
    %c0_66 = arith.constant 0 : index
    %c0_67 = arith.constant 0 : index
    %c0_68 = arith.constant 0 : index
    %84 = vector.load %arg10[%c0_66, %c0_67, %c0_68] : memref<5x80x120xf32, #tpu.memory_space<vmem>>, vector<1x80x120xf32>
    %85 = vector.shape_cast %84 : vector<1x80x120xf32> to vector<80x120xf32>
    %cst_69 = arith.constant dense<0.000000e+00> : vector<8x120xf32>
    %86 = tpu.matmul %83, %85, %cst_69 {dimension_numbers = #tpu.dot_dimension_numbers<[1], [0], [0], [1], [0, 0, 1, 1], [], []>} : vector<8x80xf32>, vector<80x120xf32>, vector<8x120xf32> -> vector<8x120xf32>
    %87 = vector.broadcast %82 : vector<1x120xf32> to vector<8x120xf32>
    %88 = arith.addf %87, %86 : vector<8x120xf32>
    %89 = vector.extract_strided_slice %81 {offsets = [8, 0], sizes = [8, 80], strides = [1, 1]} : vector<40x80xf32> to vector<8x80xf32>
    %c1_70 = arith.constant 1 : index
    %c0_71 = arith.constant 0 : index
    %c0_72 = arith.constant 0 : index
    %90 = vector.load %arg10[%c1_70, %c0_71, %c0_72] : memref<5x80x120xf32, #tpu.memory_space<vmem>>, vector<1x80x120xf32>
    %91 = vector.shape_cast %90 : vector<1x80x120xf32> to vector<80x120xf32>
    %cst_73 = arith.constant dense<0.000000e+00> : vector<8x120xf32>
    %92 = tpu.matmul %89, %91, %cst_73 {dimension_numbers = #tpu.dot_dimension_numbers<[1], [0], [0], [1], [0, 0, 1, 1], [], []>} : vector<8x80xf32>, vector<80x120xf32>, vector<8x120xf32> -> vector<8x120xf32>
    %93 = arith.addf %88, %92 : vector<8x120xf32>
    %94 = vector.extract_strided_slice %81 {offsets = [16, 0], sizes = [8, 80], strides = [1, 1]} : vector<40x80xf32> to vector<8x80xf32>
    %c2_74 = arith.constant 2 : index
    %c0_75 = arith.constant 0 : index
    %c0_76 = arith.constant 0 : index
    %95 = vector.load %arg10[%c2_74, %c0_75, %c0_76] : memref<5x80x120xf32, #tpu.memory_space<vmem>>, vector<1x80x120xf32>
    %96 = vector.shape_cast %95 : vector<1x80x120xf32> to vector<80x120xf32>
    %cst_77 = arith.constant dense<0.000000e+00> : vector<8x120xf32>
    %97 = tpu.matmul %94, %96, %cst_77 {dimension_numbers = #tpu.dot_dimension_numbers<[1], [0], [0], [1], [0, 0, 1, 1], [], []>} : vector<8x80xf32>, vector<80x120xf32>, vector<8x120xf32> -> vector<8x120xf32>
    %98 = arith.addf %93, %97 : vector<8x120xf32>
    %99 = vector.extract_strided_slice %81 {offsets = [24, 0], sizes = [8, 80], strides = [1, 1]} : vector<40x80xf32> to vector<8x80xf32>
    %c3_78 = arith.constant 3 : index
    %c0_79 = arith.constant 0 : index
    %c0_80 = arith.constant 0 : index
    %100 = vector.load %arg10[%c3_78, %c0_79, %c0_80] : memref<5x80x120xf32, #tpu.memory_space<vmem>>, vector<1x80x120xf32>
    %101 = vector.shape_cast %100 : vector<1x80x120xf32> to vector<80x120xf32>
    %cst_81 = arith.constant dense<0.000000e+00> : vector<8x120xf32>
    %102 = tpu.matmul %99, %101, %cst_81 {dimension_numbers = #tpu.dot_dimension_numbers<[1], [0], [0], [1], [0, 0, 1, 1], [], []>} : vector<8x80xf32>, vector<80x120xf32>, vector<8x120xf32> -> vector<8x120xf32>
    %103 = arith.addf %98, %102 : vector<8x120xf32>
    %104 = vector.extract_strided_slice %81 {offsets = [32, 0], sizes = [8, 80], strides = [1, 1]} : vector<40x80xf32> to vector<8x80xf32>
    %c4_82 = arith.constant 4 : index
    %c0_83 = arith.constant 0 : index
    %c0_84 = arith.constant 0 : index
    %105 = vector.load %arg10[%c4_82, %c0_83, %c0_84] : memref<5x80x120xf32, #tpu.memory_space<vmem>>, vector<1x80x120xf32>
    %106 = vector.shape_cast %105 : vector<1x80x120xf32> to vector<80x120xf32>
    %cst_85 = arith.constant dense<0.000000e+00> : vector<8x120xf32>
    %107 = tpu.matmul %104, %106, %cst_85 {dimension_numbers = #tpu.dot_dimension_numbers<[1], [0], [0], [1], [0, 0, 1, 1], [], []>} : vector<8x80xf32>, vector<80x120xf32>, vector<8x120xf32> -> vector<8x120xf32>
    %108 = arith.addf %103, %107 : vector<8x120xf32>
    %cst_86 = arith.constant 0.000000e+00 : f32
    %109 = vector.broadcast %cst_86 : f32 to vector<8x120xf32>
    %110 = arith.maximumf %108, %109 : vector<8x120xf32>
    %c0_87 = arith.constant 0 : index
    %c0_88 = arith.constant 0 : index
    %111 = vector.load %arg12[%c0_87, %c0_88] : memref<120x84xf32, #tpu.memory_space<vmem>>, vector<120x84xf32>
    %cst_89 = arith.constant dense<0.000000e+00> : vector<8x84xf32>
    %112 = tpu.matmul %110, %111, %cst_89 {dimension_numbers = #tpu.dot_dimension_numbers<[1], [0], [0], [1], [0, 0, 1, 1], [], []>} : vector<8x120xf32>, vector<120x84xf32>, vector<8x84xf32> -> vector<8x84xf32>
    %c0_90 = arith.constant 0 : index
    %c0_91 = arith.constant 0 : index
    %113 = vector.load %arg13[%c0_90, %c0_91] : memref<1x84xf32, #tpu.memory_space<vmem>>, vector<1x84xf32>
    %114 = vector.broadcast %113 : vector<1x84xf32> to vector<8x84xf32>
    %115 = arith.addf %112, %114 : vector<8x84xf32>
    %cst_92 = arith.constant 0.000000e+00 : f32
    %116 = vector.broadcast %cst_92 : f32 to vector<8x84xf32>
    %117 = arith.maximumf %115, %116 : vector<8x84xf32>
    %c0_93 = arith.constant 0 : index
    %c0_94 = arith.constant 0 : index
    %118 = vector.load %arg14[%c0_93, %c0_94] : memref<84x128xf32, #tpu.memory_space<vmem>>, vector<84x128xf32>
    %cst_95 = arith.constant dense<0.000000e+00> : vector<8x128xf32>
    %119 = tpu.matmul %117, %118, %cst_95 {dimension_numbers = #tpu.dot_dimension_numbers<[1], [0], [0], [1], [0, 0, 1, 1], [], []>} : vector<8x84xf32>, vector<84x128xf32>, vector<8x128xf32> -> vector<8x128xf32>
    %c0_96 = arith.constant 0 : index
    %c0_97 = arith.constant 0 : index
    %120 = vector.load %arg15[%c0_96, %c0_97] : memref<1x128xf32, #tpu.memory_space<vmem>>, vector<1x128xf32>
    %121 = vector.broadcast %120 : vector<1x128xf32> to vector<8x128xf32>
    %122 = arith.addf %119, %121 : vector<8x128xf32>
    %c0_98 = arith.constant 0 : index
    %c0_99 = arith.constant 0 : index
    %123 = vector.load %arg16[%c0_98, %c0_99] : memref<8x128xf32, #tpu.memory_space<vmem>>, vector<8x128xf32>
    tpu.vector_store %arg16[%c0_98, %c0_99], %122 {strides = array<i32>} : memref<8x128xf32, #tpu.memory_space<vmem>>, vector<8x128xf32>,
    return
  }
  func.func @transform_0(%arg0: i32) -> (i32, i32) {
    %c0_i32 = arith.constant 0 : i32
    %c0_i32_0 = arith.constant 0 : i32
    return %arg0, %c0_i32 : i32, i32
  }
  func.func @transform_1(%arg0: i32) -> (i32, i32, i32) {
    %c0_i32 = arith.constant 0 : i32
    %c0_i32_0 = arith.constant 0 : i32
    %c0_i32_1 = arith.constant 0 : i32
    %c0_i32_2 = arith.constant 0 : i32
    return %c0_i32, %c0_i32_0, %c0_i32_1 : i32, i32, i32
  }
  func.func @transform_2(%arg0: i32) -> (i32, i32) {
    %c0_i32 = arith.constant 0 : i32
    %c0_i32_0 = arith.constant 0 : i32
    %c0_i32_1 = arith.constant 0 : i32
    return %c0_i32, %c0_i32_0 : i32, i32
  }
  func.func @transform_3(%arg0: i32) -> (i32, i32) {
    %c0_i32 = arith.constant 0 : i32
    %c0_i32_0 = arith.constant 0 : i32
    %c0_i32_1 = arith.constant 0 : i32
    return %c0_i32, %c0_i32_0 : i32, i32
  }
  func.func @transform_4(%arg0: i32) -> (i32, i32) {
    %c0_i32 = arith.constant 0 : i32
    %c0_i32_0 = arith.constant 0 : i32
    %c0_i32_1 = arith.constant 0 : i32
    return %c0_i32, %c0_i32_0 : i32, i32
  }
  func.func @transform_5(%arg0: i32) -> (i32, i32, i32) {
    %c0_i32 = arith.constant 0 : i32
    %c0_i32_0 = arith.constant 0 : i32
    %c0_i32_1 = arith.constant 0 : i32
    %c0_i32_2 = arith.constant 0 : i32
    return %c0_i32, %c0_i32_0, %c0_i32_1 : i32, i32, i32
  }
  func.func @transform_6(%arg0: i32) -> (i32, i32) {
    %c0_i32 = arith.constant 0 : i32
    %c0_i32_0 = arith.constant 0 : i32
    %c0_i32_1 = arith.constant 0 : i32
    return %c0_i32, %c0_i32_0 : i32, i32
  }
  func.func @transform_7(%arg0: i32) -> (i32, i32) {
    %c0_i32 = arith.constant 0 : i32
    %c0_i32_0 = arith.constant 0 : i32
    %c0_i32_1 = arith.constant 0 : i32
    return %c0_i32, %c0_i32_0 : i32, i32
  }
  func.func @transform_8(%arg0: i32) -> (i32, i32) {
    %c0_i32 = arith.constant 0 : i32
    %c0_i32_0 = arith.constant 0 : i32
    %c0_i32_1 = arith.constant 0 : i32
    return %c0_i32, %c0_i32_0 : i32, i32
  }
  func.func @transform_9(%arg0: i32) -> (i32, i32, i32) {
    %c0_i32 = arith.constant 0 : i32
    %c0_i32_0 = arith.constant 0 : i32
    %c0_i32_1 = arith.constant 0 : i32
    %c0_i32_2 = arith.constant 0 : i32
    return %c0_i32, %c0_i32_0, %c0_i32_1 : i32, i32, i32
  }
  func.func @transform_10(%arg0: i32) -> (i32, i32) {
    %c0_i32 = arith.constant 0 : i32
    %c0_i32_0 = arith.constant 0 : i32
    %c0_i32_1 = arith.constant 0 : i32
    return %c0_i32, %c0_i32_0 : i32, i32
  }
  func.func @transform_11(%arg0: i32) -> (i32, i32) {
    %c0_i32 = arith.constant 0 : i32
    %c0_i32_0 = arith.constant 0 : i32
    %c0_i32_1 = arith.constant 0 : i32
    return %c0_i32, %c0_i32_0 : i32, i32
  }
  func.func @transform_12(%arg0: i32) -> (i32, i32) {
    %c0_i32 = arith.constant 0 : i32
    %c0_i32_0 = arith.constant 0 : i32
    %c0_i32_1 = arith.constant 0 : i32
    return %c0_i32, %c0_i32_0 : i32, i32
  }
  func.func @transform_13(%arg0: i32) -> (i32, i32) {
    %c0_i32 = arith.constant 0 : i32
    %c0_i32_0 = arith.constant 0 : i32
    %c0_i32_1 = arith.constant 0 : i32
    return %c0_i32, %c0_i32_0 : i32, i32
  }
  func.func @transform_14(%arg0: i32) -> (i32, i32) {
    %c0_i32 = arith.constant 0 : i32
    %c0_i32_0 = arith.constant 0 : i32
    %c0_i32_1 = arith.constant 0 : i32
    return %c0_i32, %c0_i32_0 : i32, i32
  }
  func.func @transform_15(%arg0: i32) -> (i32, i32) {
    %c0_i32 = arith.constant 0 : i32
    %c0_i32_0 = arith.constant 0 : i32
    return %arg0, %c0_i32 : i32, i32
  }
}

</mosaic_0001>

<bundles_post_ra>
// kernel: net_forward.1
= control target key start
LH: loop header
LB: loop body
LE: loop exit
PB: predicated region body
PF: predicated region fallthrough
CT: control target
= control target key end

     0   :  { %s11341_s0 = inlined_call_operand.vmem [shape: f32[512,32], index: 0, kind: input, shape index: {}]   ;;  %s11342_s1 = inlined_call_operand.vmem [shape: f32[5,32,168], index: 1, kind: input, shape index: {}]   ;;  %s11343_s2 = inlined_call_operand.hbm [shape: f32[1,168], index: 2, kind: input, shape index: {}]   ;;  %s11344_s3 = inlined_call_operand.vmem [shape: f32[128,251], index: 3, kind: input, shape index: {}]   ;;  %s11345_s4 = inlined_call_operand.vmem [shape: f32[162,84], index: 4, kind: input, shape index: {}]   ;;  %s11346_s5 = inlined_call_operand.vmem [shape: f32[5,84,160], index: 5, kind: input, shape index: {}]   ;;  %s11347_s6 = inlined_call_operand.hbm [shape: f32[1,160], index: 6, kind: input, shape index: {}]   ;;  %s11348_s7 = inlined_call_operand.hbm [shape: f32[40,123], index: 7, kind: input, shape index: {}]   ;;  %s11349_s8 = inlined_call_operand.vmem [shape: f32[144,80], index: 8, kind: input, shape index: {}]   ;;  %s11350_s9 = inlined_call_operand.vmem [shape: f32[5,80,120], index: 9, kind: input, shape index: {}]   ;;  %s11351_s10 = inlined_call_operand.hbm [shape: f32[1,120], index: 10, kind: input, shape index: {}]   ;;  %s11352_s11 = inlined_call_operand.vmem [shape: f32[120,84], index: 11, kind: input, shape index: {}]   ;;  %s11353_s12 = inlined_call_operand.vmem [shape: f32[1,84], index: 12, kind: input, shape index: {}]   ;;  %s11354_s13 = inlined_call_operand.vmem [shape: f32[84,128], index: 13, kind: input, shape index: {}]   ;;  %s11355_s14 = inlined_call_operand.vmem [shape: f32[1,128], index: 14, kind: input, shape index: {}]   ;;  %s11356_s15 = inlined_call_operand.hbm [shape: f32[16,128], index: 15, kind: output, shape index: {}]  }
   0x1   :  { %11371 = sst [smem:[#allocation123_spill]] %s11343_s2 }
   0x2   :  { %11372 = sst [smem:[#allocation124_spill]] %s11347_s6 }
   0x3   :  { %20 = vsyncpa [#allocation3], 0 }
   0x4   :  { %21 = vsyncpa [#allocation6], 0 }
   0x5   :  { %22 = vsyncpa [#allocation9], 0 }
   0x6   :  { %23 = vsyncpa [#allocation4], 0 }
   0x7   :  { %25 = vsyncpa [#allocation4 + $0x1], 0  ;;  %s7535_s18 = smov 0   ;;  %s7537_s19 = smov 0  }
   0x8   :  { %s7539_s20 = smov 0   ;;  %s7541_s21 = smov 0  }
   0x9 LB: > { %11373 = sst [smem:[#allocation15_spill]] %s7438_s20  ;;  %s7556_s22 = sadd.s32 4294967295, %s7442_s21   ;;  %s7442_s21 = sphi %s7541_s21, %s11631_s21   ;;  %s7438_s20 = sphi %s7539_s20, %s11633_s20   ;;  %s7434_s19 = sphi %s7537_s19, %s11635_s19   ;;  %s7430_s18 = sphi %s7535_s18, %s11634_s18  }
   0xa   : > { %s6437_s23 = sadd.s32 4294967294, %s7442_s21   ;;  %s7560_s24 = sadd.s32 1, %s7442_s21  }
   0xb   : > { %11374 = sst [smem:[#allocation16_spill]] %s7560_s24  ;;  %s358_s25 = sadd.s32 1, %s7438_s20 }
   0xc   : > { %s355_s26 = ssub.s32 %s7442_s21, %s7560_s24  ;;  %p368_p0 = scmp.ne.s32.totalorder %s7438_s20, %s7434_s19 }
   0xd   : > { %p356_p1 = scmp.eq.s32.totalorder %s355_s26, 0  ;;  %p369_p2 = scmp.eq.s32.totalorder %s7556_s22, 1 }
   0xe   : > { %p374_p3 = scmp.ne.s32.totalorder %s7434_s19, %s7430_s18  ;;  %p375_p4 = scmp.eq.s32.totalorder %s6437_s23, 1 }
   0xf   : > { %s7571_s27 = scalar_select %p356_p1, %s7438_s20, %s358_s25  }
  0x10   : > { %p7573_p5 = por %p369_p2, %p368_p0  ;;  %p7577_p6 = por %p375_p4, %p374_p3 }
  0x11   : > { %11375 = sst [smem:[#allocation17_spill]] %s7571_s27  ;;  %p6438_p7 = scmp.ge.s32.totalorder %s7442_s21, 1 }
  0x12   : > { %s11376_s28 = scalar_select %p7573_p5, 1, 0 }
  0x13   : > { %s11377_s29 = scalar_select %p7577_p6, 1, 0 }
  0x14   : > { %p382_p8 = scmp.lt.s32.totalorder %s7442_s21, 3  ;;  %p11360_p9 = scmp.eq.s32.totalorder %s7556_s22, 0 }
  0x15   : > { %11378 = sst [smem:[#allocation18_spill]] %s11377_s29  ;;  %s7444_s16 = smov [#allocation5]  }
  0x16   : > { %p7584_p10 = pnand %p6438_p7, %p382_p8  ;;  %s418_s17 = sshll.u32 %s7444_s16, 4  ;;  %s419_s17 = int_to_ptr.vmem [resolvable:$true] %s418_s17 }
  0x17   : > { %s7445_s23 = smov [#allocation2]   ;;  %s7446_s27 = smov [#allocation7]  }
  0x18   : > { %s11379_s30 = scalar_select %p7584_p10, 1, 0 }
  0x19   : > { %p7198_p11 = pneg %p7584_p10  ;;  %s398_s25 = sshll.u32 %s7445_s23, 4  ;;  %s399_s25 = int_to_ptr.vmem [resolvable:$true] %s398_s25 }
  0x1a   : > { %s428_s20 = sshll.u32 %s7446_s27, 4  ;;  %s7277_s16 = scalar_lea.vmem %s419_s17, 32  ;;  %s7596_s20 = int_to_ptr.vmem [resolvable:$true] %s428_s20 }
  0x1b   : > { %p7592_p12 = pnand %p11360_p9, %p7198_p11  ;;  %p7278_p0 = scmp.ne.s32.totalorder %s419_s17, %s7277_s16 }
  0x1c   : > { %p7285_p3 = scmp.lt.s32.totalorder %s419_s17, %s419_s17  ;;  %p7286_p4 = scmp.lt.s32.totalorder %s7277_s16, %s7277_s16 }
  0x1d   : > { %p7268_p13 = pneg %p7592_p12 }
  0x1e   : > { %p7287_p7 = por %p7286_p4, %p7285_p3 }
  0x1f   : > { %p7280_p1 = pnand %p7278_p0, %p7268_p13 }
  0x21   : > { %p7281_p2 = pneg %p7280_p1 }
  0x23   : > { %p7288_p8 = pnand %p7287_p7, %p7281_p2 }
  0x25   : > { %7291 = shalt.err (!%p7288_p8)
}
  0x26   : > { %s11381_s6 = sld [smem:[#allocation124_spill]]  ;;  %s7303_s27 = scalar_lea.vmem %s399_s25, 32 }
  0x27   : > { %p7304_p11 = scmp.ne.s32.totalorder %s399_s25, %s7303_s27  ;;  %p7311_p0 = scmp.lt.s32.totalorder %s399_s25, %s399_s25 }
  0x28   : > { %p7312_p1 = scmp.lt.s32.totalorder %s7303_s27, %s7303_s27 }
  0x29   : > { %p7306_p9 = pnand %p7304_p11, %p7268_p13 }
  0x2a   : > { %p7313_p5 = por %p7312_p1, %p7311_p0 }
  0x2b   : > { %p7307_p6 = pneg %p7306_p9 }
  0x2c   : > { %7204 = dma.hbm_to_vmem [thread:$0]  (!%p7592_p12), %s11381_s6, 32, %s419_s17, [#allocation6]  }
  0x2d   : > { %p7314_p10 = pnand %p7313_p5, %p7307_p6 }
  0x2f   : > { %7317 = shalt.err (!%p7314_p10)
}
  0x30   : > { %s11382_s2 = sld [smem:[#allocation123_spill]]  ;;  %s7329_s24 = scalar_lea.vmem %s7596_s20, 640 }
  0x31   : > { %p7330_p2 = scmp.ne.s32.totalorder %s7596_s20, %s7329_s24  ;;  %p7337_p4 = scmp.lt.s32.totalorder %s7596_s20, %s7596_s20 }
  0x32   : > { %p7338_p5 = scmp.lt.s32.totalorder %s7329_s24, %s7329_s24 }
  0x33   : > { %p7332_p9 = pnand %p7330_p2, %p7268_p13 }
  0x34   : > { %p7339_p6 = por %p7338_p5, %p7337_p4 }
  0x35   : > { %p7333_p3 = pneg %p7332_p9 }
  0x36   : > { %7201 = dma.hbm_to_vmem [thread:$0]  (!%p7592_p12), %s11382_s2, 32, %s399_s25, [#allocation3]  }
  0x37   : > { %p7340_p10 = pnand %p7339_p6, %p7333_p3 }
  0x39   : > { %7343 = shalt.err (!%p7340_p10)
}
  0x3a   : > { %s7447_s17 = smov 128   ;;  %s7448_s29 = smov 8  }
  0x3b   : > { %7207 = dma.hbm_to_vmem [thread:$0]  (!%p7592_p12), %s11348_s7, 640, %s7596_s20, [#allocation6], %s7447_s17, %s7447_s17, %s7448_s29  }
  0x3c   : > { %s7449_s27 = smov [#allocation8]  }
  0x3d   : > { %s448_s16 = sshll.u32 %s7449_s27, 4  ;;  %s449_s16 = int_to_ptr.vmem [resolvable:$true] %s448_s16 }
  0x3e   : > { %s7355_s2 = scalar_lea.vmem %s449_s16, 16  ;;  %s7362_s24 = scalar_lea.vmem %s449_s16, 32 }
  0x3f   : > { %p7356_p7 = scmp.ne.s32.totalorder %s449_s16, %s7355_s2  ;;  %p7363_p0 = scmp.lt.s32.totalorder %s449_s16, %s449_s16 }
  0x40   : > { %p7364_p1 = scmp.lt.s32.totalorder %s7362_s24, %s7355_s2 }
  0x41   : > { %p7358_p8 = pnand %p7356_p7, %p7268_p13 }
  0x42   : > { %p7365_p2 = por %p7364_p1, %p7363_p0 }
  0x43   : > { %p7359_p11 = pneg %p7358_p8 }
  0x45   : > { %p7366_p9 = pnand %p7365_p2, %p7359_p11 }
  0x47   : > { %7369 = shalt.err (!%p7366_p9)
}
  0x48   : > { %7210 = dma.hbm_to_vmem [thread:$0]  (!%p7592_p12), %s11351_s10, 16, %s449_s16, [#allocation9]  }
  0x49   : > { %p11383_p3 = scmp.ne.s32.totalorder %s11379_s30, 0 }
  0x4b   : > { %482 = sbr.rel (%p11383_p3) target bundleno = 2805 (0xaf5), region = 80 }
  0x50   : > { %p11384_p4 = scmp.eq.s32.totalorder %s7556_s22, 0 }
  0x52   : > { %7413 = dma.done.wait (%p11384_p4), [#allocation3], 32   ;;  %p11385_p13 = pmov %p11384_p4 }
  0x53   : > { %p11386_p5 = pmov %p11384_p4 }
  0x54   : > { %7415 = vsyncadd (%p11385_p13), [#allocation3], 4294967264 }
  0x55   : > { %7417 = dma.done.wait (%p11386_p5), [#allocation6], 672   ;;  %p11387_p6 = pmov %p11384_p4 }
  0x56   : > { %p11388_p10 = pmov %p11384_p4 }
  0x57   : > { %7419 = vsyncadd (%p11387_p6), [#allocation6], 4294966624 }
  0x58   : > { %7421 = dma.done.wait (%p11388_p10), [#allocation9], 16   ;;  %p11389_p12 = pmov %p11384_p4 }
  0x59   : > { %s6450_s2 = sshll.u32 %s7556_s22, 5  ;;  %v11364_v0 = vmov 0.0   ;;  %v6459_v1 = vld [vmem:[%s11342_s1 + $0x78] sm:$0xff]  ;;  %v6458_v3 = vld [vmem:[%s11342_s1 + $0x70] sm:$0xff]  ;;  %v6457_v5 = vld [vmem:[%s11342_s1 + $0x68] sm:$0xff]  ;;  %vm629_vm0 = vcmask 261120  }
  0x5a   : > { %7423 = vsyncadd (%p11389_p12), [#allocation9], 4294967280  ;;  %790 = vmatprep.mubr.f32.mxu0 %v11364_v0  ;;  %1143 = vmatprep.mubr.f32.mxu1 %v11364_v0  ;;  %p543_p7 = scmp.lt.s32.totalorder %s6450_s2, 63  ;;  %v587_v2 = vld [vmem:[%s11342_s1 + $0x38] sm:$0xff]  ;;  %v586_v4 = vld [vmem:[%s11342_s1 + $0x30] sm:$0xff]  ;;  %vm2914_vm1 = vcmask 1046528  }
  0x5b   : > { %750 = vmatprep.subr.mxu0 %v6459_v1  ;;  %1103 = vmatprep.subr.mxu1 %v587_v2  ;;  %v585_v6 = vld [vmem:[%s11342_s1 + $0x28] sm:$0xff]  ;;  %v6456_v7 = vld [vmem:[%s11342_s1 + $0x60] sm:$0xff]  ;;  %v6455_v9 = vld [vmem:[%s11342_s1 + $0x58] sm:$0xff]  ;;  %vm3201_vm2 = vcmask 1006592   ;;  %vm3250_vm3 = vcmask 1042432   ;;  %vm3665_vm4 = vcmask 1041408  }
  0x5c   : > { %s11637_s2 = smov (!%p543_p7, %s6450_s2), 63  ;;  %751 = vmatpush1.msra.mxu0 %v6458_v3  ;;  %1104 = vmatpush1.msra.mxu1 %v586_v4  ;;  %v584_v8 = vld [vmem:[%s11342_s1 + $0x20] sm:$0xff]  ;;  %v583_v10 = vld [vmem:[%s11342_s1 + $0x18] sm:$0xff]  ;;  %v6454_v11 = vld [vmem:[%s11342_s1 + $0x50] sm:$0xff]  ;;  %vm3939_vm5 = vcmask 1043456   ;;  %vm3514_vm6 = vcmask 998400  }
  0x5d   : > { %s6451_s25 = sshll.u32 %s11637_s2, 3  ;;  %752 = vmatprep.subr.mxu0 %v6457_v5  ;;  %1105 = vmatprep.subr.mxu1 %v585_v6  ;;  %v582_v12 = vld [vmem:[%s11342_s1 + $0x10] sm:$0xff]  ;;  %v6453_v13 = vld [vmem:[%s11342_s1 + $0x48] sm:$0xff]  ;;  %v6452_v15 = vld [vmem:[%s11342_s1 + $0x40] sm:$0xff]  ;;  %s7451_s2 = smov 122   ;;  %vm3616_vm7 = vcmask 277504  }
  0x5e   : > { %s7693_s17 = scalar_lea.vmem %s11341_s0, %s6451_s25  ;;  %753 = vmatpush1.msra.mxu0 %v6456_v7  ;;  %1106 = vmatpush1.msra.mxu1 %v584_v8  ;;  %v581_v14 = vld [vmem:[%s11342_s1 + $0x8] sm:$0xff]  ;;  %v580_v16 = vld [vmem:[%s11342_s1] sm:$0xff]  ;;  %v6531_v21 = vld [vmem:[%s11342_s1 + $0xb8] sm:$0xff]  ;;  %vm3906_vm8 = vcmask 687104   ;;  %vm4329_vm9 = vcmask 1045504   ;;  %vm4615_vm10 = vcmask 1044480  }
  0x5f   : > { %754 = vmatprep.subr.mxu0 %v6455_v9  ;;  %1107 = vmatprep.subr.mxu1 %v583_v10  ;;  %v588_v17 = vld [vmem:[%s7693_s17 + $0x1] sm:$0xff]  ;;  %v589_v19 = vld [vmem:[%s7693_s17 + $0x9] sm:$0xff]  ;;  %v590_v23 = vld [vmem:[%s7693_s17 + $0x11] sm:$0xff]  ;;  %s7452_s6 = smov 112   ;;  %vm5548_vm11 = vcmask 916480   ;;  %vm5592_vm12 = vcmask 130048  }
  0x60   : > { %755 = vmatpush1.msra.mxu0 %v6454_v11  ;;  %1108 = vmatpush1.msra.mxu1 %v582_v12  ;;  %v548_v18 = vld [vmem:[%s7693_s17] sm:$0xff]  ;;  %v549_v20 = vld [vmem:[%s7693_s17 + $0x8] sm:$0xff]  ;;  %v6530_v22 = vld [vmem:[%s11342_s1 + $0xb0] sm:$0xff]  ;;  %vm7453_vm13 = vmmov 0   ;;  %vm5709_vm14 = vcmask 654336   ;;  %vm6153_vm15 = vcmask 982016  }
  0x61   : > { %756 = vmatprep.subr.mxu0 %v6453_v13  ;;  %1109 = vmatprep.subr.mxu1 %v581_v14  ;;  %v550_v24 = vld [vmem:[%s7693_s17 + $0x10] sm:$0xff]  ;;  %v591_v25 = vld [vmem:[%s7693_s17 + $0x19] sm:$0xff]  ;;  %v6529_v27 = vld [vmem:[%s11342_s1 + $0xa8] sm:$0xff]  ;;  %s539_s23 = sand.u32 1, %s7434_s19   ;;  %s6921_s30 = sshll.u32 %s7556_s22, 7 }
  0x62   : > { %757 = vmatpush1.msra.mxu0 %v6452_v15  ;;  %1110 = vmatpush1.msra.mxu1 %v580_v16  ;;  %v551_v26 = vld [vmem:[%s7693_s17 + $0x18] sm:$0xff]  ;;  %v6528_v28 = vld [vmem:[%s11342_s1 + $0xa0] sm:$0xff]  ;;  %v6526_v32 = vld [vmem:[%s11342_s1 + $0x90] sm:$0xff]  ;;  %s6449_s25 = sshll.u32 %s539_s23, 3  ;;  %s11306_s27 = scalar_lea.hbm %s11356_s15, %s6921_s30 }
  0x63   : > { %6460 = vmatmul.mubr.msk.f32.vlgmr.msra.gmra.mxu0 %vm629_vm0, %v588_v17  ;;  %6492 = vmatmul.mubr.msk.f32.vlgmr.msra.gmra.mxu1 %vm629_vm0, %v548_v18  ;;  %v592_v29 = vld [vmem:[%s7693_s17 + $0x21] sm:$0xff]  ;;  %v6527_v31 = vld [vmem:[%s11342_s1 + $0x98] sm:$0xff]  ;;  %v593_v33 = vld [vmem:[%s7693_s17 + $0x29] sm:$0xff]  ;;  %s541_s26 = scalar_lea.vmem [#allocation10], %s6449_s25  ;;  %s6324_s16 = scalar_lea.sflag [#allocation4], %s539_s23 }
  0x64   : > { %796 = vmatprep.mubr.f32.mxu0 %v11364_v0  ;;  %1149 = vmatprep.mubr.f32.mxu1 %v11364_v0  ;;  %v552_v30 = vld [vmem:[%s7693_s17 + $0x20] sm:$0xff]  ;;  %v553_v34 = vld [vmem:[%s7693_s17 + $0x28] sm:$0xff]  ;;  %v6571_v35 = vld [vmem:[%s11342_s1 + $0xf8] sm:$0xff]  ;;  %p11628_p11 = scmp.ne.s32.totalorder %s11376_s28, 0 }
  0x65   : > { %1497 = vmatprep.subr.mxu0 %v6531_v21  ;;  %v594_v36 = vld [vmem:[%s7693_s17 + $0x31] sm:$0xff]  ;;  %v6525_v39 = vld [vmem:[%s11342_s1 + $0x88] sm:$0xff]  ;;  %v6524_v40 = vld [vmem:[%s11342_s1 + $0x80] sm:$0xff]  ;;  %1955 = vmatprep.subr.mxu1 %v6571_v35 }
  0x66   : > { %1498 = vmatpush1.msra.mxu0 %v6530_v22  ;;  %v6570_v37 = vld [vmem:[%s11342_s1 + $0xf0] sm:$0xff]  ;;  %v6569_v41 = vld [vmem:[%s11342_s1 + $0xe8] sm:$0xff]  ;;  %v6568_v42 = vld [vmem:[%s11342_s1 + $0xe0] sm:$0xff] }
  0x67   : > { %6461 = vmatmul.mubr.msk.f32.gmra.mxu0 %vm629_vm0, %v589_v19  ;;  %6493 = vmatmul.mubr.msk.f32.gmra.mxu1 %vm629_vm0, %v549_v20  ;;  %v554_v38 = vld [vmem:[%s7693_s17 + $0x30] sm:$0xff]  ;;  %v595_v43 = vld [vmem:[%s7693_s17 + $0x39] sm:$0xff]  ;;  %v596_v47 = vld [vmem:[%s7693_s17 + $0x41] sm:$0xff] }
  0x68   : > { %802 = vmatprep.mubr.f32.mxu0 %v11364_v0  ;;  %1155 = vmatprep.mubr.f32.mxu1 %v11364_v0  ;;  %v555_v44 = vld [vmem:[%s7693_s17 + $0x38] sm:$0xff]  ;;  %v6566_v46 = vld [vmem:[%s11342_s1 + $0xd0] sm:$0xff]  ;;  %v556_v48 = vld [vmem:[%s7693_s17 + $0x40] sm:$0xff] }
  0x69   : > { %1499 = vmatprep.subr.mxu0 %v6529_v27  ;;  %1956 = vmatpush1.msra.mxu1 %v6570_v37  ;;  %v6567_v45 = vld [vmem:[%s11342_s1 + $0xd8] sm:$0xff]  ;;  %v6565_v49 = vld [vmem:[%s11342_s1 + $0xc8] sm:$0xff]  ;;  %v6564_v50 = vld [vmem:[%s11342_s1 + $0xc0] sm:$0xff] }
  0x6a   : > { %1500 = vmatpush1.msra.mxu0 %v6528_v28  ;;  %1957 = vmatprep.subr.mxu1 %v6569_v41  ;;  %v597_v51 = vld [vmem:[%s7693_s17 + $0x49] sm:$0xff]  ;;  %v6611_v53 = vld [vmem:[%s11342_s1 + $0x138] sm:$0xff]  ;;  %v600_v58 = vld [vmem:[%s7693_s17 + $0x61] sm:$0xff] }
  0x6b   : > { %6462 = vmatmul.mubr.msk.f32.gmra.mxu0 %vm629_vm0, %v590_v23  ;;  %6494 = vmatmul.mubr.msk.f32.gmra.mxu1 %vm629_vm0, %v550_v24  ;;  %v557_v52 = vld [vmem:[%s7693_s17 + $0x48] sm:$0xff]  ;;  %v598_v54 = vld [vmem:[%s7693_s17 + $0x51] sm:$0xff]  ;;  %v599_v56 = vld [vmem:[%s7693_s17 + $0x59] sm:$0xff] }
  0x6c   : > { %808 = vmatprep.mubr.f32.mxu0 %v11364_v0  ;;  %1161 = vmatprep.mubr.f32.mxu1 %v11364_v0  ;;  %v558_v55 = vld [vmem:[%s7693_s17 + $0x50] sm:$0xff]  ;;  %v559_v57 = vld [vmem:[%s7693_s17 + $0x58] sm:$0xff]  ;;  %v560_v59 = vld [vmem:[%s7693_s17 + $0x60] sm:$0xff] }
  0x6d   : > { %1501 = vmatprep.subr.mxu0 %v6527_v31  ;;  %1958 = vmatpush1.msra.mxu1 %v6568_v42  ;;  %v601_v60 = vld [vmem:[%s7693_s17 + $0x69] sm:$0xff]  ;;  %v602_v62 = vld [vmem:[%s7693_s17 + $0x71] sm:$0xff]  ;;  %v603_v1 = vld [vmem:[%s7693_s17 + $0x79] sm:$0xff] }
  0x6e   : > { %1502 = vmatpush1.msra.mxu0 %v6526_v32  ;;  %1959 = vmatprep.subr.mxu1 %v6567_v45  ;;  %v561_v61 = vld [vmem:[%s7693_s17 + $0x68] sm:$0xff]  ;;  %v562_v63 = vld [vmem:[%s7693_s17 + $0x70] sm:$0xff]  ;;  %v563_v2 = vld [vmem:[%s7693_s17 + $0x78] sm:$0xff] }
  0x6f   : > { %6463 = vmatmul.mubr.msk.f32.gmra.mxu0 %vm629_vm0, %v591_v25  ;;  %6495 = vmatmul.mubr.msk.f32.gmra.mxu1 %vm629_vm0, %v551_v26  ;;  %v604_v3 = vld [vmem:[%s7693_s17 + $0x81] sm:$0xff]  ;;  %v605_v5 = vld [vmem:[%s7693_s17 + $0x89] sm:$0xff]  ;;  %v606_v7 = vld [vmem:[%s7693_s17 + $0x91] sm:$0xff] }
  0x70   : > { %814 = vmatprep.mubr.f32.mxu0 %v11364_v0  ;;  %1167 = vmatprep.mubr.f32.mxu1 %v11364_v0  ;;  %v564_v4 = vld [vmem:[%s7693_s17 + $0x80] sm:$0xff]  ;;  %v565_v6 = vld [vmem:[%s7693_s17 + $0x88] sm:$0xff]  ;;  %v566_v8 = vld [vmem:[%s7693_s17 + $0x90] sm:$0xff] }
  0x71   : > { %1503 = vmatprep.subr.mxu0 %v6525_v39  ;;  %1960 = vmatpush1.msra.mxu1 %v6566_v46  ;;  %v607_v9 = vld [vmem:[%s7693_s17 + $0x99] sm:$0xff]  ;;  %v608_v11 = vld [vmem:[%s7693_s17 + $0xa1] sm:$0xff]  ;;  %v609_v13 = vld [vmem:[%s7693_s17 + $0xa9] sm:$0xff] }
  0x72   : > { %1504 = vmatpush1.msra.mxu0 %v6524_v40  ;;  %1961 = vmatprep.subr.mxu1 %v6565_v49  ;;  %v567_v10 = vld [vmem:[%s7693_s17 + $0x98] sm:$0xff]  ;;  %v568_v12 = vld [vmem:[%s7693_s17 + $0xa0] sm:$0xff]  ;;  %v569_v14 = vld [vmem:[%s7693_s17 + $0xa8] sm:$0xff] }
  0x73   : > { %6464 = vmatmul.mubr.msk.f32.gmra.mxu0 %vm629_vm0, %v592_v29  ;;  %6496 = vmatmul.mubr.msk.f32.gmra.mxu1 %vm629_vm0, %v552_v30  ;;  %v610_v15 = vld [vmem:[%s7693_s17 + $0xb1] sm:$0xff]  ;;  %v611_v17 = vld [vmem:[%s7693_s17 + $0xb9] sm:$0xff]  ;;  %v612_v19 = vld [vmem:[%s7693_s17 + $0xc1] sm:$0xff] }
  0x74   : > { %820 = vmatprep.mubr.f32.mxu0 %v11364_v0  ;;  %1173 = vmatprep.mubr.f32.mxu1 %v11364_v0  ;;  %v570_v16 = vld [vmem:[%s7693_s17 + $0xb0] sm:$0xff]  ;;  %v571_v18 = vld [vmem:[%s7693_s17 + $0xb8] sm:$0xff]  ;;  %v572_v20 = vld [vmem:[%s7693_s17 + $0xc0] sm:$0xff] }
  0x75   : > { %1962 = vmatpush1.msra.mxu1 %v6564_v50  ;;  %2413 = vmatprep.subr.mxu0 %v6611_v53  ;;  %v613_v21 = vld [vmem:[%s7693_s17 + $0xc9] sm:$0xff]  ;;  %v614_v23 = vld [vmem:[%s7693_s17 + $0xd1] sm:$0xff]  ;;  %v615_v25 = vld [vmem:[%s7693_s17 + $0xd9] sm:$0xff] }
  0x76   : > { %v573_v22 = vld [vmem:[%s7693_s17 + $0xc8] sm:$0xff]  ;;  %v574_v24 = vld [vmem:[%s7693_s17 + $0xd0] sm:$0xff]  ;;  %v575_v26 = vld [vmem:[%s7693_s17 + $0xd8] sm:$0xff] }
  0x77   : > { %6465 = vmatmul.mubr.msk.f32.gmra.mxu0 %vm629_vm0, %v593_v33  ;;  %6497 = vmatmul.mubr.msk.f32.gmra.mxu1 %vm629_vm0, %v553_v34  ;;  %v616_v27 = vld [vmem:[%s7693_s17 + $0xe1] sm:$0xff]  ;;  %v617_v29 = vld [vmem:[%s7693_s17 + $0xe9] sm:$0xff]  ;;  %v618_v31 = vld [vmem:[%s7693_s17 + $0xf1] sm:$0xff] }
  0x78   : > { %826 = vmatprep.mubr.f32.mxu0 %v11364_v0  ;;  %1179 = vmatprep.mubr.f32.mxu1 %v11364_v0  ;;  %v576_v28 = vld [vmem:[%s7693_s17 + $0xe0] sm:$0xff]  ;;  %v577_v30 = vld [vmem:[%s7693_s17 + $0xe8] sm:$0xff]  ;;  %v578_v32 = vld [vmem:[%s7693_s17 + $0xf0] sm:$0xff] }
  0x79   : > { %v619_v33 = vld [vmem:[%s7693_s17 + $0xf9] sm:$0xf]  ;;  %v1336_v35 = vld [vmem:[%s7693_s17 + $0x2] sm:$0xff]  ;;  %v6610_v37 = vld [vmem:[%s11342_s1 + $0x130] sm:$0xff] }
  0x7a   : > { %v579_v34 = vld [vmem:[%s7693_s17 + $0xf8] sm:$0xf]  ;;  %v1337_v39 = vld [vmem:[%s7693_s17 + $0xa] sm:$0xff]  ;;  %v6608_v41 = vld [vmem:[%s11342_s1 + $0x120] sm:$0xff] }
  0x7b   : > { %6466 = vmatmul.mubr.msk.f32.gmra.mxu0 %vm629_vm0, %v594_v36  ;;  %6498 = vmatmul.mubr.msk.f32.gmra.mxu1 %vm629_vm0, %v554_v38  ;;  %v1794_v36 = vld [vmem:[%s7693_s17 + $0x3] sm:$0xff]  ;;  %v1795_v40 = vld [vmem:[%s7693_s17 + $0xb] sm:$0xff]  ;;  %v6607_v42 = vld [vmem:[%s11342_s1 + $0x118] sm:$0xff] }
  0x7c   : > { %832 = vmatprep.mubr.f32.mxu0 %v11364_v0  ;;  %1185 = vmatprep.mubr.f32.mxu1 %v11364_v0  ;;  %v6609_v38 = vld [vmem:[%s11342_s1 + $0x128] sm:$0xff]  ;;  %v6606_v45 = vld [vmem:[%s11342_s1 + $0x110] sm:$0xff]  ;;  %v6604_v49 = vld [vmem:[%s11342_s1 + $0x100] sm:$0xff] }
  0x7d   : > { %v6605_v46 = vld [vmem:[%s11342_s1 + $0x108] sm:$0xff] }
  0x7e   : > { %v1340_v50 = vld [vmem:[%s7693_s17 + $0x22] sm:$0xff]  ;;  %v1799_v53 = vld [vmem:[%s7693_s17 + $0x2b] sm:$0xff] }
  0x7f   : > { %6467 = vmatmul.mubr.msk.f32.gmra.mxu0 %vm629_vm0, %v595_v43  ;;  %6499 = vmatmul.mubr.msk.f32.gmra.mxu1 %vm629_vm0, %v555_v44  ;;  %v1338_v43 = vld [vmem:[%s7693_s17 + $0x12] sm:$0xff] }
  0x80   : > { %838 = vmatprep.mubr.f32.mxu0 %v11364_v0  ;;  %1191 = vmatprep.mubr.f32.mxu1 %v11364_v0  ;;  %v1796_v44 = vld [vmem:[%s7693_s17 + $0x13] sm:$0xff] }
  0x83   : > { %6468 = vmatmul.mubr.msk.f32.gmra.mxu0 %vm629_vm0, %v596_v47  ;;  %6500 = vmatmul.mubr.msk.f32.gmra.mxu1 %vm629_vm0, %v556_v48  ;;  %v1339_v47 = vld [vmem:[%s7693_s17 + $0x1a] sm:$0xff] }
  0x84   : > { %844 = vmatprep.mubr.f32.mxu0 %v11364_v0  ;;  %1197 = vmatprep.mubr.f32.mxu1 %v11364_v0  ;;  %v1797_v48 = vld [vmem:[%s7693_s17 + $0x1b] sm:$0xff] }
  0x87   : > { %6469 = vmatmul.mubr.msk.f32.gmra.mxu0 %vm629_vm0, %v597_v51  ;;  %6501 = vmatmul.mubr.msk.f32.gmra.mxu1 %vm629_vm0, %v557_v52  ;;  %v1798_v51 = vld [vmem:[%s7693_s17 + $0x23] sm:$0xff] }
  0x88   : > { %850 = vmatprep.mubr.f32.mxu0 %v11364_v0  ;;  %1203 = vmatprep.mubr.f32.mxu1 %v11364_v0  ;;  %v1341_v52 = vld [vmem:[%s7693_s17 + $0x2a] sm:$0xff] }
  0x8b   : > { %6470 = vmatmul.mubr.msk.f32.gmra.mxu0 %vm629_vm0, %v598_v54  ;;  %6502 = vmatmul.mubr.msk.f32.gmra.mxu1 %vm629_vm0, %v558_v55  ;;  %v1342_v54 = vld [vmem:[%s7693_s17 + $0x32] sm:$0xff] }
  0x8c   : > { %856 = vmatprep.mubr.f32.mxu0 %v11364_v0  ;;  %1209 = vmatprep.mubr.f32.mxu1 %v11364_v0  ;;  %v1800_v55 = vld [vmem:[%s7693_s17 + $0x33] sm:$0xff] }
  0x8f   : > { %6471 = vmatmul.mubr.msk.f32.gmra.mxu0 %vm629_vm0, %v599_v56  ;;  %6503 = vmatmul.mubr.msk.f32.gmra.mxu1 %vm629_vm0, %v559_v57  ;;  %v1343_v56 = vld [vmem:[%s7693_s17 + $0x3a] sm:$0xff] }
  0x90   : > { %862 = vmatprep.mubr.f32.mxu0 %v11364_v0  ;;  %1215 = vmatprep.mubr.f32.mxu1 %v11364_v0  ;;  %v1801_v57 = vld [vmem:[%s7693_s17 + $0x3b] sm:$0xff] }
  0x93   : > { %6472 = vmatmul.mubr.msk.f32.gmra.mxu0 %vm629_vm0, %v600_v58  ;;  %6504 = vmatmul.mubr.msk.f32.gmra.mxu1 %vm629_vm0, %v560_v59  ;;  %v1344_v58 = vld [vmem:[%s7693_s17 + $0x42] sm:$0xff] }
  0x94   : > { %868 = vmatprep.mubr.f32.mxu0 %v11364_v0  ;;  %1221 = vmatprep.mubr.f32.mxu1 %v11364_v0  ;;  %v1802_v59 = vld [vmem:[%s7693_s17 + $0x43] sm:$0xff] }
  0x97   : > { %6473 = vmatmul.mubr.msk.f32.gmra.mxu0 %vm629_vm0, %v601_v60  ;;  %6505 = vmatmul.mubr.msk.f32.gmra.mxu1 %vm629_vm0, %v561_v61  ;;  %v1345_v60 = vld [vmem:[%s7693_s17 + $0x4a] sm:$0xff] }
  0x98   : > { %874 = vmatprep.mubr.f32.mxu0 %v11364_v0  ;;  %1227 = vmatprep.mubr.f32.mxu1 %v11364_v0  ;;  %v1803_v61 = vld [vmem:[%s7693_s17 + $0x4b] sm:$0xff] }
  0x9b   : > { %6474 = vmatmul.mubr.msk.f32.gmra.mxu0 %vm629_vm0, %v602_v62  ;;  %6506 = vmatmul.mubr.msk.f32.gmra.mxu1 %vm629_vm0, %v562_v63  ;;  %v1346_v62 = vld [vmem:[%s7693_s17 + $0x52] sm:$0xff] }
  0x9c   : > { %880 = vmatprep.mubr.f32.mxu0 %v11364_v0  ;;  %1233 = vmatprep.mubr.f32.mxu1 %v11364_v0  ;;  %v1804_v63 = vld [vmem:[%s7693_s17 + $0x53] sm:$0xff] }
  0x9f   : > { %6475 = vmatmul.mubr.msk.f32.gmra.mxu0 %vm629_vm0, %v603_v1  ;;  %6507 = vmatmul.mubr.msk.f32.gmra.mxu1 %vm629_vm0, %v563_v2  ;;  %v1347_v1 = vld [vmem:[%s7693_s17 + $0x5a] sm:$0xff] }
  0xa0   : > { %886 = vmatprep.mubr.f32.mxu0 %v11364_v0  ;;  %1239 = vmatprep.mubr.f32.mxu1 %v11364_v0  ;;  %v1805_v2 = vld [vmem:[%s7693_s17 + $0x5b] sm:$0xff] }
  0xa3   : > { %6476 = vmatmul.mubr.msk.f32.gmra.mxu0 %vm629_vm0, %v604_v3  ;;  %6508 = vmatmul.mubr.msk.f32.gmra.mxu1 %vm629_vm0, %v564_v4  ;;  %v1348_v3 = vld [vmem:[%s7693_s17 + $0x62] sm:$0xff] }
  0xa4   : > { %892 = vmatprep.mubr.f32.mxu0 %v11364_v0  ;;  %1245 = vmatprep.mubr.f32.mxu1 %v11364_v0  ;;  %v1806_v4 = vld [vmem:[%s7693_s17 + $0x63] sm:$0xff] }
  0xa7   : > { %6477 = vmatmul.mubr.msk.f32.gmra.mxu0 %vm629_vm0, %v605_v5  ;;  %6509 = vmatmul.mubr.msk.f32.gmra.mxu1 %vm629_vm0, %v565_v6  ;;  %v1349_v5 = vld [vmem:[%s7693_s17 + $0x6a] sm:$0xff] }
  0xa8   : > { %898 = vmatprep.mubr.f32.mxu0 %v11364_v0  ;;  %1251 = vmatprep.mubr.f32.mxu1 %v11364_v0  ;;  %v1807_v6 = vld [vmem:[%s7693_s17 + $0x6b] sm:$0xff] }
  0xab   : > { %6478 = vmatmul.mubr.msk.f32.gmra.mxu0 %vm629_vm0, %v606_v7  ;;  %6510 = vmatmul.mubr.msk.f32.gmra.mxu1 %vm629_vm0, %v566_v8  ;;  %v1350_v7 = vld [vmem:[%s7693_s17 + $0x72] sm:$0xff] }
  0xac   : > { %904 = vmatprep.mubr.f32.mxu0 %v11364_v0  ;;  %1257 = vmatprep.mubr.f32.mxu1 %v11364_v0  ;;  %v1808_v8 = vld [vmem:[%s7693_s17 + $0x73] sm:$0xff] }
  0xaf   : > { %6479 = vmatmul.mubr.msk.f32.gmra.mxu0 %vm629_vm0, %v607_v9  ;;  %6511 = vmatmul.mubr.msk.f32.gmra.mxu1 %vm629_vm0, %v567_v10  ;;  %v1351_v9 = vld [vmem:[%s7693_s17 + $0x7a] sm:$0xff] }
  0xb0   : > { %910 = vmatprep.mubr.f32.mxu0 %v11364_v0  ;;  %1263 = vmatprep.mubr.f32.mxu1 %v11364_v0  ;;  %v1809_v10 = vld [vmem:[%s7693_s17 + $0x7b] sm:$0xff] }
  0xb3   : > { %6480 = vmatmul.mubr.msk.f32.gmra.mxu0 %vm629_vm0, %v608_v11  ;;  %6512 = vmatmul.mubr.msk.f32.gmra.mxu1 %vm629_vm0, %v568_v12  ;;  %v1352_v11 = vld [vmem:[%s7693_s17 + $0x82] sm:$0xff] }
  0xb4   : > { %916 = vmatprep.mubr.f32.mxu0 %v11364_v0  ;;  %1269 = vmatprep.mubr.f32.mxu1 %v11364_v0  ;;  %v1810_v12 = vld [vmem:[%s7693_s17 + $0x83] sm:$0xff] }
  0xb7   : > { %6481 = vmatmul.mubr.msk.f32.gmra.mxu0 %vm629_vm0, %v609_v13  ;;  %6513 = vmatmul.mubr.msk.f32.gmra.mxu1 %vm629_vm0, %v569_v14 }
  0xb8   : > { %922 = vmatprep.mubr.f32.mxu0 %v11364_v0  ;;  %1275 = vmatprep.mubr.f32.mxu1 %v11364_v0 }
  0xbb   : > { %6482 = vmatmul.mubr.msk.f32.gmra.mxu0 %vm629_vm0, %v610_v15  ;;  %6514 = vmatmul.mubr.msk.f32.gmra.mxu1 %vm629_vm0, %v570_v16  ;;  %v1353_v16 = vld [vmem:[%s7693_s17 + $0x8a] sm:$0xff] }
  0xbc   : > { %928 = vmatprep.mubr.f32.mxu0 %v11364_v0  ;;  %1281 = vmatprep.mubr.f32.mxu1 %v11364_v0 }
  0xbf   : > { %6483 = vmatmul.mubr.msk.f32.gmra.mxu0 %vm629_vm0, %v611_v17  ;;  %6515 = vmatmul.mubr.msk.f32.gmra.mxu1 %vm629_vm0, %v571_v18  ;;  %v1811_v17 = vld [vmem:[%s7693_s17 + $0x8b] sm:$0xff] }
  0xc0   : > { %934 = vmatprep.mubr.f32.mxu0 %v11364_v0  ;;  %1287 = vmatprep.mubr.f32.mxu1 %v11364_v0 }
  0xc3   : > { %6484 = vmatmul.mubr.msk.f32.gmra.mxu0 %vm629_vm0, %v612_v19  ;;  %6516 = vmatmul.mubr.msk.f32.gmra.mxu1 %vm629_vm0, %v572_v20 }
  0xc4   : > { %940 = vmatprep.mubr.f32.mxu0 %v11364_v0  ;;  %1293 = vmatprep.mubr.f32.mxu1 %v11364_v0 }
  0xc7   : > { %6485 = vmatmul.mubr.msk.f32.gmra.mxu0 %vm629_vm0, %v613_v21  ;;  %6517 = vmatmul.mubr.msk.f32.gmra.mxu1 %vm629_vm0, %v573_v22 }
  0xc8   : > { %946 = vmatprep.mubr.f32.mxu0 %v11364_v0  ;;  %1299 = vmatprep.mubr.f32.mxu1 %v11364_v0 }
  0xcb   : > { %6486 = vmatmul.mubr.msk.f32.gmra.mxu0 %vm629_vm0, %v614_v23  ;;  %6518 = vmatmul.mubr.msk.f32.gmra.mxu1 %vm629_vm0, %v574_v24  ;;  %v1354_v24 = vld [vmem:[%s7693_s17 + $0x92] sm:$0xff] }
  0xcc   : > { %952 = vmatprep.mubr.f32.mxu0 %v11364_v0  ;;  %1305 = vmatprep.mubr.f32.mxu1 %v11364_v0 }
  0xcf   : > { %6487 = vmatmul.mubr.msk.f32.gmra.mxu0 %vm629_vm0, %v615_v25  ;;  %6519 = vmatmul.mubr.msk.f32.gmra.mxu1 %vm629_vm0, %v575_v26  ;;  %v1812_v25 = vld [vmem:[%s7693_s17 + $0x93] sm:$0xff] }
  0xd0   : > { %958 = vmatprep.mubr.f32.mxu0 %v11364_v0  ;;  %1311 = vmatprep.mubr.f32.mxu1 %v11364_v0 }
  0xd3   : > { %6488 = vmatmul.mubr.msk.f32.gmra.mxu0 %vm629_vm0, %v616_v27  ;;  %6520 = vmatmul.mubr.msk.f32.gmra.mxu1 %vm629_vm0, %v576_v28 }
  0xd4   : > { %964 = vmatprep.mubr.f32.mxu0 %v11364_v0  ;;  %1317 = vmatprep.mubr.f32.mxu1 %v11364_v0 }
  0xd7   : > { %6489 = vmatmul.mubr.msk.f32.gmra.mxu0 %vm629_vm0, %v617_v29  ;;  %6521 = vmatmul.mubr.msk.f32.gmra.mxu1 %vm629_vm0, %v577_v30 }
  0xd8   : > { %970 = vmatprep.mubr.f32.mxu0 %v11364_v0  ;;  %1323 = vmatprep.mubr.f32.mxu1 %v11364_v0 }
  0xdb   : > { %6490 = vmatmul.mubr.msk.f32.gmra.mxu0 %vm629_vm0, %v618_v31  ;;  %6522 = vmatmul.mubr.msk.f32.gmra.mxu1 %vm629_vm0, %v578_v32  ;;  %v1355_v32 = vld [vmem:[%s7693_s17 + $0x9a] sm:$0xff] }
  0xdc   : > { %976 = vmatprep.mubr.f32.mxu0 %v11364_v0  ;;  %1329 = vmatprep.mubr.f32.mxu1 %v11364_v0 }
  0xdf   : > { %6491 = vmatmul.mubr.msk.f32.gmra.mxu0 %vm629_vm0, %v619_v33  ;;  %6523 = vmatmul.mubr.msk.f32.gmra.mxu1 %vm629_vm0, %v579_v34  ;;  %v1813_v33 = vld [vmem:[%s7693_s17 + $0x9b] sm:$0xff] }
  0xe0   : > { %1537 = vmatprep.mubr.f32.mxu0 %v11364_v0  ;;  %1995 = vmatprep.mubr.f32.mxu1 %v11364_v0 }
  0xe3   : > { %6532 = vmatmul.mubr.msk.f32.vlgmr.msra.gmra.mxu0 %vm629_vm0, %v1336_v35  ;;  %6572 = vmatmul.mubr.msk.f32.vlgmr.msra.gmra.mxu1 %vm629_vm0, %v1794_v36 }
  0xe4   : > { %1543 = vmatprep.mubr.f32.mxu0 %v11364_v0  ;;  %2001 = vmatprep.mubr.f32.mxu1 %v11364_v0 }
  0xe5   : > { %2414 = vmatpush1.msra.mxu0 %v6610_v37 }
  0xe6   : > { %2415 = vmatprep.subr.mxu0 %v6609_v38 }
  0xe7   : > { %6533 = vmatmul.mubr.msk.f32.gmra.mxu0 %vm629_vm0, %v1337_v39  ;;  %6573 = vmatmul.mubr.msk.f32.gmra.mxu1 %vm629_vm0, %v1795_v40  ;;  %v1356_v40 = vld [vmem:[%s7693_s17 + $0xa2] sm:$0xff] }
  0xe8   : > { %1549 = vmatprep.mubr.f32.mxu0 %v11364_v0  ;;  %2007 = vmatprep.mubr.f32.mxu1 %v11364_v0 }
  0xe9   : > { %2416 = vmatpush1.msra.mxu0 %v6608_v41  ;;  %v1814_v41 = vld [vmem:[%s7693_s17 + $0xa3] sm:$0xff] }
  0xea   : > { %2417 = vmatprep.subr.mxu0 %v6607_v42 }
  0xeb   : > { %6534 = vmatmul.mubr.msk.f32.gmra.mxu0 %vm629_vm0, %v1338_v43  ;;  %6574 = vmatmul.mubr.msk.f32.gmra.mxu1 %vm629_vm0, %v1796_v44 }
  0xec   : > { %1555 = vmatprep.mubr.f32.mxu0 %v11364_v0  ;;  %2013 = vmatprep.mubr.f32.mxu1 %v11364_v0 }
  0xed   : > { %2418 = vmatpush1.msra.mxu0 %v6606_v45 }
  0xee   : > { %2419 = vmatprep.subr.mxu0 %v6605_v46 }
  0xef   : > { %6535 = vmatmul.mubr.msk.f32.gmra.mxu0 %vm629_vm0, %v1339_v47  ;;  %6575 = vmatmul.mubr.msk.f32.gmra.mxu1 %vm629_vm0, %v1797_v48  ;;  %v1357_v48 = vld [vmem:[%s7693_s17 + $0xaa] sm:$0xff] }
  0xf0   : > { %1561 = vmatprep.mubr.f32.mxu0 %v11364_v0  ;;  %2019 = vmatprep.mubr.f32.mxu1 %v11364_v0 }
  0xf1   : > { %2420 = vmatpush1.msra.mxu0 %v6604_v49  ;;  %v1815_v49 = vld [vmem:[%s7693_s17 + $0xab] sm:$0xff] }
  0xf3   : > { %6536 = vmatmul.mubr.msk.f32.gmra.mxu0 %vm629_vm0, %v1340_v50  ;;  %6576 = vmatmul.mubr.msk.f32.gmra.mxu1 %vm629_vm0, %v1798_v51 }
  0xf4   : > { %1567 = vmatprep.mubr.f32.mxu0 %v11364_v0  ;;  %2025 = vmatprep.mubr.f32.mxu1 %v11364_v0 }
  0xf7   : > { %6537 = vmatmul.mubr.msk.f32.gmra.mxu0 %vm629_vm0, %v1341_v52  ;;  %6577 = vmatmul.mubr.msk.f32.gmra.mxu1 %vm629_vm0, %v1799_v53 }
  0xf8   : > { %1573 = vmatprep.mubr.f32.mxu0 %v11364_v0  ;;  %2031 = vmatprep.mubr.f32.mxu1 %v11364_v0 }
  0xfb   : > { %6538 = vmatmul.mubr.msk.f32.gmra.mxu0 %vm629_vm0, %v1342_v54  ;;  %6578 = vmatmul.mubr.msk.f32.gmra.mxu1 %vm629_vm0, %v1800_v55 }
  0xfc   : > { %1579 = vmatprep.mubr.f32.mxu0 %v11364_v0  ;;  %2037 = vmatprep.mubr.f32.mxu1 %v11364_v0 }
  0xff   : > { %6539 = vmatmul.mubr.msk.f32.gmra.mxu0 %vm629_vm0, %v1343_v56  ;;  %6579 = vmatmul.mubr.msk.f32.gmra.mxu1 %vm629_vm0, %v1801_v57  ;;  %v1358_v56 = vld [vmem:[%s7693_s17 + $0xb2] sm:$0xff] }
 0x100   : > { %1585 = vmatprep.mubr.f32.mxu0 %v11364_v0  ;;  %2043 = vmatprep.mubr.f32.mxu1 %v11364_v0  ;;  %v1816_v57 = vld [vmem:[%s7693_s17 + $0xb3] sm:$0xff] }
 0x103   : > { %6540 = vmatmul.mubr.msk.f32.gmra.mxu0 %vm629_vm0, %v1344_v58  ;;  %6580 = vmatmul.mubr.msk.f32.gmra.mxu1 %vm629_vm0, %v1802_v59 }
 0x104   : > { %1591 = vmatprep.mubr.f32.mxu0 %v11364_v0  ;;  %2049 = vmatprep.mubr.f32.mxu1 %v11364_v0 }
 0x107   : > { %6541 = vmatmul.mubr.msk.f32.gmra.mxu0 %vm629_vm0, %v1345_v60  ;;  %6581 = vmatmul.mubr.msk.f32.gmra.mxu1 %vm629_vm0, %v1803_v61 }
 0x108   : > { %1597 = vmatprep.mubr.f32.mxu0 %v11364_v0  ;;  %2055 = vmatprep.mubr.f32.mxu1 %v11364_v0 }
 0x10b   : > { %6542 = vmatmul.mubr.msk.f32.gmra.mxu0 %vm629_vm0, %v1346_v62  ;;  %6582 = vmatmul.mubr.msk.f32.gmra.mxu1 %vm629_vm0, %v1804_v63 }
 0x10c   : > { %1603 = vmatprep.mubr.f32.mxu0 %v11364_v0  ;;  %2061 = vmatprep.mubr.f32.mxu1 %v11364_v0 }
 0x10f   : > { %6543 = vmatmul.mubr.msk.f32.gmra.mxu0 %vm629_vm0, %v1347_v1  ;;  %6583 = vmatmul.mubr.msk.f32.gmra.mxu1 %vm629_vm0, %v1805_v2  ;;  %v1359_v1 = vld [vmem:[%s7693_s17 + $0xba] sm:$0xff] }
 0x110   : > { %1609 = vmatprep.mubr.f32.mxu0 %v11364_v0  ;;  %2067 = vmatprep.mubr.f32.mxu1 %v11364_v0  ;;  %v1817_v2 = vld [vmem:[%s7693_s17 + $0xbb] sm:$0xff] }
 0x113   : > { %6544 = vmatmul.mubr.msk.f32.gmra.mxu0 %vm629_vm0, %v1348_v3  ;;  %6584 = vmatmul.mubr.msk.f32.gmra.mxu1 %vm629_vm0, %v1806_v4 }
 0x114   : > { %1615 = vmatprep.mubr.f32.mxu0 %v11364_v0  ;;  %2073 = vmatprep.mubr.f32.mxu1 %v11364_v0 }
 0x117   : > { %6545 = vmatmul.mubr.msk.f32.gmra.mxu0 %vm629_vm0, %v1349_v5  ;;  %6585 = vmatmul.mubr.msk.f32.gmra.mxu1 %vm629_vm0, %v1807_v6 }
 0x118   : > { %1621 = vmatprep.mubr.f32.mxu0 %v11364_v0  ;;  %2079 = vmatprep.mubr.f32.mxu1 %v11364_v0 }
 0x11b   : > { %6546 = vmatmul.mubr.msk.f32.gmra.mxu0 %vm629_vm0, %v1350_v7  ;;  %6586 = vmatmul.mubr.msk.f32.gmra.mxu1 %vm629_vm0, %v1808_v8 }
 0x11c   : > { %1627 = vmatprep.mubr.f32.mxu0 %v11364_v0  ;;  %2085 = vmatprep.mubr.f32.mxu1 %v11364_v0 }
 0x11f   : > { %6547 = vmatmul.mubr.msk.f32.gmra.mxu0 %vm629_vm0, %v1351_v9  ;;  %6587 = vmatmul.mubr.msk.f32.gmra.mxu1 %vm629_vm0, %v1809_v10  ;;  %v1360_v9 = vld [vmem:[%s7693_s17 + $0xc2] sm:$0xff] }
 0x120   : > { %1633 = vmatprep.mubr.f32.mxu0 %v11364_v0  ;;  %2091 = vmatprep.mubr.f32.mxu1 %v11364_v0  ;;  %v1818_v10 = vld [vmem:[%s7693_s17 + $0xc3] sm:$0xff] }
 0x123   : > { %v792_v13 = vpop.f32.mrf.mxu0  ;;  %v1145_v14 = vpop.f32.mrf.mxu1  ;;  %6548 = vmatmul.mubr.msk.f32.gmra.mxu0 %vm629_vm0, %v1352_v11  ;;  %6588 = vmatmul.mubr.msk.f32.gmra.mxu1 %vm629_vm0, %v1810_v12 }
 0x124   : > { %v8071_v15 = vadd.f32 %v1145_v14, %v792_v13  ;;  %1639 = vmatprep.mubr.f32.mxu0 %v11364_v0  ;;  %2097 = vmatprep.mubr.f32.mxu1 %v11364_v0 }
 0x125   : > { %v794_v18 = vpop.f32.mrf.mxu0  ;;  %v1147_v19 = vpop.f32.mrf.mxu1 }
 0x126   : > { %v8077_v20 = vadd.f32 %v1147_v19, %v794_v18  ;;  %v1361_v18 = vld [vmem:[%s7693_s17 + $0xca] sm:$0xff] }
 0x127   : > { %v798_v21 = vpop.f32.mrf.mxu0  ;;  %v1151_v22 = vpop.f32.mrf.mxu1  ;;  %6549 = vmatmul.mubr.msk.f32.gmra.mxu0 %vm629_vm0, %v1353_v16  ;;  %6589 = vmatmul.mubr.msk.f32.gmra.mxu1 %vm629_vm0, %v1811_v17  ;;  %v1819_v19 = vld [vmem:[%s7693_s17 + $0xcb] sm:$0xff] }
 0x128   : > { %v8081_v23 = vadd.f32 %v1151_v22, %v798_v21  ;;  %1645 = vmatprep.mubr.f32.mxu0 %v11364_v0  ;;  %2103 = vmatprep.mubr.f32.mxu1 %v11364_v0 }
 0x129   : > { %v800_v26 = vpop.f32.mrf.mxu0  ;;  %v1153_v27 = vpop.f32.mrf.mxu1 }
 0x12a   : > { %v8087_v28 = vadd.f32 %v1153_v27, %v800_v26  ;;  %v1362_v27 = vld [vmem:[%s7693_s17 + $0xd2] sm:$0xff] }
 0x12b   : > { %v804_v29 = vpop.f32.mrf.mxu0  ;;  %v1157_v30 = vpop.f32.mrf.mxu1  ;;  %6550 = vmatmul.mubr.msk.f32.gmra.mxu0 %vm629_vm0, %v1354_v24  ;;  %6590 = vmatmul.mubr.msk.f32.gmra.mxu1 %vm629_vm0, %v1812_v25 }
 0x12c   : > { %v8091_v31 = vadd.f32 %v1157_v30, %v804_v29  ;;  %1651 = vmatprep.mubr.f32.mxu0 %v11364_v0  ;;  %2109 = vmatprep.mubr.f32.mxu1 %v11364_v0  ;;  %v1820_v29 = vld [vmem:[%s7693_s17 + $0xd3] sm:$0xff] }
 0x12d   : > { %v806_v34 = vpop.f32.mrf.mxu0  ;;  %v1159_v35 = vpop.f32.mrf.mxu1 }
 0x12e   : > { %v8097_v36 = vadd.f32 %v1159_v35, %v806_v34 }
 0x12f   : > { %v810_v37 = vpop.f32.mrf.mxu0  ;;  %v1163_v38 = vpop.f32.mrf.mxu1  ;;  %6551 = vmatmul.mubr.msk.f32.gmra.mxu0 %vm629_vm0, %v1355_v32  ;;  %6591 = vmatmul.mubr.msk.f32.gmra.mxu1 %vm629_vm0, %v1813_v33 }
 0x130   : > { %v8101_v39 = vadd.f32 %v1163_v38, %v810_v37  ;;  %1657 = vmatprep.mubr.f32.mxu0 %v11364_v0  ;;  %2115 = vmatprep.mubr.f32.mxu1 %v11364_v0  ;;  %v1363_v37 = vld [vmem:[%s7693_s17 + $0xda] sm:$0xff] }
 0x131   : > { %v812_v42 = vpop.f32.mrf.mxu0  ;;  %v1165_v43 = vpop.f32.mrf.mxu1  ;;  %v1821_v38 = vld [vmem:[%s7693_s17 + $0xdb] sm:$0xff] }
 0x132   : > { %v8107_v44 = vadd.f32 %v1165_v43, %v812_v42 }
 0x133   : > { %v816_v45 = vpop.f32.mrf.mxu0  ;;  %v1169_v46 = vpop.f32.mrf.mxu1  ;;  %6552 = vmatmul.mubr.msk.f32.gmra.mxu0 %vm629_vm0, %v1356_v40  ;;  %6592 = vmatmul.mubr.msk.f32.gmra.mxu1 %vm629_vm0, %v1814_v41 }
 0x134   : > { %v8111_v47 = vadd.f32 %v1169_v46, %v816_v45  ;;  %1663 = vmatprep.mubr.f32.mxu0 %v11364_v0  ;;  %2121 = vmatprep.mubr.f32.mxu1 %v11364_v0  ;;  %v1364_v46 = vld [vmem:[%s7693_s17 + $0xe2] sm:$0xff] }
 0x135   : > { %v818_v50 = vpop.f32.mrf.mxu0  ;;  %v1171_v51 = vpop.f32.mrf.mxu1 }
 0x136   : > { %v8117_v52 = vadd.f32 %v1171_v51, %v818_v50 }
 0x137   : > { %v822_v53 = vpop.f32.mrf.mxu0  ;;  %v1175_v54 = vpop.f32.mrf.mxu1  ;;  %6553 = vmatmul.mubr.msk.f32.gmra.mxu0 %vm629_vm0, %v1357_v48  ;;  %6593 = vmatmul.mubr.msk.f32.gmra.mxu1 %vm629_vm0, %v1815_v49  ;;  %v1822_v48 = vld [vmem:[%s7693_s17 + $0xe3] sm:$0xff] }
 0x138   : > { %v8121_v55 = vadd.f32 %v1175_v54, %v822_v53  ;;  %1669 = vmatprep.mubr.f32.mxu0 %v11364_v0  ;;  %2127 = vmatprep.mubr.f32.mxu1 %v11364_v0 }
 0x139   : > { %v824_v58 = vpop.f32.mrf.mxu0  ;;  %v1177_v59 = vpop.f32.mrf.mxu1 }
 0x13a   : > { %v8127_v60 = vadd.f32 %v1177_v59, %v824_v58 }
 0x13b   : > { %v828_v61 = vpop.f32.mrf.mxu0  ;;  %v1181_v62 = vpop.f32.mrf.mxu1  ;;  %6554 = vmatmul.mubr.msk.f32.gmra.mxu0 %vm629_vm0, %v1358_v56  ;;  %6594 = vmatmul.mubr.msk.f32.gmra.mxu1 %vm629_vm0, %v1816_v57  ;;  %v1365_v56 = vld [vmem:[%s7693_s17 + $0xea] sm:$0xff] }
 0x13c   : > { %v8131_v63 = vadd.f32 %v1181_v62, %v828_v61  ;;  %1675 = vmatprep.mubr.f32.mxu0 %v11364_v0  ;;  %2133 = vmatprep.mubr.f32.mxu1 %v11364_v0  ;;  %v1823_v57 = vld [vmem:[%s7693_s17 + $0xeb] sm:$0xff] }
 0x13d   : > { %v830_v3 = vpop.f32.mrf.mxu0  ;;  %v1183_v4 = vpop.f32.mrf.mxu1 }
 0x13e   : > { %v8137_v5 = vadd.f32 %v1183_v4, %v830_v3  ;;  %v1824_v3 = vld [vmem:[%s7693_s17 + $0xf3] sm:$0xff] }
 0x13f   : > { %v834_v6 = vpop.f32.mrf.mxu0  ;;  %v1187_v7 = vpop.f32.mrf.mxu1  ;;  %6555 = vmatmul.mubr.msk.f32.gmra.mxu0 %vm629_vm0, %v1359_v1  ;;  %6595 = vmatmul.mubr.msk.f32.gmra.mxu1 %vm629_vm0, %v1817_v2  ;;  %v1366_v2 = vld [vmem:[%s7693_s17 + $0xf2] sm:$0xff] }
 0x140   : > { %v8141_v8 = vadd.f32 %v1187_v7, %v834_v6  ;;  %1681 = vmatprep.mubr.f32.mxu0 %v11364_v0  ;;  %2139 = vmatprep.mubr.f32.mxu1 %v11364_v0 }
 0x141   : > { %v836_v11 = vpop.f32.mrf.mxu0  ;;  %v1189_v12 = vpop.f32.mrf.mxu1 }
 0x142   : > { %v8147_v13 = vadd.f32 %v1189_v12, %v836_v11  ;;  %v1367_v11 = vld [vmem:[%s7693_s17 + $0xfa] sm:$0xf] }
 0x143   : > { %v840_v14 = vpop.f32.mrf.mxu0  ;;  %v1193_v16 = vpop.f32.mrf.mxu1  ;;  %6556 = vmatmul.mubr.msk.f32.gmra.mxu0 %vm629_vm0, %v1360_v9  ;;  %6596 = vmatmul.mubr.msk.f32.gmra.mxu1 %vm629_vm0, %v1818_v10  ;;  %v1825_v12 = vld [vmem:[%s7693_s17 + $0xfb] sm:$0xf] }
 0x144   : > { %v8151_v17 = vadd.f32 %v1193_v16, %v840_v14  ;;  %1687 = vmatprep.mubr.f32.mxu0 %v11364_v0  ;;  %2145 = vmatprep.mubr.f32.mxu1 %v11364_v0 }
 0x145   : > { %v8157_v21 = vpop.f32.mrf.mxu0  ;;  %v8159_v22 = vpop.f32.mrf.mxu1 }
 0x147   : > { %v846_v24 = vpop.f32.mrf.mxu0  ;;  %v1199_v25 = vpop.f32.mrf.mxu1  ;;  %6557 = vmatmul.mubr.msk.f32.gmra.mxu0 %vm629_vm0, %v1361_v18  ;;  %6597 = vmatmul.mubr.msk.f32.gmra.mxu1 %vm629_vm0, %v1819_v19 }
 0x148   : > { %v8163_v26 = vadd.f32 %v1199_v25, %v846_v24  ;;  %1693 = vmatprep.mubr.f32.mxu0 %v11364_v0  ;;  %2151 = vmatprep.mubr.f32.mxu1 %v11364_v0  ;;  %v2252_v25 = vld [vmem:[%s7693_s17 + $0x4] sm:$0xff] }
 0x149   : > { %v8169_v30 = vpop.f32.mrf.mxu0  ;;  %v8171_v32 = vpop.f32.mrf.mxu1 }
 0x14b   : > { %v852_v33 = vpop.f32.mrf.mxu0  ;;  %v1205_v34 = vpop.f32.mrf.mxu1  ;;  %6558 = vmatmul.mubr.msk.f32.gmra.mxu0 %vm629_vm0, %v1362_v27  ;;  %6598 = vmatmul.mubr.msk.f32.gmra.mxu1 %vm629_vm0, %v1820_v29 }
 0x14c   : > { %v8175_v35 = vadd.f32 %v1205_v34, %v852_v33  ;;  %1699 = vmatprep.mubr.f32.mxu0 %v11364_v0  ;;  %2157 = vmatprep.mubr.f32.mxu1 %v11364_v0 }
 0x14d   : > { %v8181_v40 = vpop.f32.mrf.mxu0  ;;  %v8183_v41 = vpop.f32.mrf.mxu1 }
 0x14e   : > { %11390 = vst [vmem:[#allocation19_spill] sm:$0xff] %v8181_v40  ;;  %11391 = vst [vmem:[#allocation20_spill] sm:$0xff] %v8183_v41 }
 0x14f   : > { %v858_v42 = vpop.f32.mrf.mxu0  ;;  %v1211_v43 = vpop.f32.mrf.mxu1  ;;  %6559 = vmatmul.mubr.msk.f32.gmra.mxu0 %vm629_vm0, %v1363_v37  ;;  %6599 = vmatmul.mubr.msk.f32.gmra.mxu1 %vm629_vm0, %v1821_v38  ;;  %v2253_v38 = vld [vmem:[%s7693_s17 + $0xc] sm:$0xff] }
 0x150   : > { %v8187_v45 = vadd.f32 %v1211_v43, %v858_v42  ;;  %1705 = vmatprep.mubr.f32.mxu0 %v11364_v0  ;;  %2163 = vmatprep.mubr.f32.mxu1 %v11364_v0 }
 0x151   : > { %v8193_v49 = vpop.f32.mrf.mxu0  ;;  %v8195_v50 = vpop.f32.mrf.mxu1 }
 0x152   : > { %11392 = vst [vmem:[#allocation21_spill] sm:$0xff] %v8193_v49  ;;  %11393 = vst [vmem:[#allocation22_spill] sm:$0xff] %v8195_v50 }
 0x153   : > { %v864_v51 = vpop.f32.mrf.mxu0  ;;  %v1217_v53 = vpop.f32.mrf.mxu1  ;;  %6560 = vmatmul.mubr.msk.f32.gmra.mxu0 %vm629_vm0, %v1364_v46  ;;  %6600 = vmatmul.mubr.msk.f32.gmra.mxu1 %vm629_vm0, %v1822_v48 }
 0x154   : > { %v8199_v54 = vadd.f32 %v1217_v53, %v864_v51  ;;  %1711 = vmatprep.mubr.f32.mxu0 %v11364_v0  ;;  %2169 = vmatprep.mubr.f32.mxu1 %v11364_v0  ;;  %v2254_v53 = vld [vmem:[%s7693_s17 + $0x14] sm:$0xff] }
 0x155   : > { %v8205_v58 = vpop.f32.mrf.mxu0  ;;  %v8207_v59 = vpop.f32.mrf.mxu1 }
 0x156   : > { %11394 = vst [vmem:[#allocation23_spill] sm:$0xff] %v8205_v58  ;;  %11395 = vst [vmem:[#allocation24_spill] sm:$0xff] %v8207_v59 }
 0x157   : > { %v870_v61 = vpop.f32.mrf.mxu0  ;;  %v1223_v62 = vpop.f32.mrf.mxu1  ;;  %6561 = vmatmul.mubr.msk.f32.gmra.mxu0 %vm629_vm0, %v1365_v56  ;;  %6601 = vmatmul.mubr.msk.f32.gmra.mxu1 %vm629_vm0, %v1823_v57 }
 0x158   : > { %v8211_v1 = vadd.f32 %v1223_v62, %v870_v61  ;;  %1717 = vmatprep.mubr.f32.mxu0 %v11364_v0  ;;  %2175 = vmatprep.mubr.f32.mxu1 %v11364_v0 }
 0x159   : > { %v8217_v4 = vpop.f32.mrf.mxu0  ;;  %v8219_v6 = vpop.f32.mrf.mxu1 }
 0x15a   : > { %11396 = vst [vmem:[#allocation25_spill] sm:$0xff] %v8217_v4  ;;  %11397 = vst [vmem:[#allocation26_spill] sm:$0xff] %v8219_v6 }
 0x15b   : > { %v876_v7 = vpop.f32.mrf.mxu0  ;;  %v1229_v9 = vpop.f32.mrf.mxu1  ;;  %6562 = vmatmul.mubr.msk.f32.gmra.mxu0 %vm629_vm0, %v1366_v2  ;;  %6602 = vmatmul.mubr.msk.f32.gmra.mxu1 %vm629_vm0, %v1824_v3  ;;  %v2255_v3 = vld [vmem:[%s7693_s17 + $0x1c] sm:$0xff] }
 0x15c   : > { %v8223_v10 = vadd.f32 %v1229_v9, %v876_v7  ;;  %1723 = vmatprep.mubr.f32.mxu0 %v11364_v0  ;;  %2181 = vmatprep.mubr.f32.mxu1 %v11364_v0 }
 0x15d   : > { %v8229_v14 = vpop.f32.mrf.mxu0  ;;  %v8231_v16 = vpop.f32.mrf.mxu1 }
 0x15e   : > { %11398 = vst [vmem:[#allocation27_spill] sm:$0xff] %v8229_v14  ;;  %11399 = vst [vmem:[#allocation28_spill] sm:$0xff] %v8231_v16  ;;  %v2269_v16 = vld [vmem:[%s7693_s17 + $0x8c] sm:$0xff] }
 0x15f   : > { %v882_v18 = vpop.f32.mrf.mxu0  ;;  %v1235_v19 = vpop.f32.mrf.mxu1  ;;  %6563 = vmatmul.mubr.msk.f32.gmra.mxu0 %vm629_vm0, %v1367_v11  ;;  %6603 = vmatmul.mubr.msk.f32.gmra.mxu1 %vm629_vm0, %v1825_v12 }
 0x160   : > { %v8235_v24 = vadd.f32 %v1235_v19, %v882_v18  ;;  %2453 = vmatprep.mubr.f32.mxu0 %v11364_v0  ;;  %v2256_v19 = vld [vmem:[%s7693_s17 + $0x24] sm:$0xff] }
 0x161   : > { %v8239_v27 = vpop.f32.mrf.mxu0  ;;  %v8241_v29 = vpop.f32.mrf.mxu1 }
 0x162   : > { %11400 = vst [vmem:[#allocation29_spill] sm:$0xff] %v8239_v27  ;;  %11401 = vst [vmem:[#allocation30_spill] sm:$0xff] %v8241_v29 }
 0x163   : > { %v888_v33 = vpop.f32.mrf.mxu0  ;;  %v1241_v34 = vpop.f32.mrf.mxu1  ;;  %6612 = vmatmul.mubr.msk.f32.vlgmr.msra.gmra.mxu0 %vm629_vm0, %v2252_v25 }
 0x164   : > { %v8244_v37 = vadd.f32 %v1241_v34, %v888_v33  ;;  %2459 = vmatprep.mubr.f32.mxu0 %v11364_v0 }
 0x165   : > { %v8248_v42 = vpop.f32.mrf.mxu0  ;;  %v8250_v43 = vpop.f32.mrf.mxu1 }
 0x166   : > { %11402 = vst [vmem:[#allocation31_spill] sm:$0xff] %v8248_v42  ;;  %11403 = vst [vmem:[#allocation32_spill] sm:$0xff] %v8250_v43 }
 0x167   : > { %v894_v46 = vpop.f32.mrf.mxu0  ;;  %v1247_v48 = vpop.f32.mrf.mxu1  ;;  %6613 = vmatmul.mubr.msk.f32.gmra.mxu0 %vm629_vm0, %v2253_v38 }
 0x168   : > { %v8253_v51 = vadd.f32 %v1247_v48, %v894_v46  ;;  %2465 = vmatprep.mubr.f32.mxu0 %v11364_v0  ;;  %v2257_v48 = vld [vmem:[%s7693_s17 + $0x2c] sm:$0xff] }
 0x169   : > { %v8257_v56 = vpop.f32.mrf.mxu0  ;;  %v8259_v57 = vpop.f32.mrf.mxu1 }
 0x16a   : > { %11404 = vst [vmem:[#allocation33_spill] sm:$0xff] %v8257_v56  ;;  %11405 = vst [vmem:[#allocation34_spill] sm:$0xff] %v8259_v57 }
 0x16b   : > { %v900_v61 = vpop.f32.mrf.mxu0  ;;  %v1253_v62 = vpop.f32.mrf.mxu1  ;;  %6614 = vmatmul.mubr.msk.f32.gmra.mxu0 %vm629_vm0, %v2254_v53 }
 0x16c   : > { %v8262_v2 = vadd.f32 %v1253_v62, %v900_v61  ;;  %2471 = vmatprep.mubr.f32.mxu0 %v11364_v0 }
 0x16d   : > { %v8266_v7 = vpop.f32.mrf.mxu0  ;;  %v8268_v9 = vpop.f32.mrf.mxu1 }
 0x16e   : > { %11406 = vst [vmem:[#allocation35_spill] sm:$0xff] %v8266_v7  ;;  %11407 = vst [vmem:[#allocation36_spill] sm:$0xff] %v8268_v9 }
 0x16f   : > { %v906_v11 = vpop.f32.mrf.mxu0  ;;  %v1259_v12 = vpop.f32.mrf.mxu1  ;;  %6615 = vmatmul.mubr.msk.f32.gmra.mxu0 %vm629_vm0, %v2255_v3 }
 0x170   : > { %v8271_v18 = vadd.f32 %v1259_v12, %v906_v11  ;;  %2477 = vmatprep.mubr.f32.mxu0 %v11364_v0  ;;  %v2258_v12 = vld [vmem:[%s7693_s17 + $0x34] sm:$0xff] }
 0x171   : > { %v8275_v25 = vpop.f32.mrf.mxu0  ;;  %v8277_v33 = vpop.f32.mrf.mxu1 }
 0x172   : > { %11408 = vst [vmem:[#allocation37_spill] sm:$0xff] %v8275_v25  ;;  %11409 = vst [vmem:[#allocation38_spill] sm:$0xff] %v8277_v33 }
 0x173   : > { %v912_v34 = vpop.f32.mrf.mxu0  ;;  %v1265_v38 = vpop.f32.mrf.mxu1  ;;  %6616 = vmatmul.mubr.msk.f32.gmra.mxu0 %vm629_vm0, %v2256_v19 }
 0x174   : > { %v8280_v46 = vadd.f32 %v1265_v38, %v912_v34  ;;  %2483 = vmatprep.mubr.f32.mxu0 %v11364_v0 }
 0x175   : > { %v8284_v53 = vpop.f32.mrf.mxu0  ;;  %v8286_v61 = vpop.f32.mrf.mxu1 }
 0x176   : > { %11410 = vst [vmem:[#allocation39_spill] sm:$0xff] %v8284_v53  ;;  %11411 = vst [vmem:[#allocation40_spill] sm:$0xff] %v8286_v61  ;;  %v2259_v61 = vld [vmem:[%s7693_s17 + $0x3c] sm:$0xff] }
 0x177   : > { %v918_v62 = vpop.f32.mrf.mxu0  ;;  %v1271_v3 = vpop.f32.mrf.mxu1  ;;  %6617 = vmatmul.mubr.msk.f32.gmra.mxu0 %vm629_vm0, %v2257_v48 }
 0x178   : > { %v8289_v11 = vadd.f32 %v1271_v3, %v918_v62  ;;  %2489 = vmatprep.mubr.f32.mxu0 %v11364_v0 }
 0x179   : > { %v8293_v19 = vpop.f32.mrf.mxu0  ;;  %v8295_v34 = vpop.f32.mrf.mxu1 }
 0x17a   : > { %11412 = vst [vmem:[#allocation41_spill] sm:$0xff] %v8293_v19  ;;  %11413 = vst [vmem:[#allocation42_spill] sm:$0xff] %v8295_v34  ;;  %v2260_v34 = vld [vmem:[%s7693_s17 + $0x44] sm:$0xff] }
 0x17b   : > { %v924_v38 = vpop.f32.mrf.mxu0  ;;  %v1277_v33 = vpop.f32.mrf.mxu1  ;;  %6618 = vmatmul.mubr.msk.f32.gmra.mxu0 %vm629_vm0, %v2258_v12 }
 0x17c   : > { %v8298_v53 = vadd.f32 %v1277_v33, %v924_v38  ;;  %2495 = vmatprep.mubr.f32.mxu0 %v11364_v0 }
 0x17d   : > { %v8302_v48 = vpop.f32.mrf.mxu0  ;;  %v8304_v62 = vpop.f32.mrf.mxu1 }
 0x17e   : > { %11414 = vst [vmem:[#allocation43_spill] sm:$0xff] %v8302_v48  ;;  %11415 = vst [vmem:[#allocation44_spill] sm:$0xff] %v8304_v62  ;;  %v2261_v62 = vld [vmem:[%s7693_s17 + $0x4c] sm:$0xff] }
 0x17f   : > { %v930_v3 = vpop.f32.mrf.mxu0  ;;  %v1283_v25 = vpop.f32.mrf.mxu1  ;;  %6619 = vmatmul.mubr.msk.f32.gmra.mxu0 %vm629_vm0, %v2259_v61 }
 0x180   : > { %v8307_v19 = vadd.f32 %v1283_v25, %v930_v3  ;;  %2501 = vmatprep.mubr.f32.mxu0 %v11364_v0 }
 0x181   : > { %v8311_v33 = vpop.f32.mrf.mxu0  ;;  %v8313_v12 = vpop.f32.mrf.mxu1 }
 0x182   : > { %11416 = vst [vmem:[#allocation45_spill] sm:$0xff] %v8311_v33  ;;  %11417 = vst [vmem:[#allocation46_spill] sm:$0xff] %v8313_v12  ;;  %v2262_v12 = vld [vmem:[%s7693_s17 + $0x54] sm:$0xff] }
 0x183   : > { %v936_v38 = vpop.f32.mrf.mxu0  ;;  %v1289_v9 = vpop.f32.mrf.mxu1  ;;  %6620 = vmatmul.mubr.msk.f32.gmra.mxu0 %vm629_vm0, %v2260_v34 }
 0x184   : > { %v8316_v48 = vadd.f32 %v1289_v9, %v936_v38  ;;  %2507 = vmatprep.mubr.f32.mxu0 %v11364_v0 }
 0x185   : > { %v8320_v25 = vpop.f32.mrf.mxu0  ;;  %v8322_v61 = vpop.f32.mrf.mxu1 }
 0x186   : > { %11418 = vst [vmem:[#allocation47_spill] sm:$0xff] %v8320_v25  ;;  %11419 = vst [vmem:[#allocation48_spill] sm:$0xff] %v8322_v61  ;;  %v2263_v61 = vld [vmem:[%s7693_s17 + $0x5c] sm:$0xff] }
 0x187   : > { %v942_v3 = vpop.f32.mrf.mxu0  ;;  %v1295_v7 = vpop.f32.mrf.mxu1  ;;  %6621 = vmatmul.mubr.msk.f32.gmra.mxu0 %vm629_vm0, %v2261_v62 }
 0x188   : > { %v8325_v33 = vadd.f32 %v1295_v7, %v942_v3  ;;  %2513 = vmatprep.mubr.f32.mxu0 %v11364_v0 }
 0x189   : > { %v8329_v9 = vpop.f32.mrf.mxu0  ;;  %v8331_v34 = vpop.f32.mrf.mxu1 }
 0x18a   : > { %11420 = vst [vmem:[#allocation49_spill] sm:$0xff] %v8329_v9  ;;  %11421 = vst [vmem:[#allocation50_spill] sm:$0xff] %v8331_v34  ;;  %v2264_v34 = vld [vmem:[%s7693_s17 + $0x64] sm:$0xff] }
 0x18b   : > { %v948_v38 = vpop.f32.mrf.mxu0  ;;  %v1301_v57 = vpop.f32.mrf.mxu1  ;;  %6622 = vmatmul.mubr.msk.f32.gmra.mxu0 %vm629_vm0, %v2262_v12 }
 0x18c   : > { %v8334_v25 = vadd.f32 %v1301_v57, %v948_v38  ;;  %2519 = vmatprep.mubr.f32.mxu0 %v11364_v0 }
 0x18d   : > { %v8338_v7 = vpop.f32.mrf.mxu0  ;;  %v8340_v62 = vpop.f32.mrf.mxu1 }
 0x18e   : > { %11422 = vst [vmem:[#allocation51_spill] sm:$0xff] %v8338_v7  ;;  %11423 = vst [vmem:[#allocation52_spill] sm:$0xff] %v8340_v62  ;;  %v2265_v62 = vld [vmem:[%s7693_s17 + $0x6c] sm:$0xff] }
 0x18f   : > { %v954_v3 = vpop.f32.mrf.mxu0  ;;  %v1307_v56 = vpop.f32.mrf.mxu1  ;;  %6623 = vmatmul.mubr.msk.f32.gmra.mxu0 %vm629_vm0, %v2263_v61 }
 0x190   : > { %v8343_v9 = vadd.f32 %v1307_v56, %v954_v3  ;;  %2525 = vmatprep.mubr.f32.mxu0 %v11364_v0 }
 0x191   : > { %v8347_v57 = vpop.f32.mrf.mxu0  ;;  %v8349_v12 = vpop.f32.mrf.mxu1 }
 0x192   : > { %11424 = vst [vmem:[#allocation53_spill] sm:$0xff] %v8347_v57  ;;  %11425 = vst [vmem:[#allocation54_spill] sm:$0xff] %v8349_v12  ;;  %v2266_v12 = vld [vmem:[%s7693_s17 + $0x74] sm:$0xff] }
 0x193   : > { %v960_v38 = vpop.f32.mrf.mxu0  ;;  %v1313_v43 = vpop.f32.mrf.mxu1  ;;  %6624 = vmatmul.mubr.msk.f32.gmra.mxu0 %vm629_vm0, %v2264_v34 }
 0x194   : > { %v8352_v7 = vadd.f32 %v1313_v43, %v960_v38  ;;  %2531 = vmatprep.mubr.f32.mxu0 %v11364_v0 }
 0x195   : > { %v8356_v56 = vpop.f32.mrf.mxu0  ;;  %v8358_v61 = vpop.f32.mrf.mxu1 }
 0x196   : > { %11426 = vst [vmem:[#allocation55_spill] sm:$0xff] %v8356_v56  ;;  %11427 = vst [vmem:[#allocation56_spill] sm:$0xff] %v8358_v61  ;;  %v2267_v61 = vld [vmem:[%s7693_s17 + $0x7c] sm:$0xff] }
 0x197   : > { %v966_v3 = vpop.f32.mrf.mxu0  ;;  %v1319_v42 = vpop.f32.mrf.mxu1  ;;  %6625 = vmatmul.mubr.msk.f32.gmra.mxu0 %vm629_vm0, %v2265_v62 }
 0x198   : > { %v8361_v57 = vadd.f32 %v1319_v42, %v966_v3  ;;  %2537 = vmatprep.mubr.f32.mxu0 %v11364_v0 }
 0x199   : > { %v8365_v43 = vpop.f32.mrf.mxu0  ;;  %v8367_v34 = vpop.f32.mrf.mxu1 }
 0x19a   : > { %11428 = vst [vmem:[#allocation57_spill] sm:$0xff] %v8365_v43  ;;  %11429 = vst [vmem:[#allocation58_spill] sm:$0xff] %v8367_v34  ;;  %v2268_v34 = vld [vmem:[%s7693_s17 + $0x84] sm:$0xff] }
 0x19b   : > { %v972_v38 = vpop.f32.mrf.mxu0  ;;  %v1325_v29 = vpop.f32.mrf.mxu1  ;;  %6626 = vmatmul.mubr.msk.f32.gmra.mxu0 %vm629_vm0, %v2266_v12 }
 0x19c   : > { %v8370_v56 = vadd.f32 %v1325_v29, %v972_v38  ;;  %2543 = vmatprep.mubr.f32.mxu0 %v11364_v0 }
 0x19d   : > { %v8374_v42 = vpop.f32.mrf.mxu0  ;;  %v8376_v62 = vpop.f32.mrf.mxu1 }
 0x19e   : > { %11430 = vst [vmem:[#allocation59_spill] sm:$0xff] %v8374_v42  ;;  %11431 = vst [vmem:[#allocation60_spill] sm:$0xff] %v8376_v62 }
 0x19f   : > { %v978_v3 = vpop.f32.mrf.mxu0  ;;  %v1331_v27 = vpop.f32.mrf.mxu1  ;;  %6627 = vmatmul.mubr.msk.f32.gmra.mxu0 %vm629_vm0, %v2267_v61 }
 0x1a0   : > { %v8379_v43 = vadd.f32 %v1331_v27, %v978_v3  ;;  %2549 = vmatprep.mubr.f32.mxu0 %v11364_v0 }
 0x1a1   : > { %v8383_v12 = vpop.f32.mrf.mxu0  ;;  %v8385_v29 = vpop.f32.mrf.mxu1 }
 0x1a2   : > { %11432 = vst [vmem:[#allocation61_spill] sm:$0xff] %v8383_v12  ;;  %11433 = vst [vmem:[#allocation62_spill] sm:$0xff] %v8385_v29 }
 0x1a3   : > { %v1539_v38 = vpop.f32.mrf.mxu0  ;;  %6628 = vmatmul.mubr.msk.f32.gmra.mxu0 %vm629_vm0, %v2268_v34  ;;  %v1997_v42 = vpop.f32.mrf.mxu1 }
 0x1a4   : > { %v1730_v62 = vadd.f32 %v1539_v38, %v8071_v15  ;;  %2555 = vmatprep.mubr.f32.mxu0 %v11364_v0  ;;  %v2270_v15 = vld [vmem:[%s7693_s17 + $0x94] sm:$0xff] }
 0x1a5   : > { %v1541_v61 = vpop.f32.mrf.mxu0  ;;  %v8391_v27 = vpop.f32.mrf.mxu1 }
 0x1a6   : > { %v8394_v3 = vadd.f32 %v1541_v61, %v8077_v20  ;;  %v8396_v14 = vadd.f32 %v1997_v42, %v1730_v62 }
 0x1a7   : > { %v1545_v29 = vpop.f32.mrf.mxu0  ;;  %6629 = vmatmul.mubr.msk.f32.gmra.mxu0 %vm629_vm0, %v2269_v16  ;;  %v2003_v12 = vpop.f32.mrf.mxu1 }
 0x1a8   : > { %v1732_v34 = vadd.f32 %v1545_v29, %v8081_v23  ;;  %2561 = vmatprep.mubr.f32.mxu0 %v11364_v0  ;;  %v2271_v23 = vld [vmem:[%s7693_s17 + $0x9c] sm:$0xff] }
 0x1a9   : > { %v1547_v38 = vpop.f32.mrf.mxu0  ;;  %v8402_v6 = vpop.f32.mrf.mxu1 }
 0x1aa   : > { %v8405_v4 = vadd.f32 %v1547_v38, %v8087_v28  ;;  %v8407_v20 = vadd.f32 %v2003_v12, %v1732_v34 }
 0x1ab   : > { %v1551_v42 = vpop.f32.mrf.mxu0  ;;  %6630 = vmatmul.mubr.msk.f32.gmra.mxu0 %vm629_vm0, %v2270_v15  ;;  %v2009_v62 = vpop.f32.mrf.mxu1 }
 0x1ac   : > { %v1734_v16 = vadd.f32 %v1551_v42, %v8091_v31  ;;  %2567 = vmatprep.mubr.f32.mxu0 %v11364_v0  ;;  %v2272_v31 = vld [vmem:[%s7693_s17 + $0xa4] sm:$0xff] }
 0x1ad   : > { %v1553_v29 = vpop.f32.mrf.mxu0  ;;  %v8413_v61 = vpop.f32.mrf.mxu1 }
 0x1ae   : > { %v8416_v59 = vadd.f32 %v1553_v29, %v8097_v36  ;;  %v8418_v28 = vadd.f32 %v2009_v62, %v1734_v16 }
 0x1af   : > { %v1557_v12 = vpop.f32.mrf.mxu0  ;;  %6631 = vmatmul.mubr.msk.f32.gmra.mxu0 %vm629_vm0, %v2271_v23  ;;  %v2015_v34 = vpop.f32.mrf.mxu1 }
 0x1b0   : > { %v1736_v15 = vadd.f32 %v1557_v12, %v8101_v39  ;;  %2573 = vmatprep.mubr.f32.mxu0 %v11364_v0  ;;  %v2273_v39 = vld [vmem:[%s7693_s17 + $0xac] sm:$0xff] }
 0x1b1   : > { %v1559_v38 = vpop.f32.mrf.mxu0  ;;  %v8424_v42 = vpop.f32.mrf.mxu1 }
 0x1b2   : > { %v8427_v58 = vadd.f32 %v1559_v38, %v8107_v44  ;;  %v8429_v36 = vadd.f32 %v2015_v34, %v1736_v15 }
 0x1b3   : > { %v1563_v62 = vpop.f32.mrf.mxu0  ;;  %6632 = vmatmul.mubr.msk.f32.gmra.mxu0 %vm629_vm0, %v2272_v31  ;;  %v2021_v16 = vpop.f32.mrf.mxu1 }
 0x1b4   : > { %v1738_v23 = vadd.f32 %v1563_v62, %v8111_v47  ;;  %2579 = vmatprep.mubr.f32.mxu0 %v11364_v0  ;;  %v2274_v47 = vld [vmem:[%s7693_s17 + $0xb4] sm:$0xff] }
 0x1b5   : > { %v1565_v29 = vpop.f32.mrf.mxu0  ;;  %v8435_v12 = vpop.f32.mrf.mxu1 }
 0x1b6   : > { %v8438_v50 = vadd.f32 %v1565_v29, %v8117_v52  ;;  %v8440_v44 = vadd.f32 %v2021_v16, %v1738_v23 }
 0x1b7   : > { %v1569_v34 = vpop.f32.mrf.mxu0  ;;  %6633 = vmatmul.mubr.msk.f32.gmra.mxu0 %vm629_vm0, %v2273_v39  ;;  %v2027_v15 = vpop.f32.mrf.mxu1 }
 0x1b8   : > { %v1740_v31 = vadd.f32 %v1569_v34, %v8121_v55  ;;  %2585 = vmatprep.mubr.f32.mxu0 %v11364_v0  ;;  %v2275_v55 = vld [vmem:[%s7693_s17 + $0xbc] sm:$0xff] }
 0x1b9   : > { %v1571_v38 = vpop.f32.mrf.mxu0  ;;  %v8446_v62 = vpop.f32.mrf.mxu1 }
 0x1ba   : > { %v8449_v49 = vadd.f32 %v1571_v38, %v8127_v60  ;;  %v8451_v52 = vadd.f32 %v2027_v15, %v1740_v31 }
 0x1bb   : > { %v1575_v16 = vpop.f32.mrf.mxu0  ;;  %6634 = vmatmul.mubr.msk.f32.gmra.mxu0 %vm629_vm0, %v2274_v47  ;;  %v8454_v23 = vpop.f32.mrf.mxu1 }
 0x1bc   : > { %v8457_v39 = vadd.f32 %v1575_v16, %v8131_v63  ;;  %2591 = vmatprep.mubr.f32.mxu0 %v11364_v0  ;;  %v2276_v63 = vld [vmem:[%s7693_s17 + $0xc4] sm:$0xff] }
 0x1bd   : > { %v1577_v29 = vpop.f32.mrf.mxu0  ;;  %v8461_v34 = vpop.f32.mrf.mxu1 }
 0x1be   : > { %v8464_v60 = vadd.f32 %v1577_v29, %v8137_v5 }
 0x1bf   : > { %v1581_v15 = vpop.f32.mrf.mxu0  ;;  %6635 = vmatmul.mubr.msk.f32.gmra.mxu0 %vm629_vm0, %v2275_v55  ;;  %v8467_v31 = vpop.f32.mrf.mxu1 }
 0x1c0   : > { %v8470_v47 = vadd.f32 %v1581_v15, %v8141_v8  ;;  %2597 = vmatprep.mubr.f32.mxu0 %v11364_v0  ;;  %v2277_v8 = vld [vmem:[%s7693_s17 + $0xcc] sm:$0xff] }
 0x1c1   : > { %v1583_v38 = vpop.f32.mrf.mxu0  ;;  %v8474_v16 = vpop.f32.mrf.mxu1 }
 0x1c2   : > { %11434 = vst [vmem:[#allocation63_spill] sm:$0xff] %v8474_v16  ;;  %v8477_v41 = vadd.f32 %v1583_v38, %v8147_v13 }
 0x1c3   : > { %v1587_v5 = vpop.f32.mrf.mxu0  ;;  %6636 = vmatmul.mubr.msk.f32.gmra.mxu0 %vm629_vm0, %v2276_v63  ;;  %v8480_v29 = vpop.f32.mrf.mxu1 }
 0x1c4   : > { %11435 = vst [vmem:[#allocation64_spill] sm:$0xff] %v8480_v29  ;;  %v8483_v55 = vadd.f32 %v1587_v5, %v8151_v17  ;;  %2603 = vmatprep.mubr.f32.mxu0 %v11364_v0  ;;  %v2278_v17 = vld [vmem:[%s7693_s17 + $0xd4] sm:$0xff] }
 0x1c5   : > { %v8487_v15 = vpop.f32.mrf.mxu0  ;;  %v8489_v40 = vpop.f32.mrf.mxu1 }
 0x1c6   : > { %11436 = vst [vmem:[#allocation65_spill] sm:$0xff] %v8489_v40 }
 0x1c7   : > { %v1593_v16 = vpop.f32.mrf.mxu0  ;;  %6637 = vmatmul.mubr.msk.f32.gmra.mxu0 %vm629_vm0, %v2277_v8  ;;  %v8492_v13 = vpop.f32.mrf.mxu1 }
 0x1c8   : > { %11437 = vst [vmem:[#allocation66_spill] sm:$0xff] %v8492_v13  ;;  %v8495_v63 = vadd.f32 %v1593_v16, %v8163_v26  ;;  %2609 = vmatprep.mubr.f32.mxu0 %v11364_v0  ;;  %v2279_v26 = vld [vmem:[%s7693_s17 + $0xdc] sm:$0xff] }
 0x1c9   : > { %v8499_v38 = vpop.f32.mrf.mxu0  ;;  %v8501_v5 = vpop.f32.mrf.mxu1 }
 0x1ca   : > { %11438 = vst [vmem:[#allocation67_spill] sm:$0xff] %v8495_v63  ;;  %11439 = vst [vmem:[#allocation68_spill] sm:$0xff] %v8501_v5 }
 0x1cb   : > { %v1599_v29 = vpop.f32.mrf.mxu0  ;;  %6638 = vmatmul.mubr.msk.f32.gmra.mxu0 %vm629_vm0, %v2278_v17  ;;  %v8504_v40 = vpop.f32.mrf.mxu1 }
 0x1cc   : > { %11440 = vst [vmem:[#allocation69_spill] sm:$0xff] %v8504_v40  ;;  %v8507_v8 = vadd.f32 %v1599_v29, %v8175_v35  ;;  %2615 = vmatprep.mubr.f32.mxu0 %v11364_v0  ;;  %v2280_v35 = vld [vmem:[%s7693_s17 + $0xe4] sm:$0xff] }
 0x1cd   : > { %v8511_v16 = vpop.f32.mrf.mxu0  ;;  %v8513_v13 = vpop.f32.mrf.mxu1 }
 0x1ce   : > { %11441 = vst [vmem:[#allocation70_spill] sm:$0xff] %v8507_v8  ;;  %11442 = vst [vmem:[#allocation71_spill] sm:$0xff] %v8513_v13 }
 0x1cf   : > { %v1605_v63 = vpop.f32.mrf.mxu0  ;;  %6639 = vmatmul.mubr.msk.f32.gmra.mxu0 %vm629_vm0, %v2279_v26  ;;  %v8516_v5 = vpop.f32.mrf.mxu1 }
 0x1d0   : > { %11443 = vst [vmem:[#allocation72_spill] sm:$0xff] %v8516_v5  ;;  %v8519_v17 = vadd.f32 %v1605_v63, %v8187_v45  ;;  %2621 = vmatprep.mubr.f32.mxu0 %v11364_v0  ;;  %v2281_v45 = vld [vmem:[%s7693_s17 + $0xec] sm:$0xff] }
 0x1d1   : > { %v8523_v29 = vpop.f32.mrf.mxu0  ;;  %v8525_v40 = vpop.f32.mrf.mxu1 }
 0x1d2   : > { %11444 = vst [vmem:[#allocation73_spill] sm:$0xff] %v8519_v17  ;;  %11445 = vst [vmem:[#allocation74_spill] sm:$0xff] %v8525_v40 }
 0x1d3   : > { %v1611_v8 = vpop.f32.mrf.mxu0  ;;  %6640 = vmatmul.mubr.msk.f32.gmra.mxu0 %vm629_vm0, %v2280_v35  ;;  %v8528_v13 = vpop.f32.mrf.mxu1 }
 0x1d4   : > { %11446 = vst [vmem:[#allocation75_spill] sm:$0xff] %v8528_v13  ;;  %v8531_v26 = vadd.f32 %v1611_v8, %v8199_v54  ;;  %2627 = vmatprep.mubr.f32.mxu0 %v11364_v0  ;;  %v2282_v54 = vld [vmem:[%s7693_s17 + $0xf4] sm:$0xff] }
 0x1d5   : > { %v8535_v63 = vpop.f32.mrf.mxu0  ;;  %v8537_v5 = vpop.f32.mrf.mxu1 }
 0x1d6   : > { %11447 = vst [vmem:[#allocation76_spill] sm:$0xff] %v8531_v26  ;;  %11448 = vst [vmem:[#allocation77_spill] sm:$0xff] %v8535_v63 }
 0x1d7   : > { %11449 = vst [vmem:[#allocation78_spill] sm:$0xff] %v8537_v5  ;;  %v1617_v17 = vpop.f32.mrf.mxu0  ;;  %6641 = vmatmul.mubr.msk.f32.gmra.mxu0 %vm629_vm0, %v2281_v45  ;;  %v8540_v40 = vpop.f32.mrf.mxu1  ;;  %v2283_v45 = vld [vmem:[%s7693_s17 + $0xfc] sm:$0xf] }
 0x1d8   : > { %11450 = vst [vmem:[#allocation79_spill] sm:$0xff] %v8540_v40  ;;  %v8543_v35 = vadd.f32 %v1617_v17, %v8211_v1  ;;  %2633 = vmatprep.mubr.f32.mxu0 %v11364_v0 }
 0x1d9   : > { %v8547_v8 = vpop.f32.mrf.mxu0  ;;  %v8549_v13 = vpop.f32.mrf.mxu1 }
 0x1da   : > { %11451 = vst [vmem:[#allocation80_spill] sm:$0xff] %v8543_v35  ;;  %11452 = vst [vmem:[#allocation81_spill] sm:$0xff] %v8549_v13 }
 0x1db   : > { %v1623_v26 = vpop.f32.mrf.mxu0  ;;  %6642 = vmatmul.mubr.msk.f32.gmra.mxu0 %vm629_vm0, %v2282_v54  ;;  %v8552_v63 = vpop.f32.mrf.mxu1 }
 0x1dc   : > { %11453 = vst [vmem:[#allocation82_spill] sm:$0xff] %v8552_v63  ;;  %v8555_v5 = vadd.f32 %v1623_v26, %v8223_v10  ;;  %2639 = vmatprep.mubr.f32.mxu0 %v11364_v0 }
 0x1dd   : > { %v8559_v1 = vpop.f32.mrf.mxu0  ;;  %v8561_v17 = vpop.f32.mrf.mxu1 }
 0x1de   : > { %11454 = vst [vmem:[#allocation83_spill] sm:$0xff] %v8555_v5  ;;  %11455 = vst [vmem:[#allocation84_spill] sm:$0xff] %v8559_v1 }
 0x1df   : > { %11456 = vst [vmem:[#allocation85_spill] sm:$0xff] %v8561_v17  ;;  %v1629_v40 = vpop.f32.mrf.mxu0  ;;  %6643 = vmatmul.mubr.msk.f32.gmra.mxu0 %vm629_vm0, %v2283_v45  ;;  %v8564_v35 = vpop.f32.mrf.mxu1 }
 0x1e0   : > { %11457 = vst [vmem:[#allocation86_spill] sm:$0xff] %v8564_v35  ;;  %v8567_v13 = vadd.f32 %v1629_v40, %v8235_v24  ;;  %4010 = vmatprep.mubr.f32.mxu0 %v11364_v0 }
 0x1e1   : > { %v8570_v54 = vpop.f32.mrf.mxu0  ;;  %v8572_v10 = vpop.f32.mrf.mxu1 }
 0x1e2   : > { %11458 = vst [vmem:[#allocation87_spill] sm:$0xff] %v8567_v13  ;;  %11459 = vst [vmem:[#allocation88_spill] sm:$0xff] %v8570_v54 }
 0x1e3   : > { %11460 = vst [vmem:[#allocation89_spill] sm:$0xff] %v8572_v10  ;;  %v1635_v26 = vpop.f32.mrf.mxu0  ;;  %v8574_v63 = vpop.f32.mrf.mxu1 }
 0x1e4   : > { %11461 = vst [vmem:[#allocation90_spill] sm:$0xff] %v8574_v63  ;;  %v8577_v5 = vadd.f32 %v1635_v26, %v8244_v37 }
 0x1e5   : > { %v8579_v17 = vpop.f32.mrf.mxu0  ;;  %v8581_v45 = vpop.f32.mrf.mxu1 }
 0x1e6   : > { %11462 = vst [vmem:[#allocation91_spill] sm:$0xff] %v8577_v5  ;;  %11463 = vst [vmem:[#allocation92_spill] sm:$0xff] %v8579_v17 }
 0x1e7   : > { %11464 = vst [vmem:[#allocation93_spill] sm:$0xff] %v8581_v45  ;;  %v1641_v35 = vpop.f32.mrf.mxu0  ;;  %v2099_v1 = vpop.f32.mrf.mxu1 }
 0x1e8   : > { %v1764_v40 = vadd.f32 %v1641_v35, %v8253_v51 }
 0x1e9   : > { %v8584_v24 = vpop.f32.mrf.mxu0  ;;  %v8586_v0 = vpop.f32.mrf.mxu1 }
 0x1ea   : > { %11465 = vst [vmem:[#allocation94_spill] sm:$0xff] %v8584_v24  ;;  %v8588_v13 = vadd.f32 %v2099_v1, %v1764_v40 }
 0x1eb   : > { %v1647_v10 = vpop.f32.mrf.mxu0  ;;  %v2105_v54 = vpop.f32.mrf.mxu1 }
 0x1ec   : > { %11466 = vst [vmem:[#allocation95_spill] sm:$0xff] %v8588_v13  ;;  %v1766_v63 = vadd.f32 %v1647_v10, %v8262_v2 }
 0x1ed   : > { %v8591_v37 = vpop.f32.mrf.mxu0  ;;  %v8593_v26 = vpop.f32.mrf.mxu1 }
 0x1ee   : > { %11467 = vst [vmem:[#allocation96_spill] sm:$0xff] %v8591_v37  ;;  %v8595_v5 = vadd.f32 %v2105_v54, %v1766_v63 }
 0x1ef   : > { %v1653_v45 = vpop.f32.mrf.mxu0  ;;  %v2111_v17 = vpop.f32.mrf.mxu1 }
 0x1f0   : > { %11468 = vst [vmem:[#allocation97_spill] sm:$0xff] %v8595_v5  ;;  %v1768_v51 = vadd.f32 %v1653_v45, %v8271_v18 }
 0x1f1   : > { %v8598_v35 = vpop.f32.mrf.mxu0  ;;  %v8600_v24 = vpop.f32.mrf.mxu1 }
 0x1f2   : > { %v8602_v1 = vadd.f32 %v2111_v17, %v1768_v51 }
 0x1f3   : > { %v1659_v40 = vpop.f32.mrf.mxu0  ;;  %v2117_v13 = vpop.f32.mrf.mxu1 }
 0x1f4   : > { %11469 = vst [vmem:[#allocation98_spill] sm:$0xff] %v8602_v1  ;;  %v1770_v2 = vadd.f32 %v1659_v40, %v8280_v46 }
 0x1f5   : > { %v8605_v10 = vpop.f32.mrf.mxu0 }
 0x1f6   : > { %v8607_v37 = vadd.f32 %v2117_v13, %v1770_v2 }
 0x1f7   : > { %v1665_v63 = vpop.f32.mrf.mxu0 }
 0x1f8   : > { %v8610_v54 = vadd.f32 %v1665_v63, %v8289_v11 }
 0x1f9   : > { %v8612_v5 = vpop.f32.mrf.mxu0 }
 0x1fb   : > { %v1671_v18 = vpop.f32.mrf.mxu0 }
 0x1fc   : > { %v8615_v45 = vadd.f32 %v1671_v18, %v8298_v53 }
 0x1fd   : > { %v8617_v17 = vpop.f32.mrf.mxu0 }
 0x1fe   : > { %11470 = vst [vmem:[#allocation99_spill] sm:$0xff] %v8615_v45 }
 0x1ff   : > { %v1677_v51 = vpop.f32.mrf.mxu0 }
 0x200   : > { %v8620_v1 = vadd.f32 %v1677_v51, %v8307_v19 }
 0x201   : > { %v8622_v46 = vpop.f32.mrf.mxu0 }
 0x202   : > { %11471 = vst [vmem:[#allocation100_spill] sm:$0xff] %v8620_v1 }
 0x203   : > { %v1683_v13 = vpop.f32.mrf.mxu0 }
 0x204   : > { %v8625_v40 = vadd.f32 %v1683_v13, %v8316_v48 }
 0x205   : > { %v8627_v11 = vpop.f32.mrf.mxu0 }
 0x206   : > { %11472 = vst [vmem:[#allocation101_spill] sm:$0xff] %v8625_v40 }
 0x207   : > { %v1689_v2 = vpop.f32.mrf.mxu0 }
 0x208   : > { %v8630_v63 = vadd.f32 %v1689_v2, %v8325_v33 }
 0x209   : > { %v8632_v53 = vpop.f32.mrf.mxu0 }
 0x20a   : > { %11473 = vst [vmem:[#allocation102_spill] sm:$0xff] %v8630_v63  ;;  %11474 = vst [vmem:[#allocation103_spill] sm:$0xff] %v8632_v53  ;;  %v2712_v63 = vlaneseq }
 0x20b   : > { %v1695_v18 = vpop.f32.mrf.mxu0 }
 0x20c   : > { %v8635_v45 = vadd.f32 %v1695_v18, %v8334_v25 }
 0x20d   : > { %v8637_v19 = vpop.f32.mrf.mxu0 }
 0x20e   : > { %11475 = vst [vmem:[#allocation104_spill] sm:$0xff] %v8635_v45  ;;  %11476 = vst [vmem:[#allocation105_spill] sm:$0xff] %v8637_v19  ;;  %v8654_v45 = vshrl.u32 %v2712_v63, 7 }
 0x20f   : > { %v1701_v51 = vpop.f32.mrf.mxu0 }
 0x210   : > { %v8640_v1 = vadd.f32 %v1701_v51, %v8343_v9  ;;  %11483 = vst [vmem:[#allocation112_spill] sm:$0xff] %v8654_v45 }
 0x211   : > { %v8642_v48 = vpop.f32.mrf.mxu0 }
 0x212   : > { %11477 = vst [vmem:[#allocation106_spill] sm:$0xff] %v8640_v1  ;;  %11478 = vst [vmem:[#allocation107_spill] sm:$0xff] %v8642_v48 }
 0x213   : > { %v1707_v13 = vpop.f32.mrf.mxu0 }
 0x214   : > { %v8645_v40 = vadd.f32 %v1707_v13, %v8352_v7  ;;  %v11366_v7 = vsub.s32 0, %v8654_v45 }
 0x215   : > { %v8647_v33 = vpop.f32.mrf.mxu0 }
 0x216   : > { %11479 = vst [vmem:[#allocation108_spill] sm:$0xff] %v8645_v40  ;;  %11480 = vst [vmem:[#allocation109_spill] sm:$0xff] %v8647_v33  ;;  %v2710_v40 = vld [vmem:[#allocation2] sm:$0x3] }
 0x217   : > { %v1713_v2 = vpop.f32.mrf.mxu0  ;;  %v8670_v63 = vrot.slane %v2710_v40, %v11366_v7 }
 0x218   : > { %v8650_v53 = vadd.f32 %v1713_v2, %v8361_v57  ;;  %v11367_v57 = vsub.s32 1, %v8654_v45 }
 0x219   : > { %v8652_v25 = vpop.f32.mrf.mxu0 }
 0x21a   : > { %11481 = vst [vmem:[#allocation110_spill] sm:$0xff] %v8650_v53  ;;  %11482 = vst [vmem:[#allocation111_spill] sm:$0xff] %v8652_v25 }
 0x21b   : > { %v1719_v18 = vpop.f32.mrf.mxu0 }
 0x21c   : > { %v8657_v9 = vadd.f32 %v1719_v18, %v8370_v56  ;;  %v2189_v56 = vadd.f32 %v8391_v27, %v8394_v3 }
 0x21d   : > { %v8659_v51 = vpop.f32.mrf.mxu0 }
 0x21e   : > { %11484 = vst [vmem:[#allocation113_spill] sm:$0xff] %v8657_v9  ;;  %11485 = vst [vmem:[#allocation114_spill] sm:$0xff] %v8659_v51  ;;  %v2191_v51 = vadd.f32 %v8402_v6, %v8405_v4 }
 0x21f   : > { %v1725_v1 = vpop.f32.mrf.mxu0 }
 0x220   : > { %v8663_v13 = vadd.f32 %v1725_v1, %v8379_v43  ;;  %v8677_v43 = vrot.slane %v2710_v40, %v11367_v57  ;;  %v2193_v40 = vadd.f32 %v8413_v61, %v8416_v59 }
 0x221   : > { %v8665_v33 = vpop.f32.mrf.mxu0 }
 0x222   : > { %11486 = vst [vmem:[#allocation115_spill] sm:$0xff] %v8663_v13  ;;  %11487 = vst [vmem:[#allocation116_spill] sm:$0xff] %v8665_v33 }
 0x223   : > { %v2455_v2 = vpop.f32.mrf.mxu0 }
 0x224   : > { %v2646_v18 = vadd.f32 %v2455_v2, %v8396_v14 }
 0x225   : > { %v2457_v9 = vpop.f32.mrf.mxu0 }
 0x226   : > { %v2647_v1 = vadd.f32 %v2457_v9, %v2189_v56  ;;  %v2722_v13 = vadd.f32 %v8670_v63, %v2646_v18 }
 0x227   : > { %v2461_v33 = vpop.f32.mrf.mxu0 }
 0x228   : > { %v2648_v7 = vadd.f32 %v2461_v33, %v8407_v20  ;;  %v2723_v53 = vadd.f32 %v8677_v43, %v2647_v1  ;;  %v2786_v3 = vmax.f32 %v2722_v13, 0.0 }
 0x229   : > { %v2463_v25 = vpop.f32.mrf.mxu0 }
 0x22a   : > { %v2724_v27 = vadd.f32 %v8670_v63, %v2648_v7  ;;  %v2649_v14 = vadd.f32 %v2463_v25, %v2191_v51  ;;  %v2787_v57 = vmax.f32 %v2723_v53, 0.0  ;;  %v2195_v25 = vadd.f32 %v8424_v42, %v8427_v58 }
 0x22b   : > { %v2467_v2 = vpop.f32.mrf.mxu0  ;;  %v2915_v51 = vrot.slane %v2786_v3, 1  ;;  %v2197_v58 = vadd.f32 %v8435_v12, %v8438_v50 }
 0x22c   : > { %v2788_v9 = vmax.f32 %v2724_v27, 0.0  ;;  %v2725_v56 = vadd.f32 %v8677_v43, %v2649_v14  ;;  %v2650_v18 = vadd.f32 %v2467_v2, %v8418_v28  ;;  %v2918_v28 = vrot.slane %v2787_v57, 1 }
 0x22d   : > { %v2469_v4 = vpop.f32.mrf.mxu0 }
 0x22e   : > { %v2916_v6 = vrot.slane %v2788_v9, 1  ;;  %v2789_v20 = vmax.f32 %v2725_v56, 0.0  ;;  %v2726_v33 = vadd.f32 %v8670_v63, %v2650_v18  ;;  %v2651_v1 = vadd.f32 %v2469_v4, %v2193_v40 }
 0x22f   : > { %v2473_v7 = vpop.f32.mrf.mxu0 }
 0x230   : > { %v2919_v13 = vrot.slane %v2789_v20, 1  ;;  %v2790_v59 = vmax.f32 %v2726_v33, 0.0  ;;  %v2727_v61 = vadd.f32 %v8677_v43, %v2651_v1  ;;  %v2652_v27 = vadd.f32 %v2473_v7, %v8429_v36 }
 0x231   : > { %v2475_v53 = vpop.f32.mrf.mxu0  ;;  %v2917_v14 = vsel %vm2914_vm1, %v2915_v51, %v2916_v6 }
 0x232   : > { %v2921_v2 = vrot.slane %v2790_v59, 1  ;;  %v2791_v56 = vmax.f32 %v2727_v61, 0.0  ;;  %v2728_v18 = vadd.f32 %v8670_v63, %v2652_v27  ;;  %v2653_v40 = vadd.f32 %v2475_v53, %v2195_v25 }
 0x233   : > { %v2479_v42 = vpop.f32.mrf.mxu0  ;;  %v2920_v4 = vsel %vm2914_vm1, %v2918_v28, %v2919_v13  ;;  %v8699_v33 = vmax.f32 %v2786_v3, %v2917_v14  ;;  %v2199_v3 = vadd.f32 %v8446_v62, %v8449_v49 }
 0x234   : > { %v2923_v1 = vrot.slane %v2791_v56, 1  ;;  %v2792_v45 = vmax.f32 %v2728_v18, 0.0  ;;  %v2729_v36 = vadd.f32 %v8677_v43, %v2653_v40  ;;  %v2654_v7 = vadd.f32 %v2479_v42, %v8440_v44 }
 0x235   : > { %11488 = vst [vmem:[#allocation117_spill] sm:$0xff] %v8699_v33  ;;  %v2481_v51 = vpop.f32.mrf.mxu0  ;;  %v2922_v61 = vsel %vm2914_vm1, %v2916_v6, %v2921_v2  ;;  %v8704_v48 = vmax.f32 %v2787_v57, %v2920_v4  ;;  %v2200_v6 = vadd.f32 %v8454_v23, %v8457_v39  ;;  %v11526_v33 = vld [vmem:[#allocation78_spill] sm:$0xff] }
 0x236   : > { %v2925_v25 = vrot.slane %v2792_v45, 1  ;;  %v2793_v27 = vmax.f32 %v2729_v36, 0.0  ;;  %v2730_v50 = vadd.f32 %v8670_v63, %v2654_v7  ;;  %v2655_v12 = vadd.f32 %v2481_v51, %v2197_v58 }
 0x237   : > { %11489 = vst [vmem:[#allocation118_spill] sm:$0xff] %v8704_v48  ;;  %v2485_v28 = vpop.f32.mrf.mxu0  ;;  %v2924_v53 = vsel %vm2914_vm1, %v2919_v13, %v2923_v1  ;;  %v8710_v14 = vmax.f32 %v2788_v9, %v2922_v61  ;;  %v1196_v36 = vadd.f32 %v8159_v22, %v8157_v21  ;;  %v2201_v7 = vadd.f32 %v8461_v34, %v8464_v60 }
 0x238   : > { %v2927_v18 = vrot.slane %v2793_v27, 1  ;;  %v2794_v44 = vmax.f32 %v2730_v50, 0.0  ;;  %v2731_v40 = vadd.f32 %v8677_v43, %v2655_v12  ;;  %v2656_v57 = vadd.f32 %v2485_v28, %v8451_v52  ;;  %v11494_v28 = vld [vmem:[#allocation63_spill] sm:$0xff] }
 0x239   : > { %11490 = vst [vmem:[#allocation119_spill] sm:$0xff] %v8710_v14  ;;  %v2487_v42 = vpop.f32.mrf.mxu0  ;;  %v2926_v58 = vsel %vm2914_vm1, %v2921_v2, %v2925_v25  ;;  %v8717_v4 = vmax.f32 %v2789_v20, %v2924_v53  ;;  %v1202_v50 = vadd.f32 %v8171_v32, %v8169_v30  ;;  %v2202_v21 = vadd.f32 %v8467_v31, %v8470_v47  ;;  %v11531_v14 = vld [vmem:[#allocation81_spill] sm:$0xff] }
 0x23a   : > { %v2929_v49 = vrot.slane %v2794_v44, 1  ;;  %v2795_v62 = vmax.f32 %v2731_v40, 0.0  ;;  %v2732_v13 = vadd.f32 %v8670_v63, %v2656_v57  ;;  %v2657_v9 = vadd.f32 %v2487_v42, %v2199_v3  ;;  %v11497_v42 = vld [vmem:[#allocation20_spill] sm:$0xff] }
 0x23b   : > { %11491 = vst [vmem:[#allocation120_spill] sm:$0xff] %v8717_v4  ;;  %v2491_v52 = vpop.f32.mrf.mxu0  ;;  %v2928_v51 = vsel %vm2914_vm1, %v2923_v1, %v2927_v18  ;;  %v8725_v23 = vmax.f32 %v2790_v59, %v2926_v58  ;;  %v2203_v53 = vadd.f32 %v11494_v28, %v8477_v41  ;;  %v1747_v40 = vadd.f32 %v8487_v15, %v1196_v36  ;;  %v11502_v28 = vld [vmem:[#allocation67_spill] sm:$0xff] }
 0x23c   : > { %v2931_v39 = vrot.slane %v2795_v62, 1  ;;  %v2796_v2 = vmax.f32 %v2732_v13, 0.0  ;;  %v8728_v20 = vadd.f32 %v8677_v43, %v2657_v9  ;;  %v2658_v61 = vadd.f32 %v2491_v52, %v2200_v6  ;;  %v11496_v6 = vld [vmem:[#allocation19_spill] sm:$0xff]  ;;  %v11498_v13 = vld [vmem:[#allocation64_spill] sm:$0xff] }
 0x23d   : > { %11492 = vst [vmem:[#allocation121_spill] sm:$0xff] %v8725_v23  ;;  %v2493_v22 = vpop.f32.mrf.mxu0  ;;  %v2930_v34 = vsel %vm2914_vm1, %v2925_v25, %v2929_v49  ;;  %v8735_v60 = vmax.f32 %v2791_v56, %v2928_v51  ;;  %v1208_v58 = vadd.f32 %v11497_v42, %v11496_v6  ;;  %v2204_v9 = vadd.f32 %v11498_v13, %v8483_v55  ;;  %v11500_v51 = vld [vmem:[#allocation65_spill] sm:$0xff]  ;;  %v11506_v42 = vld [vmem:[#allocation22_spill] sm:$0xff] }
 0x23e   : > { %v2933_v1 = vrot.slane %v2796_v2, 1  ;;  %v2797_v59 = vmax.f32 %v8728_v20, 0.0  ;;  %v2734_v12 = vadd.f32 %v8670_v63, %v2658_v61  ;;  %v2659_v3 = vadd.f32 %v2493_v22, %v2201_v7  ;;  %v11505_v6 = vld [vmem:[#allocation21_spill] sm:$0xff] }
 0x23f   : > { %11493 = vst [vmem:[#allocation122_spill] sm:$0xff] %v8735_v60  ;;  %v2497_v30 = vpop.f32.mrf.mxu0  ;;  %v2932_v32 = vsel %vm2914_vm1, %v2927_v18, %v2931_v39  ;;  %v8743_v31 = vmax.f32 %v2792_v45, %v2930_v34  ;;  %v2205_v20 = vadd.f32 %v11500_v51, %v1747_v40  ;;  %v1749_v61 = vadd.f32 %v8499_v38, %v1202_v50  ;;  %v8764_v34 = vpop.f32.mrf.mxu1  ;;  %v11537_v60 = vld [vmem:[#allocation85_spill] sm:$0xff] }
 0x240   : > { %v2935_v47 = vrot.slane %v2797_v59, 1  ;;  %v2798_v25 = vmax.f32 %v2734_v12, 0.0  ;;  %v8746_v56 = vadd.f32 %v8677_v43, %v2659_v3  ;;  %v2660_v57 = vadd.f32 %v2497_v30, %v2202_v21 }
 0x241   : > { %11495 = vst [vmem:[#allocation63_spill] sm:$0xff] %v8743_v31  ;;  %v2499_v41 = vpop.f32.mrf.mxu0  ;;  %v2934_v15 = vsel %vm2914_vm1, %v2929_v49, %v2933_v1  ;;  %v8753_v36 = vmax.f32 %v2793_v27, %v2932_v32  ;;  %v1751_v40 = vadd.f32 %v8511_v16, %v1208_v58  ;;  %v1214_v13 = vadd.f32 %v11506_v42, %v11505_v6 }
 0x242   : > { %v2937_v18 = vrot.slane %v2798_v25, 1  ;;  %v2799_v45 = vmax.f32 %v8746_v56, 0.0  ;;  %v8757_v7 = vadd.f32 %v8670_v63, %v2660_v57  ;;  %v2661_v52 = vadd.f32 %v2499_v41, %v2203_v53  ;;  %v11503_v53 = vld [vmem:[#allocation66_spill] sm:$0xff] }
 0x243   : > { %11499 = vst [vmem:[#allocation19_spill] sm:$0xff] %v8753_v36  ;;  %v2503_v21 = vpop.f32.mrf.mxu0  ;;  %v2936_v22 = vsel %vm2914_vm1, %v2931_v39, %v2935_v47  ;;  %v8762_v55 = vmax.f32 %v2794_v44, %v2934_v15  ;;  %v2206_v30 = vadd.f32 %v11503_v53, %v11502_v28  ;;  %v11540_v36 = vld [vmem:[#allocation32_spill] sm:$0xff] }
 0x244   : > { %v2939_v27 = vrot.slane %v2799_v45, 1  ;;  %v2800_v49 = vmax.f32 %v8757_v7, 0.0  ;;  %v8768_v12 = vadd.f32 %v8677_v43, %v2661_v52  ;;  %v2662_v3 = vadd.f32 %v2503_v21, %v2204_v9  ;;  %v11507_v9 = vld [vmem:[#allocation68_spill] sm:$0xff]  ;;  %v11510_v21 = vld [vmem:[#allocation69_spill] sm:$0xff] }
 0x245   : > { %11501 = vst [vmem:[#allocation20_spill] sm:$0xff] %v8762_v55  ;;  %v2505_v38 = vpop.f32.mrf.mxu0  ;;  %v2938_v50 = vsel %vm2914_vm1, %v2933_v1, %v2937_v18  ;;  %v8774_v39 = vmax.f32 %v2795_v62, %v2936_v22  ;;  %v2207_v41 = vadd.f32 %v11507_v9, %v1749_v61  ;;  %v8786_v1 = vpop.f32.mrf.mxu1 }
 0x246   : > { %v2941_v44 = vrot.slane %v2800_v49, 1  ;;  %v2801_v32 = vmax.f32 %v8768_v12, 0.0  ;;  %v8778_v56 = vadd.f32 %v8670_v63, %v2662_v3  ;;  %v2663_v57 = vadd.f32 %v2505_v38, %v2205_v20  ;;  %v11509_v20 = vld [vmem:[#allocation70_spill] sm:$0xff]  ;;  %v11511_v12 = vld [vmem:[#allocation71_spill] sm:$0xff] }
 0x247   : > { %11504 = vst [vmem:[#allocation64_spill] sm:$0xff] %v8774_v39  ;;  %v2509_v15 = vpop.f32.mrf.mxu0  ;;  %v2940_v16 = vsel %vm2914_vm1, %v2935_v47, %v2939_v27  ;;  %v8784_v58 = vmax.f32 %v2796_v2, %v2938_v50  ;;  %v2208_v22 = vadd.f32 %v11510_v21, %v11509_v20  ;;  %v2209_v3 = vadd.f32 %v11511_v12, %v1751_v40 }
 0x248   : > { %v2943_v62 = vrot.slane %v2801_v32, 1  ;;  %v2802_v7 = vmax.f32 %v8778_v56, 0.0  ;;  %v8790_v52 = vadd.f32 %v8677_v43, %v2663_v57  ;;  %v2664_v51 = vadd.f32 %v2509_v15, %v2206_v30  ;;  %v11517_v15 = vld [vmem:[#allocation72_spill] sm:$0xff] }
 0x249   : > { %11508 = vst [vmem:[#allocation65_spill] sm:$0xff] %v8784_v58  ;;  %v2511_v61 = vpop.f32.mrf.mxu0  ;;  %v2942_v28 = vsel %vm2914_vm1, %v2937_v18, %v2941_v44  ;;  %v8796_v47 = vmax.f32 %v2797_v59, %v2940_v16  ;;  %v1753_v56 = vadd.f32 %v8523_v29, %v1214_v13  ;;  %v3170_v18 = vld [vmem:[%s11344_s3 + $0x8] sm:$0xff]  ;;  %v8809_v59 = vpop.f32.mrf.mxu1  ;;  %v11514_v29 = vld [vmem:[#allocation23_spill] sm:$0xff] }
 0x24a   : > { %v2945_v2 = vrot.slane %v2802_v7, 1  ;;  %v2803_v53 = vmax.f32 %v8790_v52, 0.0  ;;  %v8800_v38 = vadd.f32 %v8670_v63, %v2664_v51  ;;  %v2665_v50 = vadd.f32 %v2511_v61, %v2207_v41  ;;  %6646 = vmatprep.mubr.msk.f32.mxu1 %vm3201_vm2, %v3170_v18  ;;  %v11516_v13 = vld [vmem:[#allocation73_spill] sm:$0xff] }
 0x24b   : > { %11512 = vst [vmem:[#allocation67_spill] sm:$0xff] %v8796_v47  ;;  %v2515_v30 = vpop.f32.mrf.mxu0  ;;  %v2944_v57 = vsel %vm2914_vm1, %v2939_v27, %v2943_v62  ;;  %v8804_v6 = vmax.f32 %v2798_v25, %v2942_v28  ;;  %v11515_v27 = vld [vmem:[#allocation24_spill] sm:$0xff]  ;;  %v2210_v16 = vadd.f32 %v11517_v15, %v11516_v13  ;;  %v11519_v28 = vld [vmem:[#allocation74_spill] sm:$0xff]  ;;  %v8832_v13 = vpop.f32.mrf.mxu1 }
 0x24c   : > { %v2947_v40 = vrot.slane %v2803_v53, 1  ;;  %v2804_v42 = vmax.f32 %v8800_v38, 0.0  ;;  %v8813_v9 = vadd.f32 %v8677_v43, %v2665_v50  ;;  %v2666_v41 = vadd.f32 %v2515_v30, %v2208_v22  ;;  %v11520_v50 = vld [vmem:[#allocation77_spill] sm:$0xff]  ;;  %v11546_v47 = vld [vmem:[#allocation34_spill] sm:$0xff] }
 0x24d   : > { %11513 = vst [vmem:[#allocation66_spill] sm:$0xff] %v8804_v6  ;;  %v1220_v25 = vadd.f32 %v11515_v27, %v11514_v29  ;;  %v2517_v52 = vpop.f32.mrf.mxu0  ;;  %v2946_v51 = vsel %vm2914_vm1, %v2941_v44, %v2945_v2  ;;  %v8821_v20 = vmax.f32 %v2799_v45, %v2944_v57  ;;  %v2211_v38 = vadd.f32 %v11519_v28, %v1753_v56  ;;  %v11524_v56 = vld [vmem:[#allocation76_spill] sm:$0xff] }
 0x24e   : > { %v2949_v21 = vrot.slane %v2804_v42, 1  ;;  %v2805_v12 = vmax.f32 %v8813_v9, 0.0  ;;  %v8825_v61 = vadd.f32 %v8670_v63, %v2666_v41  ;;  %v2667_v22 = vadd.f32 %v2517_v52, %v2209_v3  ;;  %v11522_v41 = vld [vmem:[#allocation25_spill] sm:$0xff]  ;;  %v11523_v3 = vld [vmem:[#allocation26_spill] sm:$0xff]  ;;  %v11525_v52 = vld [vmem:[#allocation75_spill] sm:$0xff] }
 0x24f   : > { %11518 = vst [vmem:[#allocation21_spill] sm:$0xff] %v8821_v20  ;;  %v1755_v30 = vadd.f32 %v11520_v50, %v1220_v25  ;;  %v2521_v18 = vpop.f32.mrf.mxu0  ;;  %v2948_v29 = vsel %vm2914_vm1, %v2943_v62, %v2947_v40  ;;  %v8830_v27 = vmax.f32 %v2800_v49, %v2946_v51  ;;  %v1226_v15 = vadd.f32 %v11523_v3, %v11522_v41  ;;  %v11552_v20 = vld [vmem:[#allocation36_spill] sm:$0xff] }
 0x250   : > { %v2951_v45 = vrot.slane %v2805_v12, 1  ;;  %v2806_v44 = vmax.f32 %v8825_v61, 0.0  ;;  %v8836_v57 = vadd.f32 %v8677_v43, %v2667_v22  ;;  %v2668_v9 = vadd.f32 %v2521_v18, %v2210_v16 }
 0x251   : > { %11521 = vst [vmem:[#allocation22_spill] sm:$0xff] %v8830_v27  ;;  %v2212_v25 = vadd.f32 %v11525_v52, %v11524_v56  ;;  %v2523_v28 = vpop.f32.mrf.mxu0  ;;  %v2950_v62 = vsel %vm2914_vm1, %v2945_v2, %v2949_v21  ;;  %v8843_v49 = vmax.f32 %v2801_v32, %v2948_v29  ;;  %v2213_v16 = vadd.f32 %v11526_v33, %v1755_v30  ;;  %v8854_v52 = vpop.f32.mrf.mxu1  ;;  %v11529_v33 = vld [vmem:[#allocation80_spill] sm:$0xff]  ;;  %v11530_v30 = vld [vmem:[#allocation79_spill] sm:$0xff] }
 0x252   : > { %v2953_v51 = vrot.slane %v2806_v44, 1  ;;  %v2807_v50 = vmax.f32 %v8836_v57, 0.0  ;;  %v8847_v61 = vadd.f32 %v8670_v63, %v2668_v9  ;;  %v2669_v22 = vadd.f32 %v2523_v28, %v2211_v38  ;;  %v11527_v9 = vld [vmem:[#allocation27_spill] sm:$0xff]  ;;  %v11528_v38 = vld [vmem:[#allocation28_spill] sm:$0xff] }
 0x253   : > { %v1757_v18 = vadd.f32 %v8547_v8, %v1226_v15  ;;  %v2527_v41 = vpop.f32.mrf.mxu0  ;;  %v2952_v3 = vsel %vm2914_vm1, %v2947_v40, %v2951_v45  ;;  %v8852_v56 = vmax.f32 %v2802_v7, %v2950_v62  ;;  %v1232_v28 = vadd.f32 %v11528_v38, %v11527_v9 }
 0x254   : > { %v2955_v32 = vrot.slane %v2807_v50, 1  ;;  %v2808_v2 = vmax.f32 %v8847_v61, 0.0  ;;  %v8858_v29 = vadd.f32 %v8677_v43, %v2669_v22  ;;  %v2670_v57 = vadd.f32 %v2527_v41, %v2212_v25  ;;  %v11532_v41 = vld [vmem:[#allocation84_spill] sm:$0xff] }
 0x255   : > { %v2214_v8 = vadd.f32 %v11530_v30, %v11529_v33  ;;  %v2529_v15 = vpop.f32.mrf.mxu0  ;;  %v2954_v40 = vsel %vm2914_vm1, %v2949_v21, %v2953_v51  ;;  %v8865_v7 = vmax.f32 %v2803_v53, %v2952_v3  ;;  %v2215_v25 = vadd.f32 %v11531_v14, %v1757_v18  ;;  %v8876_v30 = vpop.f32.mrf.mxu1  ;;  %v11535_v14 = vld [vmem:[#allocation83_spill] sm:$0xff]  ;;  %v11536_v18 = vld [vmem:[#allocation82_spill] sm:$0xff] }
 0x256   : > { %v2957_v62 = vrot.slane %v2808_v2, 1  ;;  %v2809_v48 = vmax.f32 %v8858_v29, 0.0  ;;  %v8869_v61 = vadd.f32 %v8670_v63, %v2670_v57  ;;  %v2671_v22 = vadd.f32 %v2529_v15, %v2213_v16  ;;  %v11533_v57 = vld [vmem:[#allocation29_spill] sm:$0xff]  ;;  %v11534_v16 = vld [vmem:[#allocation30_spill] sm:$0xff] }
 0x257   : > { %v1759_v4 = vadd.f32 %v11532_v41, %v1232_v28  ;;  %v2533_v9 = vpop.f32.mrf.mxu0  ;;  %v2956_v38 = vsel %vm2914_vm1, %v2951_v45, %v2955_v32  ;;  %v8874_v33 = vmax.f32 %v2804_v42, %v2954_v40  ;;  %v1238_v15 = vadd.f32 %v11534_v16, %v11533_v57 }
 0x258   : > { %v2959_v53 = vrot.slane %v2809_v48, 1  ;;  %v2810_v21 = vmax.f32 %v8869_v61, 0.0  ;;  %v8880_v3 = vadd.f32 %v8677_v43, %v2671_v22  ;;  %v2672_v29 = vadd.f32 %v2533_v9, %v2214_v8  ;;  %v11538_v9 = vld [vmem:[#allocation88_spill] sm:$0xff] }
 0x259   : > { %v2216_v28 = vadd.f32 %v11536_v18, %v11535_v14  ;;  %v2535_v41 = vpop.f32.mrf.mxu0  ;;  %v2958_v45 = vsel %vm2914_vm1, %v2953_v51, %v2957_v62  ;;  %v8887_v42 = vmax.f32 %v2805_v12, %v2956_v38  ;;  %v2217_v8 = vadd.f32 %v11537_v60, %v1759_v4  ;;  %v8898_v18 = vpop.f32.mrf.mxu1  ;;  %v11542_v4 = vld [vmem:[#allocation86_spill] sm:$0xff] }
 0x25a   : > { %v2961_v40 = vrot.slane %v2810_v21, 1  ;;  %v2811_v23 = vmax.f32 %v8880_v3, 0.0  ;;  %v8891_v61 = vadd.f32 %v8670_v63, %v2672_v29  ;;  %v2673_v22 = vadd.f32 %v2535_v41, %v2215_v25  ;;  %v11539_v29 = vld [vmem:[#allocation31_spill] sm:$0xff] }
 0x25b   : > { %v1761_v31 = vadd.f32 %v11538_v9, %v1238_v15  ;;  %v2539_v57 = vpop.f32.mrf.mxu0  ;;  %v2960_v16 = vsel %vm2914_vm1, %v2955_v32, %v2959_v53  ;;  %v8896_v14 = vmax.f32 %v2806_v44, %v2958_v45  ;;  %v1244_v25 = vadd.f32 %v11540_v36, %v11539_v29  ;;  %v11541_v41 = vld [vmem:[#allocation87_spill] sm:$0xff] }
 0x25c   : > { %v2963_v12 = vrot.slane %v2811_v23, 1  ;;  %v2812_v51 = vmax.f32 %v8891_v61, 0.0  ;;  %v2749_v38 = vadd.f32 %v8677_v43, %v2673_v22  ;;  %v2674_v3 = vadd.f32 %v2539_v57, %v2216_v28  ;;  %v11543_v61 = vld [vmem:[#allocation89_spill] sm:$0xff]  ;;  %v11544_v22 = vld [vmem:[#allocation92_spill] sm:$0xff] }
 0x25d   : > { %v2218_v60 = vadd.f32 %v11542_v4, %v11541_v41  ;;  %v2541_v15 = vpop.f32.mrf.mxu0  ;;  %v2962_v9 = vsel %vm2914_vm1, %v2957_v62, %v2961_v40  ;;  %v8907_v32 = vmax.f32 %v2807_v50, %v2960_v16  ;;  %v2219_v58 = vadd.f32 %v11543_v61, %v1761_v31  ;;  %v8915_v41 = vpop.f32.mrf.mxu1 }
 0x25e   : > { %v2965_v44 = vrot.slane %v2812_v51, 1  ;;  %v2813_v45 = vmax.f32 %v2749_v38, 0.0  ;;  %v2750_v55 = vadd.f32 %v8670_v63, %v2674_v3  ;;  %v2675_v39 = vadd.f32 %v2541_v15, %v2217_v8  ;;  %v11545_v38 = vld [vmem:[#allocation33_spill] sm:$0xff]  ;;  %v11547_v8 = vld [vmem:[#allocation91_spill] sm:$0xff]  ;;  %v11548_v15 = vld [vmem:[#allocation90_spill] sm:$0xff] }
 0x25f   : > { %v1763_v28 = vadd.f32 %v11544_v22, %v1244_v25  ;;  %v2545_v57 = vpop.f32.mrf.mxu0  ;;  %v2964_v36 = vsel %vm2914_vm1, %v2959_v53, %v2963_v12  ;;  %v8913_v29 = vmax.f32 %v2808_v2, %v2962_v9  ;;  %v1250_v3 = vadd.f32 %v11546_v47, %v11545_v38 }
 0x260   : > { %v2967_v4 = vrot.slane %v2813_v45, 1  ;;  %v2814_v62 = vmax.f32 %v2750_v55, 0.0  ;;  %v2751_v50 = vadd.f32 %v8677_v43, %v2675_v39  ;;  %v2676_v16 = vadd.f32 %v2545_v57, %v2218_v60  ;;  %v11549_v55 = vld [vmem:[#allocation93_spill] sm:$0xff]  ;;  %v11550_v39 = vld [vmem:[#allocation94_spill] sm:$0xff] }
 0x261   : > { %v2220_v31 = vadd.f32 %v11548_v15, %v11547_v8  ;;  %v2547_v61 = vpop.f32.mrf.mxu0  ;;  %v2966_v25 = vsel %vm2914_vm1, %v2961_v40, %v2965_v44  ;;  %v8923_v22 = vmax.f32 %v2809_v48, %v2964_v36  ;;  %v2221_v6 = vadd.f32 %v11549_v55, %v1763_v28  ;;  %v8931_v8 = vpop.f32.mrf.mxu1 }
 0x262   : > { %v2969_v2 = vrot.slane %v2814_v62, 1  ;;  %v2815_v53 = vmax.f32 %v2751_v50, 0.0  ;;  %v2752_v9 = vadd.f32 %v8670_v63, %v2676_v16  ;;  %v2677_v19 = vadd.f32 %v2547_v61, %v2219_v58  ;;  %v11551_v50 = vld [vmem:[#allocation35_spill] sm:$0xff] }
 0x263   : > { %v1765_v60 = vadd.f32 %v11550_v39, %v1250_v3  ;;  %v2551_v57 = vpop.f32.mrf.mxu0  ;;  %v2968_v47 = vsel %vm2914_vm1, %v2963_v12, %v2967_v4  ;;  %v8929_v38 = vmax.f32 %v2810_v21, %v2966_v25  ;;  %v1256_v16 = vadd.f32 %v11552_v20, %v11551_v50  ;;  %v11553_v39 = vld [vmem:[#allocation96_spill] sm:$0xff]  ;;  %v8945_v20 = vpop.f32.mrf.mxu1 }
 0x264   : > { %v2971_v15 = vrot.slane %v2815_v53, 1  ;;  %v2816_v40 = vmax.f32 %v2752_v9, 0.0  ;;  %v2753_v48 = vadd.f32 %v8677_v43, %v2677_v19  ;;  %v2678_v36 = vadd.f32 %v2551_v57, %v2220_v31 }
 0x265   : > { %v2553_v58 = vpop.f32.mrf.mxu0  ;;  %v2970_v28 = vsel %vm2914_vm1, %v2965_v44, %v2969_v2  ;;  %v8937_v61 = vmax.f32 %v2811_v23, %v2968_v47  ;;  %v2223_v25 = vadd.f32 %v8586_v0, %v1765_v60  ;;  %v1767_v9 = vadd.f32 %v11553_v39, %v1256_v16  ;;  %v11554_v47 = vld [vmem:[#allocation95_spill] sm:$0xff] }
 0x266   : > { %v2973_v3 = vrot.slane %v2816_v40, 1  ;;  %v2817_v55 = vmax.f32 %v2753_v48, 0.0  ;;  %v2754_v21 = vadd.f32 %v8670_v63, %v2678_v36  ;;  %v2679_v12 = vadd.f32 %v2553_v58, %v2221_v6  ;;  %v11555_v36 = vld [vmem:[#allocation37_spill] sm:$0xff]  ;;  %v11556_v6 = vld [vmem:[#allocation38_spill] sm:$0xff] }
 0x267   : > { %v2557_v27 = vpop.f32.mrf.mxu0  ;;  %v2972_v19 = vsel %vm2914_vm1, %v2967_v4, %v2971_v15  ;;  %v8943_v31 = vmax.f32 %v2812_v51, %v2970_v28  ;;  %v1262_v50 = vadd.f32 %v11556_v6, %v11555_v36  ;;  %v8963_v36 = vpop.f32.mrf.mxu1  ;;  %v11559_v6 = vld [vmem:[#allocation39_spill] sm:$0xff] }
 0x268   : > { %v2975_v57 = vrot.slane %v2817_v55, 1  ;;  %v2818_v44 = vmax.f32 %v2754_v21, 0.0  ;;  %v8948_v23 = vadd.f32 %v8677_v43, %v2679_v12  ;;  %v2680_v48 = vadd.f32 %v2557_v27, %v11554_v47  ;;  %11557 = vst [vmem:[#allocation68_spill] sm:$0xff] %v8963_v36 }
 0x269   : > { %v2559_v0 = vpop.f32.mrf.mxu0  ;;  %v2974_v60 = vsel %vm2914_vm1, %v2969_v2, %v2973_v3  ;;  %v8954_v16 = vmax.f32 %v2813_v45, %v2972_v19  ;;  %v2225_v21 = vadd.f32 %v8593_v26, %v1767_v9  ;;  %v1769_v12 = vadd.f32 %v8598_v35, %v1262_v50 }
 0x26a   : > { %v2977_v4 = vrot.slane %v2818_v44, 1  ;;  %v2819_v51 = vmax.f32 %v8948_v23, 0.0  ;;  %v8958_v58 = vadd.f32 %v8670_v63, %v2680_v48  ;;  %v2681_v28 = vadd.f32 %v2559_v0, %v2223_v25  ;;  %v11558_v23 = vld [vmem:[#allocation97_spill] sm:$0xff]  ;;  %v11560_v25 = vld [vmem:[#allocation40_spill] sm:$0xff] }
 0x26b   : > { %v2563_v27 = vpop.f32.mrf.mxu0  ;;  %v2976_v39 = vsel %vm2914_vm1, %v2971_v15, %v2975_v57  ;;  %v3133_v47 = vmax.f32 %v2814_v62, %v2974_v60  ;;  %v1268_v0 = vadd.f32 %v11560_v25, %v11559_v6  ;;  %v8980_v6 = vpop.f32.mrf.mxu1 }
 0x26c   : > { %v2979_v2 = vrot.slane %v2819_v51, 1  ;;  %v2820_v45 = vmax.f32 %v8958_v58, 0.0  ;;  %v8967_v19 = vadd.f32 %v8677_v43, %v2681_v28  ;;  %v2682_v48 = vadd.f32 %v2563_v27, %v11558_v23 }
 0x26d   : > { %v2565_v26 = vpop.f32.mrf.mxu0  ;;  %v2978_v35 = vsel %vm2914_vm1, %v2973_v3, %v2977_v4  ;;  %v3134_v9 = vmax.f32 %v2815_v53, %v2976_v39  ;;  %v2227_v58 = vadd.f32 %v8600_v24, %v1769_v12  ;;  %v1771_v28 = vadd.f32 %v8605_v10, %v1268_v0  ;;  %v11561_v39 = vld [vmem:[#allocation98_spill] sm:$0xff] }
 0x26e   : > { %v2981_v50 = vrot.slane %v2820_v45, 1  ;;  %v2821_v62 = vmax.f32 %v8967_v19, 0.0  ;;  %v8975_v15 = vadd.f32 %v8670_v63, %v2682_v48  ;;  %v2683_v60 = vadd.f32 %v2565_v26, %v2225_v21  ;;  %v11562_v48 = vld [vmem:[#allocation41_spill] sm:$0xff]  ;;  %v11563_v21 = vld [vmem:[#allocation42_spill] sm:$0xff] }
 0x26f   : > { %v2569_v36 = vpop.f32.mrf.mxu0  ;;  %v2980_v27 = vsel %vm2914_vm1, %v2975_v57, %v2979_v2  ;;  %v3135_v23 = vmax.f32 %v2816_v40, %v2978_v35  ;;  %v1274_v26 = vadd.f32 %v11563_v21, %v11562_v48 }
 0x270   : > { %v2983_v25 = vrot.slane %v2821_v62, 1  ;;  %v2822_v53 = vmax.f32 %v8975_v15, 0.0  ;;  %v8984_v3 = vadd.f32 %v8677_v43, %v2683_v60  ;;  %v2684_v19 = vadd.f32 %v2569_v36, %v11561_v39 }
 0x271   : > { %v2571_v24 = vpop.f32.mrf.mxu0  ;;  %v3136_v12 = vmax.f32 %v2817_v55, %v2980_v27  ;;  %v2982_v10 = vsel %vm2914_vm1, %v2977_v4, %v2981_v50  ;;  %v2229_v60 = vadd.f32 %v8764_v34, %v1771_v28  ;;  %v1773_v36 = vadd.f32 %v8612_v5, %v1274_v26  ;;  %v9001_v4 = vpop.f32.mrf.mxu1  ;;  %v11564_v5 = vld [vmem:[#allocation43_spill] sm:$0xff] }
 0x272   : > { %v2985_v40 = vrot.slane %v2822_v53, 1  ;;  %v2823_v57 = vmax.f32 %v8984_v3, 0.0  ;;  %v8994_v0 = vadd.f32 %v8670_v63, %v2684_v19  ;;  %v2685_v35 = vadd.f32 %v2571_v24, %v2227_v58  ;;  %v11565_v58 = vld [vmem:[#allocation44_spill] sm:$0xff] }
 0x273   : > { %3257 = vmatprep.subr.mxu1 %v3136_v12  ;;  %v2575_v39 = vpop.f32.mrf.mxu0  ;;  %v2984_v48 = vsel %vm2914_vm1, %v2979_v2, %v2983_v25  ;;  %v8999_v55 = vmax.f32 %v2818_v44, %v2982_v10  ;;  %v1280_v28 = vadd.f32 %v11565_v58, %v11564_v5  ;;  %v2230_v44 = vadd.f32 %v8786_v1, %v8610_v54 }
 0x274   : > { %v2987_v27 = vrot.slane %v2823_v57, 1  ;;  %v2824_v21 = vmax.f32 %v8994_v0, 0.0  ;;  %v9007_v19 = vadd.f32 %v8677_v43, %v2685_v35  ;;  %3258 = vmatpush1.msra.mxu1 %v3135_v23  ;;  %v2686_v34 = vadd.f32 %v2575_v39, %v8607_v37 }
 0x275   : > { %3259 = vmatprep.subr.mxu1 %v3134_v9  ;;  %v2577_v2 = vpop.f32.mrf.mxu0  ;;  %v2986_v26 = vsel %vm2914_vm1, %v2981_v50, %v2985_v40  ;;  %v9015_v24 = vmax.f32 %v2819_v51, %v2984_v48  ;;  %v2231_v35 = vadd.f32 %v8809_v59, %v1773_v36  ;;  %v1775_v54 = vadd.f32 %v8617_v17, %v1280_v28  ;;  %v9029_v50 = vpop.f32.mrf.mxu1  ;;  %v11566_v59 = vld [vmem:[#allocation45_spill] sm:$0xff]  ;;  %v11568_v36 = vld [vmem:[#allocation99_spill] sm:$0xff] }
 0x276   : > { %v2989_v12 = vrot.slane %v2824_v21, 1  ;;  %v2825_v10 = vmax.f32 %v9007_v19, 0.0  ;;  %v9021_v23 = vadd.f32 %v8670_v63, %v2686_v34  ;;  %3260 = vmatpush1.msra.mxu1 %v3133_v47  ;;  %v2687_v37 = vadd.f32 %v2577_v2, %v2229_v60 }
 0x277   : > { %3261 = vmatprep.subr.mxu1 %v8954_v16  ;;  %v2581_v1 = vpop.f32.mrf.mxu0  ;;  %v2988_v51 = vsel %vm2914_vm1, %v2983_v25, %v2987_v27  ;;  %v9027_v9 = vmax.f32 %v2820_v45, %v2986_v26  ;;  %v11567_v16 = vld [vmem:[#allocation46_spill] sm:$0xff]  ;;  %v2232_v45 = vadd.f32 %v8832_v13, %v11568_v36  ;;  %v2233_v13 = vadd.f32 %v8854_v52, %v1775_v54  ;;  %v9061_v26 = vpop.f32.mrf.mxu1  ;;  %v11571_v54 = vld [vmem:[#allocation100_spill] sm:$0xff] }
 0x278   : > { %v2991_v39 = vrot.slane %v2825_v10, 1  ;;  %v2826_v48 = vmax.f32 %v9021_v23, 0.0  ;;  %v9035_v47 = vadd.f32 %v8677_v43, %v2687_v37  ;;  %3262 = vmatpush1.msra.mxu1 %v8943_v31  ;;  %v2688_v17 = vadd.f32 %v2581_v1, %v2230_v44 }
 0x279   : > { %v1286_v60 = vadd.f32 %v11567_v16, %v11566_v59  ;;  %3263 = vmatprep.subr.mxu1 %v8937_v61  ;;  %v2583_v25 = vpop.f32.mrf.mxu0  ;;  %v2990_v34 = vsel %vm2914_vm1, %v2985_v40, %v2989_v12  ;;  %v9044_v5 = vmax.f32 %v2821_v62, %v2988_v51  ;;  %v2234_v15 = vadd.f32 %v8876_v30, %v11571_v54  ;;  %v11578_v54 = vld [vmem:[#allocation52_spill] sm:$0xff] }
 0x27a   : > { %v2993_v58 = vrot.slane %v2826_v48, 1  ;;  %v2827_v28 = vmax.f32 %v9035_v47, 0.0  ;;  %v9050_v31 = vadd.f32 %v8670_v63, %v2688_v17  ;;  %3264 = vmatpush1.msra.mxu1 %v8929_v38  ;;  %v2689_v44 = vadd.f32 %v2583_v25, %v2231_v35  ;;  %v11570_v35 = vld [vmem:[#allocation48_spill] sm:$0xff]  ;;  %v11574_v25 = vld [vmem:[#allocation101_spill] sm:$0xff] }
 0x27b   : > { %v1777_v61 = vadd.f32 %v8622_v46, %v1286_v60  ;;  %3265 = vmatprep.subr.mxu1 %v8923_v22  ;;  %v2587_v40 = vpop.f32.mrf.mxu0  ;;  %v2992_v62 = vsel %vm2914_vm1, %v2987_v27, %v2991_v39  ;;  %v9059_v2 = vmax.f32 %v2822_v53, %v2990_v34  ;;  %v11569_v22 = vld [vmem:[#allocation47_spill] sm:$0xff]  ;;  %v9095_v60 = vpop.f32.mrf.mxu1  ;;  %v2236_v0 = vadd.f32 %v8915_v41, %v11574_v25 }
 0x27c   : > { %v2995_v37 = vrot.slane %v2827_v28, 1  ;;  %v2828_v38 = vmax.f32 %v9050_v31, 0.0  ;;  %v9067_v52 = vadd.f32 %v8677_v43, %v2689_v44  ;;  %3266 = vmatpush1.msra.mxu1 %v8913_v29  ;;  %v2690_v46 = vadd.f32 %v2587_v40, %v2232_v45  ;;  %v11573_v45 = vld [vmem:[#allocation50_spill] sm:$0xff]  ;;  %v11575_v40 = vld [vmem:[#allocation103_spill] sm:$0xff] }
 0x27d   : > { %v1292_v27 = vadd.f32 %v11570_v35, %v11569_v22  ;;  %3267 = vmatprep.subr.mxu1 %v8907_v32  ;;  %v2589_v53 = vpop.f32.mrf.mxu0  ;;  %v2994_v1 = vsel %vm2914_vm1, %v2989_v12, %v2993_v58  ;;  %v9078_v51 = vmax.f32 %v2823_v57, %v2992_v62  ;;  %v2235_v32 = vadd.f32 %v8898_v18, %v1777_v61  ;;  %v11576_v35 = vld [vmem:[#allocation22_spill] sm:$0xff] }
 0x27e   : > { %v2997_v17 = vrot.slane %v2828_v38, 1  ;;  %v2829_v29 = vmax.f32 %v9067_v52, 0.0  ;;  %v9084_v59 = vadd.f32 %v8670_v63, %v2690_v46  ;;  %3268 = vmatpush1.msra.mxu1 %v8896_v14  ;;  %v2691_v30 = vadd.f32 %v2589_v53, %v2233_v13  ;;  %v9129_v46 = vpop.f32.mrf.mxu1 }
 0x27f   : > { %v1779_v16 = vadd.f32 %v8627_v11, %v1292_v27  ;;  %3269 = vmatprep.subr.mxu1 %v8887_v42  ;;  %v2593_v3 = vpop.f32.mrf.mxu0  ;;  %v2996_v57 = vsel %vm2914_vm1, %v2991_v39, %v2995_v37  ;;  %v9093_v12 = vmax.f32 %v2824_v21, %v2994_v1  ;;  %v11572_v42 = vld [vmem:[#allocation49_spill] sm:$0xff]  ;;  %v11577_v27 = vld [vmem:[#allocation51_spill] sm:$0xff] }
 0x280   : > { %v2999_v36 = vrot.slane %v2829_v29, 1  ;;  %v2830_v14 = vmax.f32 %v9084_v59, 0.0  ;;  %v9101_v18 = vadd.f32 %v8677_v43, %v2691_v30  ;;  %3270 = vmatpush1.msra.mxu1 %v8874_v33  ;;  %v2692_v11 = vadd.f32 %v2593_v3, %v2234_v15  ;;  %v11579_v15 = vld [vmem:[#allocation102_spill] sm:$0xff] }
 0x281   : > { %v1298_v39 = vadd.f32 %v11573_v45, %v11572_v42  ;;  %3271 = vmatprep.subr.mxu1 %v8865_v7  ;;  %v2595_v21 = vpop.f32.mrf.mxu0  ;;  %v2998_v34 = vsel %vm2914_vm1, %v2993_v58, %v2997_v17  ;;  %v9112_v44 = vmax.f32 %v2825_v10, %v2996_v57  ;;  %v2237_v7 = vadd.f32 %v8931_v8, %v1779_v16  ;;  %v11581_v57 = vld [vmem:[#allocation66_spill] sm:$0xff]  ;;  %v11583_v45 = vld [vmem:[#allocation105_spill] sm:$0xff] }
 0x282   : > { %v3001_v13 = vrot.slane %v2830_v14, 1  ;;  %v2831_v33 = vmax.f32 %v9101_v18, 0.0  ;;  %v9118_v61 = vadd.f32 %v8670_v63, %v2692_v11  ;;  %3272 = vmatpush1.msra.mxu1 %v8852_v56  ;;  %v2693_v41 = vadd.f32 %v2595_v21, %v2235_v32  ;;  %v11582_v11 = vld [vmem:[#allocation68_spill] sm:$0xff] }
 0x283   : > { %v1781_v62 = vadd.f32 %v11575_v40, %v1298_v39  ;;  %3273 = vmatprep.subr.mxu1 %v8843_v49  ;;  %v2599_v19 = vpop.f32.mrf.mxu0  ;;  %v3000_v10 = vsel %vm2914_vm1, %v2995_v37, %v2999_v36  ;;  %v9127_v58 = vmax.f32 %v2826_v48, %v2998_v34  ;;  %v1304_v37 = vadd.f32 %v11578_v54, %v11577_v27  ;;  %v11580_v48 = vld [vmem:[#allocation21_spill] sm:$0xff] }
 0x284   : > { %v3003_v22 = vrot.slane %v2831_v33, 1  ;;  %v2832_v56 = vmax.f32 %v9118_v61, 0.0  ;;  %v9135_v8 = vadd.f32 %v8677_v43, %v2693_v41  ;;  %3274 = vmatpush1.msra.mxu1 %v11576_v35  ;;  %v2694_v49 = vadd.f32 %v2599_v19, %v2236_v0  ;;  %v9163_v0 = vpop.f32.mrf.mxu1  ;;  %v11587_v19 = vld [vmem:[#allocation54_spill] sm:$0xff] }
 0x285   : > { %v2238_v23 = vadd.f32 %v8945_v20, %v11579_v15  ;;  %3275 = vmatprep.subr.mxu1 %v11580_v48  ;;  %v2601_v53 = vpop.f32.mrf.mxu0  ;;  %v3002_v1 = vsel %vm2914_vm1, %v2997_v17, %v3001_v13  ;;  %v9146_v30 = vmax.f32 %v2827_v28, %v3000_v10  ;;  %v2239_v42 = vadd.f32 %v11582_v11, %v1781_v62  ;;  %v11584_v17 = vld [vmem:[#allocation67_spill] sm:$0xff]  ;;  %v11586_v62 = vld [vmem:[#allocation53_spill] sm:$0xff]  ;;  %v11588_v10 = vld [vmem:[#allocation104_spill] sm:$0xff] }
 0x286   : > { %v3005_v32 = vrot.slane %v2832_v56, 1  ;;  %v2833_v16 = vmax.f32 %v9135_v8, 0.0  ;;  %v9152_v3 = vadd.f32 %v8670_v63, %v2694_v49  ;;  %3276 = vmatpush1.msra.mxu1 %v11581_v57  ;;  %v2695_v20 = vadd.f32 %v2601_v53, %v2237_v7  ;;  %v11585_v7 = vld [vmem:[#allocation65_spill] sm:$0xff]  ;;  %v11591_v53 = vld [vmem:[#allocation107_spill] sm:$0xff] }
 0x287   : > { %v1783_v39 = vadd.f32 %v11583_v45, %v1304_v37  ;;  %3277 = vmatprep.subr.mxu1 %v11584_v17  ;;  %v2605_v47 = vpop.f32.mrf.mxu0  ;;  %v3004_v28 = vsel %vm2914_vm1, %v2999_v36, %v3003_v22  ;;  %v9161_v25 = vmax.f32 %v2828_v38, %v3002_v1  ;;  %v1310_v36 = vadd.f32 %v11587_v19, %v11586_v62  ;;  %v11589_v38 = vld [vmem:[#allocation64_spill] sm:$0xff]  ;;  %v11594_v17 = vld [vmem:[#allocation55_spill] sm:$0xff] }
 0x288   : > { %v3007_v21 = vrot.slane %v2833_v16, 1  ;;  %v2834_v34 = vmax.f32 %v9152_v3, 0.0  ;;  %v9169_v41 = vadd.f32 %v8677_v43, %v2695_v20  ;;  %3278 = vmatpush1.msra.mxu1 %v11585_v7  ;;  %v2696_v40 = vadd.f32 %v2605_v47, %v2238_v23  ;;  %v11590_v23 = vld [vmem:[#allocation20_spill] sm:$0xff]  ;;  %v2173_v20 = vpop.f32.mrf.mxu1 }
 0x289   : > { %v2240_v31 = vadd.f32 %v8980_v6, %v11588_v10  ;;  %3279 = vmatprep.subr.mxu1 %v11589_v38  ;;  %v2607_v35 = vpop.f32.mrf.mxu0  ;;  %v3006_v49 = vsel %vm2914_vm1, %v3001_v13, %v3005_v32  ;;  %v9180_v27 = vmax.f32 %v2829_v29, %v3004_v28  ;;  %v2241_v48 = vadd.f32 %v9001_v4, %v1783_v39  ;;  %v11592_v13 = vld [vmem:[#allocation19_spill] sm:$0xff]  ;;  %v11595_v47 = vld [vmem:[#allocation56_spill] sm:$0xff] }
 0x28a   : > { %v3009_v54 = vrot.slane %v2834_v34, 1  ;;  %v2835_v37 = vmax.f32 %v9169_v41, 0.0  ;;  %v9186_v15 = vadd.f32 %v8670_v63, %v2696_v40  ;;  %3280 = vmatpush1.msra.mxu1 %v11590_v23  ;;  %v2697_v6 = vadd.f32 %v2607_v35, %v2239_v42  ;;  %v11593_v4 = vld [vmem:[#allocation63_spill] sm:$0xff]  ;;  %v11599_v35 = vld [vmem:[#allocation109_spill] sm:$0xff]  ;;  %v2177_v23 = vpop.f32.mrf.mxu1 }
 0x28b   : > { %v1785_v1 = vadd.f32 %v11591_v53, %v1310_v36  ;;  %3281 = vmatprep.subr.mxu1 %v11592_v13  ;;  %v2611_v52 = vpop.f32.mrf.mxu0  ;;  %v3008_v29 = vsel %vm2914_vm1, %v3003_v22, %v3007_v21  ;;  %v9195_v57 = vmax.f32 %v2830_v14, %v3006_v49  ;;  %v1316_v28 = vadd.f32 %v11595_v47, %v11594_v17  ;;  %v11596_v22 = vld [vmem:[#allocation106_spill] sm:$0xff] }
 0x28c   : > { %v3011_v11 = vrot.slane %v2835_v37, 1  ;;  %v2836_v45 = vmax.f32 %v9186_v15, 0.0  ;;  %v9201_v42 = vadd.f32 %v8677_v43, %v2697_v6  ;;  %3282 = vmatpush1.msra.mxu1 %v11593_v4  ;;  %v2698_v39 = vadd.f32 %v2611_v52, %v2240_v31  ;;  %v11597_v14 = vld [vmem:[#allocation122_spill] sm:$0xff]  ;;  %v11598_v31 = vld [vmem:[#allocation121_spill] sm:$0xff]  ;;  %v11600_v15 = vld [vmem:[#allocation120_spill] sm:$0xff] }
 0x28d   : > { %v2242_v59 = vadd.f32 %v9029_v50, %v11596_v22  ;;  %3283 = vmatprep.subr.mxu1 %v11597_v14  ;;  %v2613_v7 = vpop.f32.mrf.mxu0  ;;  %v3010_v40 = vsel %vm2914_vm1, %v3005_v32, %v3009_v54  ;;  %v9212_v62 = vmax.f32 %v2831_v33, %v3008_v29  ;;  %v2243_v50 = vadd.f32 %v9061_v26, %v1785_v1  ;;  %v11602_v1 = vld [vmem:[#allocation57_spill] sm:$0xff]  ;;  %v11603_v52 = vld [vmem:[#allocation58_spill] sm:$0xff]  ;;  %v11607_v14 = vld [vmem:[#allocation111_spill] sm:$0xff] }
 0x28e   : > { %v3013_v19 = vrot.slane %v2836_v45, 1  ;;  %v2837_v36 = vmax.f32 %v9201_v42, 0.0  ;;  %v9216_v10 = vadd.f32 %v8670_v63, %v2698_v39  ;;  %3284 = vmatpush1.msra.mxu1 %v11598_v31  ;;  %v2699_v38 = vadd.f32 %v2613_v7, %v2241_v48  ;;  %v11601_v48 = vld [vmem:[#allocation119_spill] sm:$0xff]  ;;  %v11604_v42 = vld [vmem:[#allocation108_spill] sm:$0xff]  ;;  %v11605_v4 = vld [vmem:[#allocation118_spill] sm:$0xff] }
 0x28f   : > { %v1787_v49 = vadd.f32 %v11599_v35, %v1316_v28  ;;  %3285 = vmatprep.subr.mxu1 %v11600_v15  ;;  %v2617_v32 = vpop.f32.mrf.mxu0  ;;  %v3012_v18 = vsel %vm2914_vm1, %v3007_v21, %v3011_v11  ;;  %v9225_v33 = vmax.f32 %v2832_v56, %v3010_v40  ;;  %v1322_v29 = vadd.f32 %v11603_v52, %v11602_v1  ;;  %v11606_v22 = vld [vmem:[#allocation117_spill] sm:$0xff]  ;;  %v11608_v15 = vld [vmem:[#allocation59_spill] sm:$0xff]  ;;  %v11611_v52 = vld [vmem:[#allocation114_spill] sm:$0xff] }
 0x290   : > { %v3015_v6 = vrot.slane %v2837_v36, 1  ;;  %v2838_v53 = vmax.f32 %v9216_v10, 0.0  ;;  %v9229_v13 = vadd.f32 %v8677_v43, %v2699_v38  ;;  %3286 = vmatpush1.msra.mxu1 %v11601_v48  ;;  %v2700_v26 = vadd.f32 %v2617_v32, %v2242_v59 }
 0x291   : > { %v2244_v21 = vadd.f32 %v9095_v60, %v11604_v42  ;;  %3287 = vmatprep.subr.mxu1 %v11605_v4  ;;  %v2619_v61 = vpop.f32.mrf.mxu0  ;;  %v3014_v56 = vsel %vm2914_vm1, %v3009_v54, %v3013_v19  ;;  %v9240_v39 = vmax.f32 %v2833_v16, %v3012_v18  ;;  %v2245_v60 = vadd.f32 %v9129_v46, %v1787_v49  ;;  %v2179_v16 = vpop.f32.mrf.mxu1  ;;  %v11610_v46 = vld [vmem:[#allocation110_spill] sm:$0xff] }
 0x292   : > { %v3017_v17 = vrot.slane %v2838_v53, 1  ;;  %v2839_v47 = vmax.f32 %v9229_v13, 0.0  ;;  %v9244_v28 = vadd.f32 %v8670_v63, %v2700_v26  ;;  %3288 = vmatpush1.msra.mxu1 %v11606_v22  ;;  %v2701_v59 = vadd.f32 %v2619_v61, %v2243_v50  ;;  %v11609_v50 = vld [vmem:[#allocation60_spill] sm:$0xff] }
 0x293   : > { %v1789_v7 = vadd.f32 %v11607_v14, %v1322_v29  ;;  %v2623_v40 = vpop.f32.mrf.mxu0  ;;  %v3016_v54 = vsel %vm2914_vm1, %v3011_v11, %v3015_v6  ;;  %v9252_v8 = vmax.f32 %v2834_v34, %v3014_v56  ;;  %v1328_v32 = vadd.f32 %v11609_v50, %v11608_v15  ;;  %v11612_v56 = vld [vmem:[#allocation61_spill] sm:$0xff] }
 0x294   : > { %v3019_v10 = vrot.slane %v2839_v47, 1  ;;  %v2840_v31 = vmax.f32 %v9244_v28, 0.0  ;;  %v2777_v38 = vadd.f32 %v8677_v43, %v2701_v59  ;;  %v2702_v35 = vadd.f32 %v2623_v40, %v2244_v21  ;;  %v11613_v28 = vld [vmem:[#allocation62_spill] sm:$0xff]  ;;  %v11614_v59 = vld [vmem:[#allocation113_spill] sm:$0xff] }
 0x295   : > { %v2246_v49 = vadd.f32 %v9163_v0, %v11610_v46  ;;  %v2625_v18 = vpop.f32.mrf.mxu0  ;;  %v3018_v11 = vsel %vm2914_vm1, %v3013_v19, %v3017_v17  ;;  %v9263_v3 = vmax.f32 %v2835_v37, %v3016_v54  ;;  %v2247_v1 = vadd.f32 %v2173_v20, %v1789_v7  ;;  %v2183_v0 = vpop.f32.mrf.mxu1 }
 0x296   : > { %v3021_v34 = vrot.slane %v2840_v31, 1  ;;  %v2841_v13 = vmax.f32 %v2777_v38, 0.0  ;;  %v2778_v48 = vadd.f32 %v8670_v63, %v2702_v35  ;;  %v2703_v26 = vadd.f32 %v2625_v18, %v2245_v60  ;;  %v11615_v35 = vld [vmem:[#allocation116_spill] sm:$0xff] }
 0x297   : > { %v1791_v29 = vadd.f32 %v11611_v52, %v1328_v32  ;;  %v2629_v42 = vpop.f32.mrf.mxu0  ;;  %v3020_v21 = vsel %vm2914_vm1, %v3015_v6, %v3019_v10  ;;  %v9268_v4 = vmax.f32 %v2836_v45, %v3018_v11  ;;  %v1334_v22 = vadd.f32 %v11613_v28, %v11612_v56 }
 0x298   : > { %v3023_v61 = vrot.slane %v2841_v13, 1  ;;  %v2842_v19 = vmax.f32 %v2778_v48, 0.0  ;;  %v2779_v41 = vadd.f32 %v8677_v43, %v2703_v26  ;;  %v2704_v37 = vadd.f32 %v2629_v42, %v2246_v49  ;;  %v2185_v49 = vpop.f32.mrf.mxu1 }
 0x299   : > { %v2248_v14 = vadd.f32 %v2177_v23, %v11614_v59  ;;  %v2631_v60 = vpop.f32.mrf.mxu0  ;;  %v3022_v20 = vsel %vm2914_vm1, %v3017_v17, %v3021_v34  ;;  %v9275_v7 = vmax.f32 %v2837_v36, %v3020_v21  ;;  %v2249_v38 = vadd.f32 %v2179_v16, %v1791_v29  ;;  %v11616_v36 = vld [vmem:[#allocation115_spill] sm:$0xff] }
 0x29a   : > { %v3025_v40 = vrot.slane %v2842_v19, 1  ;;  %v2843_v6 = vmax.f32 %v2779_v41, 0.0  ;;  %v2780_v45 = vadd.f32 %v8670_v63, %v2704_v37  ;;  %v2705_v54 = vadd.f32 %v2631_v60, %v2247_v1 }
 0x29b   : > { %v1793_v15 = vadd.f32 %v11615_v35, %v1334_v22  ;;  %v2635_v50 = vpop.f32.mrf.mxu0  ;;  %v3024_v32 = vsel %vm2914_vm1, %v3019_v10, %v3023_v61  ;;  %v3157_v46 = vmax.f32 %v2838_v53, %v3022_v20  ;;  %v2250_v48 = vadd.f32 %v2183_v0, %v11616_v36 }
 0x29c   : > { %v3027_v18 = vrot.slane %v2843_v6, 1  ;;  %v2844_v23 = vmax.f32 %v2780_v45, 0.0  ;;  %v2781_v11 = vadd.f32 %v8677_v43, %v2705_v54  ;;  %v2706_v17 = vadd.f32 %v2635_v50, %v2248_v14 }
 0x29d   : > { %v2637_v26 = vpop.f32.mrf.mxu0  ;;  %v3026_v52 = vsel %vm2914_vm1, %v3021_v34, %v3025_v40  ;;  %v3158_v42 = vmax.f32 %v2839_v47, %v3024_v32  ;;  %v2251_v41 = vadd.f32 %v2185_v49, %v1793_v15 }
 0x29e   : > { %v3029_v1 = vrot.slane %v2844_v23, 1  ;;  %v2845_v16 = vmax.f32 %v2781_v11, 0.0  ;;  %v2782_v29 = vadd.f32 %v8670_v63, %v2706_v17  ;;  %v2707_v21 = vadd.f32 %v2637_v26, %v2249_v38 }
 0x29f   : > { %v2641_v10 = vpop.f32.mrf.mxu0  ;;  %v3028_v53 = vsel %vm2914_vm1, %v3023_v61, %v3027_v18  ;;  %v3159_v37 = vmax.f32 %v2840_v31, %v3026_v52  ;;  %v3194_v52 = vld [vmem:[%s11344_s3 + $0xc8] sm:$0xff] }
 0x2a0   : > { %v3031_v56 = vrot.slane %v2845_v16, 1  ;;  %v2846_v28 = vmax.f32 %v2782_v29, 0.0  ;;  %v2783_v22 = vadd.f32 %v8677_v43, %v2707_v21  ;;  %v2708_v59 = vadd.f32 %v2641_v10, %v2250_v48  ;;  %v3198_v29 = vld [vmem:[%s11344_s3 + $0xe8] sm:$0xff]  ;;  %v3197_v21 = vld [vmem:[%s11344_s3 + $0xe0] sm:$0xff]  ;;  %v3199_v10 = vld [vmem:[%s11344_s3 + $0xf0] sm:$0xff] }
 0x2a1   : > { %v2643_v0 = vpop.f32.mrf.mxu0  ;;  %v3030_v14 = vsel %vm2914_vm1, %v3025_v40, %v3029_v1  ;;  %v3160_v34 = vmax.f32 %v2841_v13, %v3028_v53  ;;  %v3610_v53 = vld [vmem:[%s11345_s4 + $0x78] sm:$0xff] }
 0x2a2   : > { %v3033_v47 = vrot.slane %v2846_v28, 1  ;;  %v2847_v60 = vmax.f32 %v2783_v22, 0.0  ;;  %v2784_v20 = vadd.f32 %v8670_v63, %v2708_v59  ;;  %v2709_v45 = vadd.f32 %v2643_v0, %v2251_v41  ;;  %v3200_v41 = vld [vmem:[%s11344_s3 + $0xf8] sm:$0xff]  ;;  %v3605_v59 = vld [vmem:[%s11345_s4 + $0x50] sm:$0xff]  ;;  %v3604_v0 = vld [vmem:[%s11345_s4 + $0x48] sm:$0xff] }
 0x2a3   : > { %v3032_v54 = vsel %vm2914_vm1, %v3027_v18, %v3031_v56  ;;  %v3161_v38 = vmax.f32 %v2842_v19, %v3030_v14  ;;  %v3606_v22 = vld [vmem:[%s11345_s4 + $0x58] sm:$0xff]  ;;  %v3603_v14 = vld [vmem:[%s11345_s4 + $0x40] sm:$0xff] }
 0x2a4   : > { %v3035_v35 = vrot.slane %v2847_v60, 1  ;;  %v2848_v61 = vmax.f32 %v2784_v20, 0.0  ;;  %v2785_v31 = vadd.f32 %v8677_v43, %v2709_v45  ;;  %v3034_v15 = vsel %vm2914_vm1, %v3029_v1, %v3033_v47  ;;  %v3169_v43 = vld [vmem:[%s11344_s3] sm:$0xff]  ;;  %v3196_v1 = vld [vmem:[%s11344_s3 + $0xd8] sm:$0xff] }
 0x2a5   : > { %v3163_v50 = vmax.f32 %v2844_v23, %v3034_v15  ;;  %v3162_v32 = vmax.f32 %v2843_v6, %v3032_v54  ;;  %v3189_v6 = vld [vmem:[%s11344_s3 + $0xa0] sm:$0xff]  ;;  %v3191_v23 = vld [vmem:[%s11344_s3 + $0xb0] sm:$0xff]  ;;  %v3598_v45 = vld [vmem:[%s11345_s4 + $0x18] sm:$0xff] }
 0x2a6   : > { %v3037_v49 = vrot.slane %v2848_v61, 1  ;;  %v2849_v11 = vmax.f32 %v2785_v31, 0.0  ;;  %v3036_v13 = vsel %vm2914_vm1, %v3031_v56, %v3035_v35  ;;  %v3608_v56 = vld [vmem:[%s11345_s4 + $0x68] sm:$0xff]  ;;  %v3599_v20 = vld [vmem:[%s11345_s4 + $0x20] sm:$0xff]  ;;  %v3597_v54 = vld [vmem:[%s11345_s4 + $0x10] sm:$0xff] }
 0x2a7   : > { %v3164_v40 = vmax.f32 %v2845_v16, %v3036_v13  ;;  %v3195_v16 = vld [vmem:[%s11344_s3 + $0xd0] sm:$0xff]  ;;  %v3614_v31 = vld [vmem:[%s11345_s4 + $0x98] sm:$0xff] }
 0x2a8   : > { %v3039_v17 = vrot.slane %v2849_v11, 1  ;;  %v3038_v63 = vsel %vm2914_vm1, %v3033_v47, %v3037_v49  ;;  %v3167_v48 = vmax.f32 %v2848_v61, %v3037_v49  ;;  %v3601_v47 = vld [vmem:[%s11345_s4 + $0x30] sm:$0xff]  ;;  %v3615_v61 = vld [vmem:[%s11345_s4 + $0xa0] sm:$0x3] }
 0x2a9   : > { %v3165_v36 = vmax.f32 %v2846_v28, %v3038_v63  ;;  %v3607_v28 = vld [vmem:[%s11345_s4 + $0x60] sm:$0xff]  ;;  %v3613_v15 = vld [vmem:[%s11345_s4 + $0x90] sm:$0xff] }
 0x2aa   : > { %v3168_v18 = vmax.f32 %v2849_v11, %v3039_v17  ;;  %v3040_v19 = vsel %vm2914_vm1, %v3035_v35, %v3039_v17  ;;  %v3595_v35 = vld [vmem:[%s11345_s4] sm:$0xff] }
 0x2ab   : > { %v3166_v26 = vmax.f32 %v2847_v60, %v3040_v19  ;;  %v3600_v60 = vld [vmem:[%s11345_s4 + $0x28] sm:$0xff] }
 0x2ac   : > { %6644 = vmatprep.subr.msk.mxu1 %vm3250_vm3, %v3168_v18 }
 0x2ad   : > { %6645 = vmatpush2.msk.msra.mxu1 %vm3250_vm3, %v3167_v48 }
 0x2ae   : > { %3291 = vmatprep.subr.mxu1 %v3166_v26 }
 0x2af   : > { %3292 = vmatpush2.msra.mxu1 %v3165_v36 }
 0x2b0   : > { %3293 = vmatprep.subr.mxu1 %v3164_v40 }
 0x2b1   : > { %3294 = vmatpush2.msra.mxu1 %v3163_v50  ;;  %v3612_v50 = vld [vmem:[%s11345_s4 + $0x88] sm:$0xff] }
 0x2b2   : > { %3295 = vmatprep.subr.mxu1 %v3162_v32  ;;  %v3611_v32 = vld [vmem:[%s11345_s4 + $0x80] sm:$0xff] }
 0x2b3   : > { %3296 = vmatpush2.msra.mxu1 %v3161_v38  ;;  %v3596_v38 = vld [vmem:[%s11345_s4 + $0x8] sm:$0xff] }
 0x2b4   : > { %3297 = vmatprep.subr.mxu1 %v3160_v34  ;;  %v3602_v34 = vld [vmem:[%s11345_s4 + $0x38] sm:$0xff] }
 0x2b5   : > { %3298 = vmatpush2.msra.mxu1 %v3159_v37  ;;  %v3609_v37 = vld [vmem:[%s11345_s4 + $0x70] sm:$0xff] }
 0x2b6   : > { %3299 = vmatprep.subr.mxu1 %v3158_v42  ;;  %v3193_v42 = vld [vmem:[%s11344_s3 + $0xc0] sm:$0xff] }
 0x2b7   : > { %3300 = vmatpush2.msra.mxu1 %v3157_v46  ;;  %v3192_v46 = vld [vmem:[%s11344_s3 + $0xb8] sm:$0xff] }
 0x2b8   : > { %3301 = vmatprep.subr.mxu1 %v9275_v7  ;;  %v3190_v7 = vld [vmem:[%s11344_s3 + $0xa8] sm:$0xff] }
 0x2b9   : > { %3302 = vmatpush2.msra.mxu1 %v9268_v4  ;;  %v3187_v4 = vld [vmem:[%s11344_s3 + $0x90] sm:$0xff] }
 0x2ba   : > { %3303 = vmatprep.subr.mxu1 %v9263_v3  ;;  %v3188_v3 = vld [vmem:[%s11344_s3 + $0x98] sm:$0xff] }
 0x2bb   : > { %3304 = vmatpush2.msra.mxu1 %v9252_v8  ;;  %v3185_v8 = vld [vmem:[%s11344_s3 + $0x80] sm:$0xff] }
 0x2bc   : > { %3305 = vmatprep.subr.mxu1 %v9240_v39  ;;  %v3186_v39 = vld [vmem:[%s11344_s3 + $0x88] sm:$0xff] }
 0x2bd   : > { %3306 = vmatpush2.msra.mxu1 %v9225_v33  ;;  %v3183_v33 = vld [vmem:[%s11344_s3 + $0x70] sm:$0xff] }
 0x2be   : > { %3307 = vmatprep.subr.mxu1 %v9212_v62  ;;  %v3184_v62 = vld [vmem:[%s11344_s3 + $0x78] sm:$0xff] }
 0x2bf   : > { %3308 = vmatpush2.msra.mxu1 %v9195_v57  ;;  %v3181_v57 = vld [vmem:[%s11344_s3 + $0x60] sm:$0xff] }
 0x2c0   : > { %3309 = vmatprep.subr.mxu1 %v9180_v27  ;;  %v3182_v27 = vld [vmem:[%s11344_s3 + $0x68] sm:$0xff] }
 0x2c1   : > { %3310 = vmatpush2.msra.mxu1 %v9161_v25  ;;  %v3179_v25 = vld [vmem:[%s11344_s3 + $0x50] sm:$0xff] }
 0x2c2   : > { %3311 = vmatprep.subr.mxu1 %v9146_v30  ;;  %v3180_v30 = vld [vmem:[%s11344_s3 + $0x58] sm:$0xff] }
 0x2c3   : > { %3312 = vmatpush2.msra.mxu1 %v9127_v58  ;;  %v3177_v58 = vld [vmem:[%s11344_s3 + $0x40] sm:$0xff] }
 0x2c4   : > { %3313 = vmatprep.subr.mxu1 %v9112_v44  ;;  %v3172_v44 = vld [vmem:[%s11344_s3 + $0x18] sm:$0xff] }
 0x2c5   : > { %3314 = vmatpush2.msra.mxu1 %v9093_v12  ;;  %v3178_v12 = vld [vmem:[%s11344_s3 + $0x48] sm:$0xff] }
 0x2c6   : > { %3315 = vmatprep.subr.mxu1 %v9078_v51  ;;  %v11617_v51 = vmov 0.0  }
 0x2c7   : > { %3316 = vmatpush2.msra.mxu1 %v9059_v2  ;;  %v3175_v2 = vld [vmem:[%s11344_s3 + $0x30] sm:$0xff] }
 0x2c8   : > { %3317 = vmatprep.subr.mxu1 %v9044_v5  ;;  %v3174_v5 = vld [vmem:[%s11344_s3 + $0x28] sm:$0xff] }
 0x2c9   : > { %3318 = vmatpush2.msra.mxu1 %v9027_v9  ;;  %v3171_v9 = vld [vmem:[%s11344_s3 + $0x10] sm:$0xff] }
 0x2ca   : > { %3319 = vmatprep.subr.mxu1 %v9015_v24  ;;  %v3176_v24 = vld [vmem:[%s11344_s3 + $0x38] sm:$0xff] }
 0x2cb   : > { %3320 = vmatpush2.msra.mxu1 %v8999_v55  ;;  %v3173_v55 = vld [vmem:[%s11344_s3 + $0x20] sm:$0xff] }
 0x2cc   : > { %3322 = vmatmul.mubr.f32.vlgmr.msra.gmra.mxu1 %v3169_v43  ;;  %3669 = vmatprep.subr.mxu1 %v11617_v51 }
 0x2cd   : > { %6647 = vmatprep.mubr.msk.f32.mxu1 %vm3201_vm2, %v3172_v44  ;;  %3670 = vmatpush1.msra.mxu1 %v3610_v53  ;;  %v6691_v53 = vld [vmem:[%s11346_s5 + $0x110] sm:$0xff] }
 0x2ce   : > { %3671 = vmatprep.subr.mxu1 %v11617_v51 }
 0x2cf   : > { %3672 = vmatpush1.msra.mxu1 %v3609_v37  ;;  %v6690_v37 = vld [vmem:[%s11346_s5 + $0x108] sm:$0xff] }
 0x2d0   : > { %3328 = vmatmul.mubr.f32.gmra.mxu1 %v3171_v9  ;;  %3673 = vmatprep.subr.mxu1 %v11617_v51 }
 0x2d1   : > { %6648 = vmatprep.mubr.msk.f32.mxu1 %vm3201_vm2, %v3174_v5  ;;  %3674 = vmatpush1.msra.mxu1 %v3608_v56  ;;  %v6689_v56 = vld [vmem:[%s11346_s5 + $0x100] sm:$0xff] }
 0x2d2   : > { %3675 = vmatprep.subr.mxu1 %v11617_v51 }
 0x2d3   : > { %3676 = vmatpush1.msra.mxu1 %v3607_v28  ;;  %v6688_v28 = vld [vmem:[%s11346_s5 + $0xf8] sm:$0xff] }
 0x2d4   : > { %3334 = vmatmul.mubr.f32.gmra.mxu1 %v3173_v55  ;;  %3677 = vmatprep.subr.mxu1 %v11617_v51 }
 0x2d5   : > { %6649 = vmatprep.mubr.msk.f32.mxu1 %vm3201_vm2, %v3176_v24  ;;  %3678 = vmatpush1.msra.mxu1 %v3606_v22  ;;  %v6687_v22 = vld [vmem:[%s11346_s5 + $0xf0] sm:$0xff] }
 0x2d6   : > { %3679 = vmatprep.subr.mxu1 %v11617_v51 }
 0x2d7   : > { %3680 = vmatpush1.msra.mxu1 %v3605_v59  ;;  %v6686_v59 = vld [vmem:[%s11346_s5 + $0xe8] sm:$0xff] }
 0x2d8   : > { %3340 = vmatmul.mubr.f32.gmra.mxu1 %v3175_v2  ;;  %3681 = vmatprep.subr.mxu1 %v11617_v51 }
 0x2d9   : > { %6650 = vmatprep.mubr.msk.f32.mxu1 %vm3201_vm2, %v3178_v12  ;;  %3682 = vmatpush1.msra.mxu1 %v3604_v0 }
 0x2da   : > { %3683 = vmatprep.subr.mxu1 %v11617_v51 }
 0x2db   : > { %3684 = vmatpush1.msra.mxu1 %v3603_v14 }
 0x2dc   : > { %3346 = vmatmul.mubr.f32.gmra.mxu1 %v3177_v58  ;;  %3685 = vmatprep.subr.mxu1 %v11617_v51 }
 0x2dd   : > { %6651 = vmatprep.mubr.msk.f32.mxu1 %vm3201_vm2, %v3180_v30  ;;  %3686 = vmatpush1.msra.mxu1 %v3602_v34 }
 0x2de   : > { %3687 = vmatprep.subr.mxu1 %v11617_v51 }
 0x2df   : > { %3688 = vmatpush1.msra.mxu1 %v3601_v47 }
 0x2e0   : > { %3352 = vmatmul.mubr.f32.gmra.mxu1 %v3179_v25  ;;  %3689 = vmatprep.subr.mxu1 %v11617_v51 }
 0x2e1   : > { %6652 = vmatprep.mubr.msk.f32.mxu1 %vm3201_vm2, %v3182_v27  ;;  %3690 = vmatpush1.msra.mxu1 %v3600_v60 }
 0x2e2   : > { %3691 = vmatprep.subr.mxu1 %v11617_v51 }
 0x2e3   : > { %3692 = vmatpush1.msra.mxu1 %v3599_v20 }
 0x2e4   : > { %3358 = vmatmul.mubr.f32.gmra.mxu1 %v3181_v57  ;;  %3693 = vmatprep.subr.mxu1 %v11617_v51 }
 0x2e5   : > { %6653 = vmatprep.mubr.msk.f32.mxu1 %vm3201_vm2, %v3184_v62  ;;  %3694 = vmatpush1.msra.mxu1 %v3598_v45  ;;  %v3834_v45 = vld [vmem:[%s11346_s5 + $0xa0] sm:$0xf] }
 0x2e6   : > { %3695 = vmatprep.subr.mxu1 %v11617_v51 }
 0x2e7   : > { %3696 = vmatpush1.msra.mxu1 %v3597_v54  ;;  %v3833_v54 = vld [vmem:[%s11346_s5 + $0x98] sm:$0xff] }
 0x2e8   : > { %3364 = vmatmul.mubr.f32.gmra.mxu1 %v3183_v33  ;;  %3697 = vmatprep.subr.mxu1 %v11617_v51 }
 0x2e9   : > { %6654 = vmatprep.mubr.msk.f32.mxu1 %vm3201_vm2, %v3186_v39  ;;  %3698 = vmatpush1.msra.mxu1 %v3596_v38 }
 0x2ea   : > { %3699 = vmatprep.subr.mxu1 %v11617_v51 }
 0x2eb   : > { %3700 = vmatpush1.msra.mxu1 %v3595_v35 }
 0x2ec   : > { %3370 = vmatmul.mubr.f32.gmra.mxu1 %v3185_v8  ;;  %3723 = vmatprep.subr.mxu1 %v11617_v51 }
 0x2ed   : > { %6655 = vmatprep.mubr.msk.f32.mxu1 %vm3201_vm2, %v3188_v3  ;;  %6662 = vmatpush2.msk.msra.mxu1 %vm3665_vm4, %v3615_v61  ;;  %v6700_v3 = vld [vmem:[%s11346_s5 + $0x158] sm:$0xf]  ;;  %v3832_v61 = vld [vmem:[%s11346_s5 + $0x90] sm:$0xff] }
 0x2ee   : > { %3725 = vmatprep.subr.mxu1 %v11617_v51  ;;  %6701 = vmatprep.subr.msk.mxu0 %vm3939_vm5, %v6700_v3 }
 0x2ef   : > { %3726 = vmatpush2.msra.mxu1 %v3614_v31 }
 0x2f0   : > { %3376 = vmatmul.mubr.f32.gmra.mxu1 %v3187_v4  ;;  %3727 = vmatprep.subr.mxu1 %v11617_v51  ;;  %v6699_v4 = vld [vmem:[%s11346_s5 + $0x150] sm:$0xf] }
 0x2f1   : > { %6656 = vmatprep.mubr.msk.f32.mxu1 %vm3201_vm2, %v3190_v7  ;;  %3728 = vmatpush2.msra.mxu1 %v3613_v15 }
 0x2f2   : > { %3729 = vmatprep.subr.mxu1 %v11617_v51  ;;  %6702 = vmatpush1.msk.msra.mxu0 %vm3939_vm5, %v6699_v4 }
 0x2f3   : > { %3730 = vmatpush2.msra.mxu1 %v3612_v50  ;;  %v3831_v50 = vld [vmem:[%s11346_s5 + $0x88] sm:$0xff] }
 0x2f4   : > { %3382 = vmatmul.mubr.f32.gmra.mxu1 %v3189_v6  ;;  %3731 = vmatprep.subr.mxu1 %v11617_v51  ;;  %v6698_v6 = vld [vmem:[%s11346_s5 + $0x148] sm:$0xff] }
 0x2f5   : > { %6657 = vmatprep.mubr.msk.f32.mxu1 %vm3201_vm2, %v3192_v46  ;;  %3732 = vmatpush2.msra.mxu1 %v3611_v32  ;;  %v6697_v46 = vld [vmem:[%s11346_s5 + $0x140] sm:$0xff] }
 0x2f6   : > { %3958 = vmatprep.subr.mxu0 %v6698_v6 }
 0x2f7   : > { %3959 = vmatpush1.msra.mxu0 %v6697_v46  ;;  %v3827_v46 = vld [vmem:[%s11346_s5 + $0x68] sm:$0xff] }
 0x2f8   : > { %3388 = vmatmul.mubr.f32.gmra.mxu1 %v3191_v23 }
 0x2f9   : > { %6658 = vmatprep.mubr.msk.f32.mxu1 %vm3201_vm2, %v3194_v52  ;;  %v6696_v52 = vld [vmem:[%s11346_s5 + $0x138] sm:$0xff] }
 0x2fa   : > { %3960 = vmatprep.subr.mxu0 %v6696_v52 }
 0x2fc   : > { %3394 = vmatmul.mubr.f32.gmra.mxu1 %v3193_v42  ;;  %v3835_v42 = vld [vmem:[%s11346_s5 + $0xa8] sm:$0xf] }
 0x2fd   : > { %6659 = vmatprep.mubr.msk.f32.mxu1 %vm3201_vm2, %v3196_v1  ;;  %6719 = vmatprep.subr.msk.mxu1 %vm3939_vm5, %v3835_v42  ;;  %v3826_v42 = vld [vmem:[%s11346_s5 + $0x60] sm:$0xff] }
 0x300   : > { %3400 = vmatmul.mubr.f32.gmra.mxu1 %v3195_v16  ;;  %v6695_v16 = vld [vmem:[%s11346_s5 + $0x130] sm:$0xff] }
 0x301   : > { %6660 = vmatprep.mubr.msk.f32.mxu1 %vm3201_vm2, %v3198_v29  ;;  %v6694_v29 = vld [vmem:[%s11346_s5 + $0x128] sm:$0xff]  ;;  %3961 = vmatpush1.msra.mxu0 %v6695_v16  ;;  %v3825_v16 = vld [vmem:[%s11346_s5 + $0x58] sm:$0xff] }
 0x302   : > { %3962 = vmatprep.subr.mxu0 %v6694_v29 }
 0x304   : > { %3406 = vmatmul.mubr.f32.gmra.mxu1 %v3197_v21  ;;  %v6693_v21 = vld [vmem:[%s11346_s5 + $0x120] sm:$0xff] }
 0x305   : > { %6661 = vmatprep.mubr.msk.f32.mxu1 %vm3201_vm2, %v3200_v41  ;;  %v6692_v41 = vld [vmem:[%s11346_s5 + $0x118] sm:$0xff]  ;;  %3963 = vmatpush1.msra.mxu0 %v6693_v21 }
 0x306   : > { %3964 = vmatprep.subr.mxu0 %v6692_v41 }
 0x307   : > { %3965 = vmatpush1.msra.mxu0 %v6691_v53  ;;  %v3823_v53 = vld [vmem:[%s11346_s5 + $0x48] sm:$0xff] }
 0x308   : > { %3412 = vmatmul.mubr.f32.gmra.mxu1 %v3199_v10  ;;  %3966 = vmatprep.subr.mxu0 %v6690_v37 }
 0x309   : > { %3967 = vmatpush1.msra.mxu0 %v6689_v56  ;;  %v3822_v56 = vld [vmem:[%s11346_s5 + $0x40] sm:$0xff] }
 0x30a   : > { %3968 = vmatprep.subr.mxu0 %v6688_v28  ;;  %v3821_v28 = vld [vmem:[%s11346_s5 + $0x38] sm:$0xff] }
 0x30b   : > { %3969 = vmatpush1.msra.mxu0 %v6687_v22 }
 0x30c   : > { %3970 = vmatprep.subr.mxu0 %v6686_v59 }
 0x38c   : > { %v9508_v49 = vpop.f32.mrf.mxu1 }
 0x38d   : > { %3450 = vrot.lane.b32.xlu0 %v9508_v49, %s7451_s2 }
 0x38e   : > { %v9512_v11 = vpop.f32.mrf.mxu1 }
 0x390   : > { %v9514_v13 = vpop.f32.mrf.mxu1 }
 0x391   : > { %3452 = vrot.lane.b32.xlu0 %v9512_v11, %s7451_s2  ;;  %3454 = vrot.lane.b32.xlu1 %v9514_v13, %s7451_s2 }
 0x392   : > { %v9520_v40 = vpop.f32.mrf.mxu1 }
 0x394   : > { %v9522_v17 = vpop.f32.mrf.mxu1 }
 0x395   : > { %3456 = vrot.lane.b32.xlu1 %v9520_v40, %s7451_s2  ;;  %3458 = vrot.lane.b32.xlu0 %v9522_v17, %s7451_s2 }
 0x396   : > { %v9528_v63 = vpop.f32.mrf.mxu1 }
 0x398   : > { %v9530_v36 = vpop.f32.mrf.mxu1 }
 0x399   : > { %3460 = vrot.lane.b32.xlu1 %v9528_v63, %s7451_s2  ;;  %3462 = vrot.lane.b32.xlu0 %v9530_v36, %s7451_s2 }
 0x39a   : > { %v9536_v18 = vpop.f32.mrf.mxu1 }
 0x39c   : > { %v9538_v19 = vpop.f32.mrf.mxu1 }
 0x39d   : > { %3464 = vrot.lane.b32.xlu1 %v9536_v18, %s7451_s2  ;;  %3466 = vrot.lane.b32.xlu0 %v9538_v19, %s7451_s2 }
 0x39e   : > { %v9544_v48 = vpop.f32.mrf.mxu1 }
 0x3a0   : > { %v9546_v26 = vpop.f32.mrf.mxu1 }
 0x3a1   : > { %3468 = vrot.lane.b32.xlu1 %v9544_v48, %s7451_s2  ;;  %3470 = vrot.lane.b32.xlu0 %v9546_v26, %s7451_s2 }
 0x3a2   : > { %v9552_v43 = vpop.f32.mrf.mxu1 }
 0x3a4   : > { %v9554_v44 = vpop.f32.mrf.mxu1 }
 0x3a5   : > { %3472 = vrot.lane.b32.xlu1 %v9552_v43, %s7451_s2  ;;  %3474 = vrot.lane.b32.xlu0 %v9554_v44, %s7451_s2 }
 0x3a6   : > { %v9560_v9 = vpop.f32.mrf.mxu1 }
 0x3a8   : > { %v9562_v5 = vpop.f32.mrf.mxu1 }
 0x3a9   : > { %3476 = vrot.lane.b32.xlu1 %v9560_v9, %s7451_s2  ;;  %3478 = vrot.lane.b32.xlu0 %v9562_v5, %s7451_s2 }
 0x3aa   : > { %v9568_v55 = vpop.f32.mrf.mxu1 }
 0x3ac   : > { %v9570_v24 = vpop.f32.mrf.mxu1 }
 0x3ad   : > { %3480 = vrot.lane.b32.xlu1 %v9568_v55, %s7451_s2  ;;  %3482 = vrot.lane.b32.xlu0 %v9570_v24, %s7451_s2 }
 0x3ae   : > { %v9576_v2 = vpop.f32.mrf.mxu1 }
 0x3b0   : > { %v9578_v12 = vpop.f32.mrf.mxu1 }
 0x3b1   : > { %3484 = vrot.lane.b32.xlu1 %v9576_v2, %s7451_s2  ;;  %3486 = vrot.lane.b32.xlu0 %v9578_v12, %s7451_s2 }
 0x3b2   : > { %v9584_v58 = vpop.f32.mrf.mxu1 }
 0x3b4   : > { %v9586_v30 = vpop.f32.mrf.mxu1 }
 0x3b5   : > { %3488 = vrot.lane.b32.xlu1 %v9584_v58, %s7451_s2  ;;  %3490 = vrot.lane.b32.xlu0 %v9586_v30, %s7451_s2 }
 0x3b6   : > { %v9592_v25 = vpop.f32.mrf.mxu1 }
 0x3b8   : > { %v9594_v27 = vpop.f32.mrf.mxu1 }
 0x3b9   : > { %3492 = vrot.lane.b32.xlu1 %v9592_v25, %s7451_s2  ;;  %3494 = vrot.lane.b32.xlu0 %v9594_v27, %s7451_s2 }
 0x3ba   : > { %v9600_v57 = vpop.f32.mrf.mxu1 }
 0x3bc   : > { %v9602_v62 = vpop.f32.mrf.mxu1 }
 0x3bd   : > { %3496 = vrot.lane.b32.xlu1 %v9600_v57, %s7451_s2  ;;  %3498 = vrot.lane.b32.xlu0 %v9602_v62, %s7451_s2 }
 0x3be   : > { %v9608_v33 = vpop.f32.mrf.mxu1 }
 0x3c0   : > { %v9610_v39 = vpop.f32.mrf.mxu1 }
 0x3c1   : > { %3500 = vrot.lane.b32.xlu1 %v9608_v33, %s7451_s2  ;;  %3502 = vrot.lane.b32.xlu0 %v9610_v39, %s7451_s2 }
 0x3c2   : > { %v9616_v8 = vpop.f32.mrf.mxu1 }
 0x3c4   : > { %v9624_v7 = vpop.f32.mrf.mxu1 }
 0x3c5   : > { %3504 = vrot.lane.b32.xlu1 %v9616_v8, %s7451_s2  ;;  %3506 = vrot.lane.b32.xlu0 %v9624_v7, %s7451_s2 }
 0x3c6   : > { %v9637_v23 = vpop.f32.mrf.mxu1 }
 0x3c8   : > { %v9646_v1 = vpop.f32.mrf.mxu1 }
 0x3c9   : > { %3508 = vrot.lane.b32.xlu1 %v9637_v23, %s7451_s2  ;;  %3510 = vrot.lane.b32.xlu0 %v9646_v1, %s7451_s2 }
 0x3ca   : > { %v9665_v10 = vpop.f32.mrf.mxu1 }
 0x3cd   : > { %3512 = vrot.lane.b32.xlu1 %v9665_v10, %s7451_s2  ;;  %s7454_s2 = smov [#allocation10]  }
 0x3ce   : > { %s7374_s22 = sshll.u32 %s7454_s2, 4  ;;  %s7375_s22 = int_to_ptr.vmem [resolvable:$false] %s7374_s22 }
 0x3cf   : > { %s7376_s25 = scalar_lea.vmem %s7375_s22, 256 }
 0x3ff   : > { %v3451_v0 = vpop.permute.xlu0 %3450 }
 0x403   : > { %v3453_v14 = vpop.permute.xlu0 %3452  ;;  %v3455_v34 = vpop.permute.xlu1 %3454 }
 0x404   : > { %v3515_v47 = vsel %vm3514_vm6, %v3451_v0, %v3453_v14  ;;  %v3564_v60 = vmax.f32 %v9512_v11, %v3453_v14  ;;  %v3829_v11 = vld [vmem:[%s11346_s5 + $0x78] sm:$0xff]  ;;  %v3819_v14 = vld [vmem:[%s11346_s5 + $0x28] sm:$0xff] }
 0x405   : > { %v3563_v20 = vmax.f32 %v9508_v49, %v3515_v47  ;;  %v3830_v49 = vld [vmem:[%s11346_s5 + $0x80] sm:$0xff] }
 0x406   : > { %6663 = vmatprep.mubr.msk.f32.mxu1 %vm3616_vm7, %v3564_v60  ;;  %v3818_v47 = vld [vmem:[%s11346_s5 + $0x20] sm:$0xff]  ;;  %v3817_v60 = vld [vmem:[%s11346_s5 + $0x18] sm:$0xff] }
 0x407   : > { %3734 = vmatmul.mubr.f32.vlgmr.msra.gmra.mxu1 %v3563_v20  ;;  %v3457_v38 = vpop.permute.xlu1 %3456  ;;  %v3459_v35 = vpop.permute.xlu0 %3458 }
 0x408   : > { %v3516_v31 = vsel %vm3514_vm6, %v3455_v34, %v3457_v38  ;;  %v3566_v15 = vmax.f32 %v9520_v40, %v3457_v38  ;;  %6720 = vmatpush1.msk.msra.mxu1 %vm3939_vm5, %v3834_v45  ;;  %v3815_v38 = vld [vmem:[%s11346_s5 + $0x8] sm:$0xff] }
 0x409   : > { %v3565_v32 = vmax.f32 %v9514_v13, %v3516_v31  ;;  %4157 = vmatprep.subr.mxu1 %v3833_v54  ;;  %v3828_v13 = vld [vmem:[%s11346_s5 + $0x70] sm:$0xff] }
 0x40a   : > { %6664 = vmatprep.mubr.msk.f32.mxu1 %vm3616_vm7, %v3566_v15  ;;  %4158 = vmatpush1.msra.mxu1 %v3832_v61 }
 0x40b   : > { %3739 = vmatmul.mubr.f32.gmra.mxu1 %v3565_v32  ;;  %v3461_v40 = vpop.permute.xlu1 %3460  ;;  %v3463_v3 = vpop.permute.xlu0 %3462  ;;  %4159 = vmatprep.subr.mxu1 %v3831_v50 }
 0x40c   : > { %v3517_v4 = vsel %vm3514_vm6, %v3459_v35, %v3461_v40  ;;  %v3568_v6 = vmax.f32 %v9528_v63, %v3461_v40  ;;  %4160 = vmatpush1.msra.mxu1 %v3830_v49 }
 0x40d   : > { %v3567_v52 = vmax.f32 %v9522_v17, %v3517_v4  ;;  %4161 = vmatprep.subr.mxu1 %v3829_v11  ;;  %v3824_v17 = vld [vmem:[%s11346_s5 + $0x50] sm:$0xff] }
 0x40e   : > { %6665 = vmatprep.mubr.msk.f32.mxu1 %vm3616_vm7, %v3568_v6  ;;  %4162 = vmatpush1.msra.mxu1 %v3828_v13 }
 0x40f   : > { %3744 = vmatmul.mubr.f32.gmra.mxu1 %v3567_v52  ;;  %v3465_v63 = vpop.permute.xlu1 %3464  ;;  %v3467_v29 = vpop.permute.xlu0 %3466  ;;  %4163 = vmatprep.subr.mxu1 %v3827_v46 }
 0x410   : > { %v3518_v21 = vsel %vm3514_vm6, %v3463_v3, %v3465_v63  ;;  %v3570_v41 = vmax.f32 %v9536_v18, %v3465_v63  ;;  %4164 = vmatpush1.msra.mxu1 %v3826_v42 }
 0x411   : > { %v3569_v37 = vmax.f32 %v9530_v36, %v3518_v21  ;;  %4165 = vmatprep.subr.mxu1 %v3825_v16  ;;  %v3820_v36 = vld [vmem:[%s11346_s5 + $0x30] sm:$0xff] }
 0x412   : > { %6666 = vmatprep.mubr.msk.f32.mxu1 %vm3616_vm7, %v3570_v41  ;;  %4166 = vmatpush1.msra.mxu1 %v3824_v17 }
 0x413   : > { %3749 = vmatmul.mubr.f32.gmra.mxu1 %v3569_v37  ;;  %v3469_v18 = vpop.permute.xlu1 %3468  ;;  %v3471_v22 = vpop.permute.xlu0 %3470  ;;  %4167 = vmatprep.subr.mxu1 %v3823_v53 }
 0x414   : > { %v3519_v59 = vsel %vm3514_vm6, %v3467_v29, %v3469_v18  ;;  %v3572_v0 = vmax.f32 %v9544_v48, %v3469_v18  ;;  %4168 = vmatpush1.msra.mxu1 %v3822_v56 }
 0x415   : > { %v3571_v34 = vmax.f32 %v9538_v19, %v3519_v59  ;;  %4169 = vmatprep.subr.mxu1 %v3821_v28  ;;  %v3816_v19 = vld [vmem:[%s11346_s5 + $0x10] sm:$0xff] }
 0x416   : > { %6667 = vmatprep.mubr.msk.f32.mxu1 %vm3616_vm7, %v3572_v0  ;;  %4170 = vmatpush1.msra.mxu1 %v3820_v36 }
 0x417   : > { %3754 = vmatmul.mubr.f32.gmra.mxu1 %v3571_v34  ;;  %v3473_v48 = vpop.permute.xlu1 %3472  ;;  %v3475_v20 = vpop.permute.xlu0 %3474  ;;  %4171 = vmatprep.subr.mxu1 %v3819_v14  ;;  %v6682_v34 = vld [vmem:[%s11346_s5 + $0xc8] sm:$0xff] }
 0x418   : > { %v3520_v45 = vsel %vm3514_vm6, %v3471_v22, %v3473_v48  ;;  %v3574_v54 = vmax.f32 %v9552_v43, %v3473_v48  ;;  %4172 = vmatpush1.msra.mxu1 %v3818_v47  ;;  %v6681_v47 = vld [vmem:[%s11346_s5 + $0xc0] sm:$0xff]  ;;  %v6679_v48 = vld [vmem:[%s11346_s5 + $0xb0] sm:$0xff] }
 0x419   : > { %v3573_v35 = vmax.f32 %v9546_v26, %v3520_v45  ;;  %4173 = vmatprep.subr.mxu1 %v3817_v60  ;;  %v6680_v60 = vld [vmem:[%s11346_s5 + $0xb8] sm:$0xff]  ;;  %v6797_v45 = vld [vmem:[%s11346_s5 + $0x2b0] sm:$0xf] }
 0x41a   : > { %6668 = vmatprep.mubr.msk.f32.mxu1 %vm3616_vm7, %v3574_v54  ;;  %4174 = vmatpush1.msra.mxu1 %v3816_v19  ;;  %v6758_v19 = vld [vmem:[%s11346_s5 + $0x208] sm:$0xf] }
 0x41b   : > { %3759 = vmatmul.mubr.f32.gmra.mxu1 %v3573_v35  ;;  %v3477_v61 = vpop.permute.xlu1 %3476  ;;  %v3479_v31 = vpop.permute.xlu0 %3478  ;;  %4175 = vmatprep.subr.mxu1 %v3815_v38  ;;  %v6796_v38 = vld [vmem:[%s11346_s5 + $0x2a8] sm:$0xff]  ;;  %v6795_v35 = vld [vmem:[%s11346_s5 + $0x2a0] sm:$0xff] }
 0x41c   : > { %v3521_v15 = vsel %vm3514_vm6, %v3475_v20, %v3477_v61  ;;  %v3576_v50 = vmax.f32 %v9560_v9, %v3477_v61  ;;  %v6798_v20 = vld [vmem:[%s11346_s5 + $0x2b8] sm:$0xf] }
 0x41d   : > { %v3575_v43 = vmax.f32 %v9554_v44, %v3521_v15  ;;  %v6793_v15 = vld [vmem:[%s11346_s5 + $0x290] sm:$0xff] }
 0x41e   : > { %6669 = vmatprep.mubr.msk.f32.mxu1 %vm3616_vm7, %v3576_v50 }
 0x41f   : > { %3764 = vmatmul.mubr.f32.gmra.mxu1 %v3575_v43  ;;  %v3481_v32 = vpop.permute.xlu1 %3480  ;;  %v3483_v49 = vpop.permute.xlu0 %3482 }
 0x420   : > { %v3522_v26 = vsel %vm3514_vm6, %v3479_v31, %v3481_v32  ;;  %v3578_v11 = vmax.f32 %v9568_v55, %v3481_v32  ;;  %v6794_v31 = vld [vmem:[%s11346_s5 + $0x298] sm:$0xff] }
 0x421   : > { %v3577_v40 = vmax.f32 %v9562_v5, %v3522_v26 }
 0x422   : > { %6670 = vmatprep.mubr.msk.f32.mxu1 %vm3616_vm7, %v3578_v11 }
 0x423   : > { %3769 = vmatmul.mubr.f32.gmra.mxu1 %v3577_v40  ;;  %v3485_v3 = vpop.permute.xlu1 %3484  ;;  %v3487_v13 = vpop.permute.xlu0 %3486 }
 0x424   : > { %v3523_v9 = vsel %vm3514_vm6, %v3483_v49, %v3485_v3  ;;  %v3580_v44 = vmax.f32 %v9576_v2, %v3485_v3  ;;  %v6792_v49 = vld [vmem:[%s11346_s5 + $0x288] sm:$0xff] }
 0x425   : > { %v3579_v4 = vmax.f32 %v9570_v24, %v3523_v9 }
 0x426   : > { %6671 = vmatprep.mubr.msk.f32.mxu1 %vm3616_vm7, %v3580_v44 }
 0x427   : > { %3774 = vmatmul.mubr.f32.gmra.mxu1 %v3579_v4  ;;  %v3489_v6 = vpop.permute.xlu1 %3488  ;;  %v3491_v46 = vpop.permute.xlu0 %3490  ;;  %v6757_v4 = vld [vmem:[%s11346_s5 + $0x200] sm:$0xf] }
 0x428   : > { %v3524_v55 = vsel %vm3514_vm6, %v3487_v13, %v3489_v6  ;;  %v3582_v5 = vmax.f32 %v9584_v58, %v3489_v6  ;;  %v6791_v13 = vld [vmem:[%s11346_s5 + $0x280] sm:$0xff] }
 0x429   : > { %v3581_v52 = vmax.f32 %v9578_v12, %v3524_v55 }
 0x42a   : > { %6672 = vmatprep.mubr.msk.f32.mxu1 %vm3616_vm7, %v3582_v5  ;;  %v6756_v5 = vld [vmem:[%s11346_s5 + $0x1f8] sm:$0xff] }
 0x42b   : > { %3779 = vmatmul.mubr.f32.gmra.mxu1 %v3581_v52  ;;  %v3493_v42 = vpop.permute.xlu1 %3492  ;;  %v3495_v16 = vpop.permute.xlu0 %3494  ;;  %v6790_v52 = vld [vmem:[%s11346_s5 + $0x278] sm:$0xff] }
 0x42c   : > { %v3525_v2 = vsel %vm3514_vm6, %v3491_v46, %v3493_v42  ;;  %v3584_v24 = vmax.f32 %v9592_v25, %v3493_v42 }
 0x42d   : > { %v3583_v63 = vmax.f32 %v9586_v30, %v3525_v2 }
 0x42e   : > { %6673 = vmatprep.mubr.msk.f32.mxu1 %vm3616_vm7, %v3584_v24  ;;  %v6789_v24 = vld [vmem:[%s11346_s5 + $0x270] sm:$0xff] }
 0x42f   : > { %3784 = vmatmul.mubr.f32.gmra.mxu1 %v3583_v63  ;;  %v3497_v29 = vpop.permute.xlu1 %3496  ;;  %v3499_v17 = vpop.permute.xlu0 %3498 }
 0x430   : > { %v3526_v58 = vsel %vm3514_vm6, %v3495_v16, %v3497_v29  ;;  %v3586_v12 = vmax.f32 %v9600_v57, %v3497_v29 }
 0x431   : > { %v3585_v21 = vmax.f32 %v9594_v27, %v3526_v58 }
 0x432   : > { %6674 = vmatprep.mubr.msk.f32.mxu1 %vm3616_vm7, %v3586_v12 }
 0x433   : > { %3789 = vmatmul.mubr.f32.gmra.mxu1 %v3585_v21  ;;  %v3501_v41 = vpop.permute.xlu1 %3500  ;;  %v3503_v53 = vpop.permute.xlu0 %3502  ;;  %v6788_v21 = vld [vmem:[%s11346_s5 + $0x268] sm:$0xff] }
 0x434   : > { %v3527_v25 = vsel %vm3514_vm6, %v3499_v17, %v3501_v41  ;;  %v3588_v30 = vmax.f32 %v9608_v33, %v3501_v41  ;;  %v6755_v17 = vld [vmem:[%s11346_s5 + $0x1f0] sm:$0xff]  ;;  %v6754_v41 = vld [vmem:[%s11346_s5 + $0x1e8] sm:$0xff] }
 0x435   : > { %v3587_v37 = vmax.f32 %v9602_v62, %v3527_v25 }
 0x436   : > { %6675 = vmatprep.mubr.msk.f32.mxu1 %vm3616_vm7, %v3588_v30 }
 0x437   : > { %3794 = vmatmul.mubr.f32.gmra.mxu1 %v3587_v37  ;;  %v3505_v56 = vpop.permute.xlu1 %3504  ;;  %v3507_v18 = vpop.permute.xlu0 %3506 }
 0x438   : > { %v3528_v28 = vsel %vm3514_vm6, %v3503_v53, %v3505_v56  ;;  %v3590_v57 = vmax.f32 %v9616_v8, %v3505_v56  ;;  %v6787_v56 = vld [vmem:[%s11346_s5 + $0x260] sm:$0xff] }
 0x439   : > { %v3589_v27 = vmax.f32 %v9610_v39, %v3528_v28 }
 0x43a   : > { %6676 = vmatprep.mubr.msk.f32.mxu1 %vm3616_vm7, %v3590_v57 }
 0x43b   : > { %3799 = vmatmul.mubr.f32.gmra.mxu1 %v3589_v27  ;;  %v3509_v22 = vpop.permute.xlu1 %3508  ;;  %v3511_v59 = vpop.permute.xlu0 %3510  ;;  %v6753_v27 = vld [vmem:[%s11346_s5 + $0x1e0] sm:$0xff] }
 0x43c   : > { %v3529_v36 = vsel %vm3514_vm6, %v3507_v18, %v3509_v22  ;;  %v3592_v33 = vmax.f32 %v9637_v23, %v3509_v22  ;;  %v3814_v23 = vld [vmem:[%s11346_s5] sm:$0xff] }
 0x43d   : > { %v3591_v62 = vmax.f32 %v9624_v7, %v3529_v36  ;;  %v6685_v7 = vld [vmem:[%s11346_s5 + $0xe0] sm:$0xff]  ;;  %4176 = vmatpush1.msra.mxu1 %v3814_v23  ;;  %v6786_v36 = vld [vmem:[%s11346_s5 + $0x258] sm:$0xff]  ;;  %v6751_v23 = vld [vmem:[%s11346_s5 + $0x1d0] sm:$0xff] }
 0x43e   : > { %6677 = vmatprep.mubr.msk.f32.mxu1 %vm3616_vm7, %v3592_v33  ;;  %3971 = vmatpush1.msra.mxu0 %v6685_v7  ;;  %v6752_v33 = vld [vmem:[%s11346_s5 + $0x1d8] sm:$0xff] }
 0x43f   : > { %3804 = vmatmul.mubr.f32.gmra.mxu1 %v3591_v62  ;;  %v3513_v0 = vpop.permute.xlu1 %3512  ;;  %6799 = vmatprep.subr.msk.mxu1 %vm3939_vm5, %v6798_v20 }
 0x440   : > { %v3530_v8 = vsel %vm3514_vm6, %v3511_v59, %v3513_v0  ;;  %v3594_v39 = vmax.f32 %v9665_v10, %v3513_v0  ;;  %v6684_v10 = vld [vmem:[%s11346_s5 + $0xd8] sm:$0xff] }
 0x441   : > { %v3593_v14 = vmax.f32 %v9646_v1, %v3530_v8  ;;  %v6683_v1 = vld [vmem:[%s11346_s5 + $0xd0] sm:$0xff]  ;;  %3972 = vmatprep.subr.mxu0 %v6684_v10 }
 0x442   : > { %6678 = vmatprep.mubr.msk.f32.mxu1 %vm3616_vm7, %v3594_v39  ;;  %3973 = vmatpush1.msra.mxu0 %v6683_v1  ;;  %v6785_v39 = vld [vmem:[%s11346_s5 + $0x250] sm:$0xff] }
 0x443   : > { %3809 = vmatmul.mubr.f32.gmra.mxu1 %v3593_v14  ;;  %3974 = vmatprep.subr.mxu0 %v6682_v34  ;;  %v6784_v34 = vld [vmem:[%s11346_s5 + $0x248] sm:$0xff] }
 0x444   : > { %4209 = vmatprep.mubr.f32.mxu1 %v11617_v51  ;;  %3975 = vmatpush1.msra.mxu0 %v6681_v47  ;;  %v6750_v47 = vld [vmem:[%s11346_s5 + $0x1c8] sm:$0xff] }
 0x445   : > { %3976 = vmatprep.subr.mxu0 %v6680_v60 }
 0x446   : > { %3977 = vmatpush1.msra.mxu0 %v6679_v48 }
 0x447   : > { %6759 = vmatprep.subr.msk.mxu0 %vm3939_vm5, %v6758_v19 }
 0x4c7   : > { %v9848_v54 = vpop.f32.mrf.mxu1 }
 0x4c8   : > { %6721 = vmatmul.mubr.msk.f32.vlgmr.msra.gmra.mxu1 %vm3906_vm8, %v9848_v54  ;;  %v3875_v50 = vrot.slane %v9848_v54, 1  ;;  %v4330_v43 = vrot.slane %v9848_v54, 2  ;;  %v4901_v26 = vrot.slane %v9848_v54, 4 }
 0x4c9   : > { %v3737_v61 = vpop.f32.mrf.mxu1  ;;  %4215 = vmatprep.mubr.f32.mxu1 %v11617_v51  ;;  %6800 = vmatpush1.msk.msra.mxu1 %vm3939_vm5, %v6797_v45  ;;  %v6783_v45 = vld [vmem:[%s11346_s5 + $0x240] sm:$0xff] }
 0x4ca   : > { %4697 = vmatprep.subr.mxu1 %v6796_v38  ;;  %v6749_v61 = vld [vmem:[%s11346_s5 + $0x1c0] sm:$0xff] }
 0x4cb   : > { %v9868_v32 = vpop.f32.mrf.mxu1  ;;  %4698 = vmatpush1.msra.mxu1 %v6795_v35 }
 0x4cc   : > { %v3876_v11 = vrot.slane %v9868_v32, 1  ;;  %v4331_v40 = vrot.slane %v9868_v32, 2  ;;  %v4902_v3 = vrot.slane %v9868_v32, 4  ;;  %6722 = vmatmul.mubr.msk.f32.gmra.mxu1 %vm3906_vm8, %v9868_v32  ;;  %4699 = vmatprep.subr.mxu1 %v6794_v31 }
 0x4cd   : > { %v3742_v9 = vpop.f32.mrf.mxu1  ;;  %4221 = vmatprep.mubr.f32.mxu1 %v11617_v51  ;;  %4700 = vmatpush1.msra.mxu1 %v6793_v15 }
 0x4ce   : > { %v3877_v44 = vsel %vm2914_vm1, %v3875_v50, %v3876_v11  ;;  %4701 = vmatprep.subr.mxu1 %v6792_v49  ;;  %v9888_v6 = vsel %vm4329_vm9, %v4330_v43, %v4331_v40  ;;  %v9891_v46 = vsel %vm3939_vm5, %v4901_v26, %v4902_v3  ;;  %v6782_v50 = vld [vmem:[%s11346_s5 + $0x238] sm:$0xff] }
 0x4cf   : > { %v9893_v55 = vpop.f32.mrf.mxu1  ;;  %6703 = vmatmul.mubr.msk.f32.vlgmr.msra.gmra.mxu0 %vm3906_vm8, %v3877_v44  ;;  %4702 = vmatpush1.msra.mxu1 %v6791_v13  ;;  %v6748_v43 = vld [vmem:[%s11346_s5 + $0x1b8] sm:$0xff]  ;;  %v6747_v44 = vld [vmem:[%s11346_s5 + $0x1b0] sm:$0xff] }
 0x4d0   : > { %v3878_v42 = vrot.slane %v9893_v55, 1  ;;  %v4333_v16 = vrot.slane %v9893_v55, 2  ;;  %v4904_v2 = vrot.slane %v9893_v55, 4  ;;  %6723 = vmatmul.mubr.msk.f32.gmra.mxu1 %vm3906_vm8, %v9893_v55  ;;  %4016 = vmatprep.mubr.f32.mxu0 %v11617_v51 }
 0x4d1   : > { %v3747_v63 = vpop.f32.mrf.mxu1  ;;  %4227 = vmatprep.mubr.f32.mxu1 %v11617_v51  ;;  %6760 = vmatpush1.msk.msra.mxu0 %vm3939_vm5, %v6757_v4 }
 0x4d2   : > { %v3879_v29 = vsel %vm2914_vm1, %v3876_v11, %v3878_v42  ;;  %4411 = vmatprep.subr.mxu0 %v6756_v5  ;;  %4703 = vmatprep.subr.mxu1 %v6790_v52  ;;  %v9918_v58 = vsel %vm4329_vm9, %v4331_v40, %v4333_v16  ;;  %v9930_v53 = vsel %vm3939_vm5, %v4902_v3, %v4904_v2  ;;  %v6781_v3 = vld [vmem:[%s11346_s5 + $0x230] sm:$0xff]  ;;  %v6780_v52 = vld [vmem:[%s11346_s5 + $0x228] sm:$0xff] }
 0x4d3   : > { %v9920_v12 = vpop.f32.mrf.mxu1  ;;  %6704 = vmatmul.mubr.msk.f32.gmra.mxu0 %vm3906_vm8, %v3879_v29  ;;  %4704 = vmatpush1.msra.mxu1 %v6789_v24  ;;  %v6779_v29 = vld [vmem:[%s11346_s5 + $0x220] sm:$0xff] }
 0x4d4   : > { %v3880_v25 = vrot.slane %v9920_v12, 1  ;;  %v4335_v30 = vrot.slane %v9920_v12, 2  ;;  %v4906_v37 = vrot.slane %v9920_v12, 4  ;;  %6724 = vmatmul.mubr.msk.f32.gmra.mxu1 %vm3906_vm8, %v9920_v12  ;;  %4022 = vmatprep.mubr.f32.mxu0 %v11617_v51 }
 0x4d5   : > { %v3752_v28 = vpop.f32.mrf.mxu1  ;;  %4233 = vmatprep.mubr.f32.mxu1 %v11617_v51  ;;  %4412 = vmatpush1.msra.mxu0 %v6755_v17 }
 0x4d6   : > { %v3881_v57 = vsel %vm2914_vm1, %v3878_v42, %v3880_v25  ;;  %4705 = vmatprep.subr.mxu1 %v6788_v21  ;;  %4413 = vmatprep.subr.mxu0 %v6754_v41  ;;  %v9947_v18 = vsel %vm4329_vm9, %v4333_v16, %v4335_v30  ;;  %v9959_v62 = vsel %vm3939_vm5, %v4904_v2, %v4906_v37  ;;  %v6746_v42 = vld [vmem:[%s11346_s5 + $0x1a8] sm:$0xff]  ;;  %v6745_v41 = vld [vmem:[%s11346_s5 + $0x1a0] sm:$0xff] }
 0x4d7   : > { %v9949_v22 = vpop.f32.mrf.mxu1  ;;  %6705 = vmatmul.mubr.msk.f32.gmra.mxu0 %vm3906_vm8, %v3881_v57  ;;  %4706 = vmatpush1.msra.mxu1 %v6787_v56  ;;  %v6744_v56 = vld [vmem:[%s11346_s5 + $0x198] sm:$0xff] }
 0x4d8   : > { %v3882_v59 = vrot.slane %v9949_v22, 1  ;;  %v4337_v0 = vrot.slane %v9949_v22, 2  ;;  %v4908_v8 = vrot.slane %v9949_v22, 4  ;;  %6725 = vmatmul.mubr.msk.f32.gmra.mxu1 %vm3906_vm8, %v9949_v22  ;;  %4028 = vmatprep.mubr.f32.mxu0 %v11617_v51 }
 0x4d9   : > { %v3757_v14 = vpop.f32.mrf.mxu1  ;;  %4239 = vmatprep.mubr.f32.mxu1 %v11617_v51  ;;  %4414 = vmatpush1.msra.mxu0 %v6753_v27 }
 0x4da   : > { %v3883_v7 = vsel %vm2914_vm1, %v3880_v25, %v3882_v59  ;;  %4707 = vmatprep.subr.mxu1 %v6786_v36  ;;  %4415 = vmatprep.subr.mxu0 %v6752_v33  ;;  %v9976_v10 = vsel %vm4329_vm9, %v4335_v30, %v4337_v0  ;;  %v9988_v60 = vsel %vm3939_vm5, %v4906_v37, %v4908_v8  ;;  %v6778_v37 = vld [vmem:[%s11346_s5 + $0x218] sm:$0xff]  ;;  %v6777_v33 = vld [vmem:[%s11346_s5 + $0x210] sm:$0xff] }
 0x4db   : > { %v9978_v1 = vpop.f32.mrf.mxu1  ;;  %6706 = vmatmul.mubr.msk.f32.gmra.mxu0 %vm3906_vm8, %v3883_v7  ;;  %4708 = vmatpush1.msra.mxu1 %v6785_v39  ;;  %v6742_v7 = vld [vmem:[%s11346_s5 + $0x188] sm:$0xff] }
 0x4dc   : > { %v3884_v48 = vrot.slane %v9978_v1, 1  ;;  %v4339_v20 = vrot.slane %v9978_v1, 2  ;;  %v4910_v19 = vrot.slane %v9978_v1, 4  ;;  %6726 = vmatmul.mubr.msk.f32.gmra.mxu1 %vm3906_vm8, %v9978_v1  ;;  %4034 = vmatprep.mubr.f32.mxu0 %v11617_v51 }
 0x4dd   : > { %v3762_v38 = vpop.f32.mrf.mxu1  ;;  %4245 = vmatprep.mubr.f32.mxu1 %v11617_v51  ;;  %4416 = vmatpush1.msra.mxu0 %v6751_v23 }
 0x4de   : > { %v3885_v35 = vsel %vm2914_vm1, %v3882_v59, %v3884_v48  ;;  %4709 = vmatprep.subr.mxu1 %v6784_v34  ;;  %4417 = vmatprep.subr.mxu0 %v6750_v47  ;;  %v10005_v31 = vsel %vm4329_vm9, %v4337_v0, %v4339_v20  ;;  %v10017_v49 = vsel %vm3939_vm5, %v4908_v8, %v4910_v19  ;;  %v6743_v8 = vld [vmem:[%s11346_s5 + $0x190] sm:$0xff] }
 0x4df   : > { %v10007_v15 = vpop.f32.mrf.mxu1  ;;  %6707 = vmatmul.mubr.msk.f32.gmra.mxu0 %vm3906_vm8, %v3885_v35  ;;  %4710 = vmatpush1.msra.mxu1 %v6783_v45  ;;  %v6741_v45 = vld [vmem:[%s11346_s5 + $0x180] sm:$0xff] }
 0x4e0   : > { %v3886_v26 = vrot.slane %v10007_v15, 1  ;;  %v4341_v11 = vrot.slane %v10007_v15, 2  ;;  %v4912_v40 = vrot.slane %v10007_v15, 4  ;;  %6727 = vmatmul.mubr.msk.f32.gmra.mxu1 %vm3906_vm8, %v10007_v15  ;;  %4040 = vmatprep.mubr.f32.mxu0 %v11617_v51 }
 0x4e1   : > { %v3767_v13 = vpop.f32.mrf.mxu1  ;;  %4251 = vmatprep.mubr.f32.mxu1 %v11617_v51  ;;  %4418 = vmatpush1.msra.mxu0 %v6749_v61 }
 0x4e2   : > { %v3887_v9 = vsel %vm2914_vm1, %v3884_v48, %v3886_v26  ;;  %4711 = vmatprep.subr.mxu1 %v6782_v50  ;;  %4419 = vmatprep.subr.mxu0 %v6748_v43  ;;  %v10034_v4 = vsel %vm4329_vm9, %v4339_v20, %v4341_v11  ;;  %v10046_v16 = vsel %vm3939_vm5, %v4910_v19, %v4912_v40  ;;  %v6740_v50 = vld [vmem:[%s11346_s5 + $0x178] sm:$0xff]  ;;  %v6739_v13 = vld [vmem:[%s11346_s5 + $0x170] sm:$0xff] }
 0x4e3   : > { %v10036_v5 = vpop.f32.mrf.mxu1  ;;  %6708 = vmatmul.mubr.msk.f32.gmra.mxu0 %vm3906_vm8, %v3887_v9  ;;  %4712 = vmatpush1.msra.mxu1 %v6781_v3 }
 0x4e4   : > { %v3888_v2 = vrot.slane %v10036_v5, 1  ;;  %v4343_v24 = vrot.slane %v10036_v5, 2  ;;  %v4914_v63 = vrot.slane %v10036_v5, 4  ;;  %6728 = vmatmul.mubr.msk.f32.gmra.mxu1 %vm3906_vm8, %v10036_v5  ;;  %4046 = vmatprep.mubr.f32.mxu0 %v11617_v51 }
 0x4e5   : > { %v3772_v17 = vpop.f32.mrf.mxu1  ;;  %4257 = vmatprep.mubr.f32.mxu1 %v11617_v51  ;;  %4420 = vmatpush1.msra.mxu0 %v6747_v44 }
 0x4e6   : > { %v3889_v21 = vsel %vm2914_vm1, %v3886_v26, %v3888_v2  ;;  %4713 = vmatprep.subr.mxu1 %v6780_v52  ;;  %4421 = vmatprep.subr.mxu0 %v6746_v42  ;;  %v10063_v25 = vsel %vm4329_vm9, %v4341_v11, %v4343_v24  ;;  %v10075_v28 = vsel %vm3939_vm5, %v4912_v40, %v4914_v63  ;;  %v6738_v42 = vld [vmem:[%s11346_s5 + $0x168] sm:$0xff] }
 0x4e7   : > { %v10065_v30 = vpop.f32.mrf.mxu1  ;;  %6709 = vmatmul.mubr.msk.f32.gmra.mxu0 %vm3906_vm8, %v3889_v21  ;;  %4714 = vmatpush1.msra.mxu1 %v6779_v29  ;;  %v6737_v21 = vld [vmem:[%s11346_s5 + $0x160] sm:$0xff] }
 0x4e8   : > { %v3890_v57 = vrot.slane %v10065_v30, 1  ;;  %v4345_v27 = vrot.slane %v10065_v30, 2  ;;  %v4916_v36 = vrot.slane %v10065_v30, 4  ;;  %6729 = vmatmul.mubr.msk.f32.gmra.mxu1 %vm3906_vm8, %v10065_v30  ;;  %4052 = vmatprep.mubr.f32.mxu0 %v11617_v51 }
 0x4e9   : > { %v3777_v59 = vpop.f32.mrf.mxu1  ;;  %4263 = vmatprep.mubr.f32.mxu1 %v11617_v51  ;;  %4422 = vmatpush1.msra.mxu0 %v6745_v41 }
 0x4ea   : > { %v3891_v0 = vsel %vm2914_vm1, %v3888_v2, %v3890_v57  ;;  %4715 = vmatprep.subr.mxu1 %v6778_v37  ;;  %4423 = vmatprep.subr.mxu0 %v6744_v56  ;;  %v10092_v39 = vsel %vm4329_vm9, %v4343_v24, %v4345_v27  ;;  %v10101_v23 = vsel %vm3939_vm5, %v4914_v63, %v4916_v36 }
 0x4eb   : > { %v10094_v14 = vpop.f32.mrf.mxu1  ;;  %6710 = vmatmul.mubr.msk.f32.gmra.mxu0 %vm3906_vm8, %v3891_v0  ;;  %4716 = vmatpush1.msra.mxu1 %v6777_v33 }
 0x4ec   : > { %v3892_v34 = vrot.slane %v10094_v14, 1  ;;  %v4347_v47 = vrot.slane %v10094_v14, 2  ;;  %v4918_v48 = vrot.slane %v10094_v14, 4  ;;  %6730 = vmatmul.mubr.msk.f32.gmra.mxu1 %vm3906_vm8, %v10094_v14  ;;  %4058 = vmatprep.mubr.f32.mxu0 %v11617_v51 }
 0x4ed   : > { %v3782_v20 = vpop.f32.mrf.mxu1  ;;  %4269 = vmatprep.mubr.f32.mxu1 %v11617_v51  ;;  %4424 = vmatpush1.msra.mxu0 %v6743_v8 }
 0x4ee   : > { %v3893_v19 = vsel %vm2914_vm1, %v3890_v57, %v3892_v34  ;;  %4425 = vmatprep.subr.mxu0 %v6742_v7  ;;  %v10115_v38 = vsel %vm4329_vm9, %v4345_v27, %v4347_v47  ;;  %v10118_v35 = vsel %vm3939_vm5, %v4916_v36, %v4918_v48  ;;  %v6838_v57 = vld [vmem:[%s11346_s5 + $0x368] sm:$0xf] }
 0x4ef   : > { %v10120_v61 = vpop.f32.mrf.mxu1  ;;  %6711 = vmatmul.mubr.msk.f32.gmra.mxu0 %vm3906_vm8, %v3893_v19 }
 0x4f0   : > { %v3894_v43 = vrot.slane %v10120_v61, 1  ;;  %v4349_v26 = vrot.slane %v10120_v61, 2  ;;  %v4920_v11 = vrot.slane %v10120_v61, 4  ;;  %6731 = vmatmul.mubr.msk.f32.gmra.mxu1 %vm3906_vm8, %v10120_v61  ;;  %4064 = vmatprep.mubr.f32.mxu0 %v11617_v51 }
 0x4f1   : > { %v3787_v40 = vpop.f32.mrf.mxu1  ;;  %4275 = vmatprep.mubr.f32.mxu1 %v11617_v51  ;;  %4426 = vmatpush1.msra.mxu0 %v6741_v45 }
 0x4f2   : > { %v3895_v3 = vsel %vm2914_vm1, %v3892_v34, %v3894_v43  ;;  %4427 = vmatprep.subr.mxu0 %v6740_v50  ;;  %v10138_v9 = vsel %vm4329_vm9, %v4347_v47, %v4349_v26  ;;  %v10141_v44 = vsel %vm3939_vm5, %v4918_v48, %v4920_v11 }
 0x4f3   : > { %v10143_v52 = vpop.f32.mrf.mxu1  ;;  %6712 = vmatmul.mubr.msk.f32.gmra.mxu0 %vm3906_vm8, %v3895_v3 }
 0x4f4   : > { %v3896_v2 = vrot.slane %v10143_v52, 1  ;;  %v4351_v24 = vrot.slane %v10143_v52, 2  ;;  %v4922_v63 = vrot.slane %v10143_v52, 4  ;;  %6732 = vmatmul.mubr.msk.f32.gmra.mxu1 %vm3906_vm8, %v10143_v52  ;;  %4070 = vmatprep.mubr.f32.mxu0 %v11617_v51 }
 0x4f5   : > { %v3792_v29 = vpop.f32.mrf.mxu1  ;;  %4281 = vmatprep.mubr.f32.mxu1 %v11617_v51  ;;  %4428 = vmatpush1.msra.mxu0 %v6739_v13 }
 0x4f6   : > { %v3897_v17 = vsel %vm2914_vm1, %v3894_v43, %v3896_v2  ;;  %4429 = vmatprep.subr.mxu0 %v6738_v42  ;;  %v10161_v41 = vsel %vm4329_vm9, %v4349_v26, %v4351_v24  ;;  %v10164_v37 = vsel %vm3939_vm5, %v4920_v11, %v4922_v63 }
 0x4f7   : > { %v10166_v56 = vpop.f32.mrf.mxu1  ;;  %6713 = vmatmul.mubr.msk.f32.gmra.mxu0 %vm3906_vm8, %v3897_v17 }
 0x4f8   : > { %v3898_v27 = vrot.slane %v10166_v56, 1  ;;  %v4353_v36 = vrot.slane %v10166_v56, 2  ;;  %v4924_v33 = vrot.slane %v10166_v56, 4  ;;  %6733 = vmatmul.mubr.msk.f32.gmra.mxu1 %vm3906_vm8, %v10166_v56  ;;  %4076 = vmatprep.mubr.f32.mxu0 %v11617_v51 }
 0x4f9   : > { %v3797_v59 = vpop.f32.mrf.mxu1  ;;  %4287 = vmatprep.mubr.f32.mxu1 %v11617_v51  ;;  %4430 = vmatpush1.msra.mxu0 %v6737_v21 }
 0x4fa   : > { %v3899_v0 = vsel %vm2914_vm1, %v3896_v2, %v3898_v27  ;;  %6839 = vmatprep.subr.msk.mxu0 %vm3939_vm5, %v6838_v57  ;;  %v10182_v8 = vsel %vm4329_vm9, %v4351_v24, %v4353_v36  ;;  %v10185_v7 = vsel %vm3939_vm5, %v4922_v63, %v4924_v33  ;;  %v4617_v63 = vrot.slane %v9868_v32, 3 }
 0x4fb   : > { %v10187_v34 = vpop.f32.mrf.mxu1  ;;  %6714 = vmatmul.mubr.msk.f32.gmra.mxu0 %vm3906_vm8, %v3899_v0  ;;  %v4619_v0 = vrot.slane %v9893_v55, 3  ;;  %v6837_v55 = vld [vmem:[%s11346_s5 + $0x360] sm:$0xf] }
 0x4fc   : > { %v3900_v47 = vrot.slane %v10187_v34, 1  ;;  %v4355_v48 = vrot.slane %v10187_v34, 2  ;;  %v4926_v20 = vrot.slane %v10187_v34, 4  ;;  %6734 = vmatmul.mubr.msk.f32.gmra.mxu1 %vm3906_vm8, %v10187_v34  ;;  %4082 = vmatprep.mubr.f32.mxu0 %v11617_v51 }
 0x4fd   : > { %v3802_v19 = vpop.f32.mrf.mxu1  ;;  %4293 = vmatprep.mubr.f32.mxu1 %v11617_v51 }
 0x4fe   : > { %v3901_v45 = vsel %vm2914_vm1, %v3898_v27, %v3900_v47  ;;  %v10199_v50 = vsel %vm4329_vm9, %v4353_v36, %v4355_v48  ;;  %v10202_v43 = vsel %vm3939_vm5, %v4924_v33, %v4926_v20  ;;  %v4616_v27 = vrot.slane %v9848_v54, 3  ;;  %v6836_v19 = vld [vmem:[%s11346_s5 + $0x358] sm:$0xff] }
 0x4ff   : > { %v10204_v26 = vpop.f32.mrf.mxu1  ;;  %6715 = vmatmul.mubr.msk.f32.gmra.mxu0 %vm3906_vm8, %v3901_v45 }
 0x500   : > { %v3902_v11 = vrot.slane %v10204_v26, 1  ;;  %v4357_v40 = vrot.slane %v10204_v26, 2  ;;  %v4928_v3 = vrot.slane %v10204_v26, 4  ;;  %6735 = vmatmul.mubr.msk.f32.gmra.mxu1 %vm3906_vm8, %v10204_v26  ;;  %4088 = vmatprep.mubr.f32.mxu0 %v11617_v51  ;;  %v4618_v54 = vsel %vm4615_vm10, %v4616_v27, %v4617_v63 }
 0x501   : > { %v3807_v13 = vpop.f32.mrf.mxu1  ;;  %4299 = vmatprep.mubr.f32.mxu1 %v11617_v51 }
 0x502   : > { %v3903_v42 = vsel %vm2914_vm1, %v3900_v47, %v3902_v11  ;;  %v10216_v2 = vsel %vm4329_vm9, %v4355_v48, %v4357_v40  ;;  %v10219_v24 = vsel %vm3939_vm5, %v4926_v20, %v4928_v3  ;;  %v4621_v47 = vrot.slane %v9920_v12, 3 }
 0x503   : > { %v10222_v29 = vpop.f32.mrf.mxu1  ;;  %6716 = vmatmul.mubr.msk.f32.gmra.mxu0 %vm3906_vm8, %v3903_v42  ;;  %v4620_v48 = vsel %vm4615_vm10, %v4617_v63, %v4619_v0  ;;  %v4623_v20 = vrot.slane %v9949_v22, 3  ;;  %v6835_v22 = vld [vmem:[%s11346_s5 + $0x350] sm:$0xff]  ;;  %v6830_v42 = vld [vmem:[%s11346_s5 + $0x328] sm:$0xff] }
 0x504   : > { %v3904_v17 = vrot.slane %v10222_v29, 1  ;;  %v4359_v21 = vrot.slane %v10222_v29, 2  ;;  %v4930_v57 = vrot.slane %v10222_v29, 4  ;;  %6736 = vmatmul.mubr.msk.f32.gmra.mxu1 %vm3906_vm8, %v10222_v29  ;;  %4094 = vmatprep.mubr.f32.mxu0 %v11617_v51  ;;  %v4622_v12 = vsel %vm4615_vm10, %v4619_v0, %v4621_v47  ;;  %v6824_v0 = vld [vmem:[%s11346_s5 + $0x2f8] sm:$0xff] }
 0x505   : > { %v3812_v36 = vpop.f32.mrf.mxu1  ;;  %4749 = vmatprep.mubr.f32.mxu1 %v11617_v51  ;;  %v4624_v45 = vsel %vm4615_vm10, %v4621_v47, %v4623_v20  ;;  %v6822_v47 = vld [vmem:[%s11346_s5 + $0x2e8] sm:$0xff] }
 0x506   : > { %v3905_v32 = vsel %vm2914_vm1, %v3902_v11, %v3904_v17  ;;  %v10237_v33 = vsel %vm4329_vm9, %v4357_v40, %v4359_v21  ;;  %v10242_v59 = vsel %vm3939_vm5, %v4928_v3, %v4930_v57  ;;  %v6834_v11 = vld [vmem:[%s11346_s5 + $0x348] sm:$0xff]  ;;  %v6832_v3 = vld [vmem:[%s11346_s5 + $0x338] sm:$0xff] }
 0x507   : > { %6717 = vmatmul.mubr.msk.f32.gmra.mxu0 %vm3906_vm8, %v3905_v32  ;;  %v6826_v36 = vld [vmem:[%s11346_s5 + $0x308] sm:$0xff] }
 0x508   : > { %6801 = vmatmul.mubr.msk.f32.vlgmr.msra.gmra.mxu1 %vm3906_vm8, %v4618_v54  ;;  %4100 = vmatprep.mubr.f32.mxu0 %v11617_v51 }
 0x509   : > { %4755 = vmatprep.mubr.f32.mxu1 %v11617_v51 }
 0x50b   : > { %6718 = vmatmul.mubr.msk.f32.gmra.mxu0 %vm3906_vm8, %v3904_v17  ;;  %v6828_v17 = vld [vmem:[%s11346_s5 + $0x318] sm:$0xff] }
 0x50c   : > { %6802 = vmatmul.mubr.msk.f32.gmra.mxu1 %vm3906_vm8, %v4620_v48  ;;  %4463 = vmatprep.mubr.f32.mxu0 %v11617_v51 }
 0x50d   : > { %4761 = vmatprep.mubr.f32.mxu1 %v11617_v51 }
 0x50f   : > { %6761 = vmatmul.mubr.msk.f32.vlgmr.msra.gmra.mxu0 %vm3906_vm8, %v9888_v6  ;;  %v4625_v6 = vrot.slane %v9978_v1, 3  ;;  %v6833_v1 = vld [vmem:[%s11346_s5 + $0x340] sm:$0xff] }
 0x510   : > { %6803 = vmatmul.mubr.msk.f32.gmra.mxu1 %vm3906_vm8, %v4622_v12  ;;  %4469 = vmatprep.mubr.f32.mxu0 %v11617_v51  ;;  %v6818_v12 = vld [vmem:[%s11346_s5 + $0x2c8] sm:$0xff] }
 0x511   : > { %4767 = vmatprep.mubr.f32.mxu1 %v11617_v51  ;;  %6840 = vmatpush1.msk.msra.mxu0 %vm3939_vm5, %v6837_v55  ;;  %v4626_v40 = vsel %vm4615_vm10, %v4623_v20, %v4625_v6  ;;  %v6820_v55 = vld [vmem:[%s11346_s5 + $0x2d8] sm:$0xff] }
 0x512   : > { %4982 = vmatprep.subr.mxu0 %v6836_v19 }
 0x513   : > { %6762 = vmatmul.mubr.msk.f32.gmra.mxu0 %vm3906_vm8, %v9918_v58  ;;  %v4627_v58 = vrot.slane %v10007_v15, 3  ;;  %v6831_v15 = vld [vmem:[%s11346_s5 + $0x330] sm:$0xff] }
 0x514   : > { %6804 = vmatmul.mubr.msk.f32.gmra.mxu1 %vm3906_vm8, %v4624_v45  ;;  %4475 = vmatprep.mubr.f32.mxu0 %v11617_v51 }
 0x515   : > { %4773 = vmatprep.mubr.f32.mxu1 %v11617_v51  ;;  %4983 = vmatpush1.msra.mxu0 %v6835_v22  ;;  %v4628_v13 = vsel %vm4615_vm10, %v4625_v6, %v4627_v58  ;;  %v4645_v22 = vrot.slane %v10222_v29, 3 }
 0x516   : > { %4984 = vmatprep.subr.mxu0 %v6834_v11 }
 0x517   : > { %6763 = vmatmul.mubr.msk.f32.gmra.mxu0 %vm3906_vm8, %v9947_v18  ;;  %v4629_v18 = vrot.slane %v10036_v5, 3  ;;  %v6829_v5 = vld [vmem:[%s11346_s5 + $0x320] sm:$0xff] }
 0x518   : > { %6805 = vmatmul.mubr.msk.f32.gmra.mxu1 %vm3906_vm8, %v4626_v40  ;;  %4481 = vmatprep.mubr.f32.mxu0 %v11617_v51 }
 0x519   : > { %4779 = vmatprep.mubr.f32.mxu1 %v11617_v51  ;;  %4985 = vmatpush1.msra.mxu0 %v6833_v1  ;;  %v4630_v63 = vsel %vm4615_vm10, %v4627_v58, %v4629_v18 }
 0x51a   : > { %4986 = vmatprep.subr.mxu0 %v6832_v3 }
 0x51b   : > { %6764 = vmatmul.mubr.msk.f32.gmra.mxu0 %vm3906_vm8, %v9976_v10  ;;  %v4631_v10 = vrot.slane %v10065_v30, 3  ;;  %v6827_v30 = vld [vmem:[%s11346_s5 + $0x310] sm:$0xff] }
 0x51c   : > { %6806 = vmatmul.mubr.msk.f32.gmra.mxu1 %vm3906_vm8, %v4628_v13  ;;  %4487 = vmatprep.mubr.f32.mxu0 %v11617_v51 }
 0x51d   : > { %4785 = vmatprep.mubr.f32.mxu1 %v11617_v51  ;;  %4987 = vmatpush1.msra.mxu0 %v6831_v15  ;;  %v4632_v27 = vsel %vm4615_vm10, %v4629_v18, %v4631_v10 }
 0x51e   : > { %4988 = vmatprep.subr.mxu0 %v6830_v42 }
 0x51f   : > { %6765 = vmatmul.mubr.msk.f32.gmra.mxu0 %vm3906_vm8, %v10005_v31  ;;  %v4633_v31 = vrot.slane %v10094_v14, 3  ;;  %v6825_v14 = vld [vmem:[%s11346_s5 + $0x300] sm:$0xff] }
 0x520   : > { %6807 = vmatmul.mubr.msk.f32.gmra.mxu1 %vm3906_vm8, %v4630_v63  ;;  %4493 = vmatprep.mubr.f32.mxu0 %v11617_v51 }
 0x521   : > { %4791 = vmatprep.mubr.f32.mxu1 %v11617_v51  ;;  %4989 = vmatpush1.msra.mxu0 %v6829_v5  ;;  %v4634_v32 = vsel %vm4615_vm10, %v4631_v10, %v4633_v31 }
 0x522   : > { %4990 = vmatprep.subr.mxu0 %v6828_v17 }
 0x523   : > { %6766 = vmatmul.mubr.msk.f32.gmra.mxu0 %vm3906_vm8, %v10034_v4  ;;  %v4635_v4 = vrot.slane %v10120_v61, 3  ;;  %v6823_v61 = vld [vmem:[%s11346_s5 + $0x2f0] sm:$0xff] }
 0x524   : > { %6808 = vmatmul.mubr.msk.f32.gmra.mxu1 %vm3906_vm8, %v4632_v27  ;;  %4499 = vmatprep.mubr.f32.mxu0 %v11617_v51 }
 0x525   : > { %4797 = vmatprep.mubr.f32.mxu1 %v11617_v51  ;;  %4991 = vmatpush1.msra.mxu0 %v6827_v30  ;;  %v4636_v54 = vsel %vm4615_vm10, %v4633_v31, %v4635_v4 }
 0x526   : > { %4992 = vmatprep.subr.mxu0 %v6826_v36 }
 0x527   : > { %6767 = vmatmul.mubr.msk.f32.gmra.mxu0 %vm3906_vm8, %v10063_v25  ;;  %v4637_v25 = vrot.slane %v10143_v52, 3  ;;  %v6821_v52 = vld [vmem:[%s11346_s5 + $0x2e0] sm:$0xff] }
 0x528   : > { %6809 = vmatmul.mubr.msk.f32.gmra.mxu1 %vm3906_vm8, %v4634_v32  ;;  %4505 = vmatprep.mubr.f32.mxu0 %v11617_v51 }
 0x529   : > { %4803 = vmatprep.mubr.f32.mxu1 %v11617_v51  ;;  %4993 = vmatpush1.msra.mxu0 %v6825_v14  ;;  %v4638_v48 = vsel %vm4615_vm10, %v4635_v4, %v4637_v25 }
 0x52a   : > { %4994 = vmatprep.subr.mxu0 %v6824_v0 }
 0x52b   : > { %6768 = vmatmul.mubr.msk.f32.gmra.mxu0 %vm3906_vm8, %v10092_v39  ;;  %v4639_v39 = vrot.slane %v10166_v56, 3  ;;  %v6819_v56 = vld [vmem:[%s11346_s5 + $0x2d0] sm:$0xff] }
 0x52c   : > { %6810 = vmatmul.mubr.msk.f32.gmra.mxu1 %vm3906_vm8, %v4636_v54  ;;  %4511 = vmatprep.mubr.f32.mxu0 %v11617_v51 }
 0x52d   : > { %4809 = vmatprep.mubr.f32.mxu1 %v11617_v51  ;;  %4995 = vmatpush1.msra.mxu0 %v6823_v61  ;;  %v4640_v20 = vsel %vm4615_vm10, %v4637_v25, %v4639_v39 }
 0x52e   : > { %4996 = vmatprep.subr.mxu0 %v6822_v47 }
 0x52f   : > { %6769 = vmatmul.mubr.msk.f32.gmra.mxu0 %vm3906_vm8, %v10115_v38  ;;  %v4641_v38 = vrot.slane %v10187_v34, 3  ;;  %v6817_v34 = vld [vmem:[%s11346_s5 + $0x2c0] sm:$0xff] }
 0x530   : > { %6811 = vmatmul.mubr.msk.f32.gmra.mxu1 %vm3906_vm8, %v4638_v48  ;;  %4517 = vmatprep.mubr.f32.mxu0 %v11617_v51 }
 0x531   : > { %4815 = vmatprep.mubr.f32.mxu1 %v11617_v51  ;;  %4997 = vmatpush1.msra.mxu0 %v6821_v52  ;;  %v4642_v19 = vsel %vm4615_vm10, %v4639_v39, %v4641_v38 }
 0x532   : > { %4998 = vmatprep.subr.mxu0 %v6820_v55 }
 0x533   : > { %6770 = vmatmul.mubr.msk.f32.gmra.mxu0 %vm3906_vm8, %v10138_v9  ;;  %v4643_v9 = vrot.slane %v10204_v26, 3 }
 0x534   : > { %6812 = vmatmul.mubr.msk.f32.gmra.mxu1 %vm3906_vm8, %v4640_v20  ;;  %4523 = vmatprep.mubr.f32.mxu0 %v11617_v51 }
 0x535   : > { %4821 = vmatprep.mubr.f32.mxu1 %v11617_v51  ;;  %4999 = vmatpush1.msra.mxu0 %v6819_v56  ;;  %v4644_v26 = vsel %vm4615_vm10, %v4641_v38, %v4643_v9 }
 0x536   : > { %5000 = vmatprep.subr.mxu0 %v6818_v12 }
 0x537   : > { %6771 = vmatmul.mubr.msk.f32.gmra.mxu0 %vm3906_vm8, %v10161_v41  ;;  %v4646_v41 = vsel %vm4615_vm10, %v4643_v9, %v4645_v22 }
 0x538   : > { %6813 = vmatmul.mubr.msk.f32.gmra.mxu1 %vm3906_vm8, %v4642_v19  ;;  %4529 = vmatprep.mubr.f32.mxu0 %v11617_v51 }
 0x539   : > { %4827 = vmatprep.mubr.f32.mxu1 %v11617_v51  ;;  %5001 = vmatpush1.msra.mxu0 %v6817_v34 }
 0x53a   : > { %7030 = vmatprep.subr.mxu0 %v11617_v51 }
 0x53b   : > { %6772 = vmatmul.mubr.msk.f32.gmra.mxu0 %vm3906_vm8, %v10182_v8 }
 0x53c   : > { %6814 = vmatmul.mubr.msk.f32.gmra.mxu1 %vm3906_vm8, %v4644_v26  ;;  %4535 = vmatprep.mubr.f32.mxu0 %v11617_v51 }
 0x53d   : > { %4833 = vmatprep.mubr.f32.mxu1 %v11617_v51 }
 0x53f   : > { %6773 = vmatmul.mubr.msk.f32.gmra.mxu0 %vm3906_vm8, %v10199_v50 }
 0x540   : > { %6815 = vmatmul.mubr.msk.f32.gmra.mxu1 %vm3906_vm8, %v4646_v41  ;;  %4541 = vmatprep.mubr.f32.mxu0 %v11617_v51 }
 0x541   : > { %4839 = vmatprep.mubr.f32.mxu1 %v11617_v51 }
 0x543   : > { %6774 = vmatmul.mubr.msk.f32.gmra.mxu0 %vm3906_vm8, %v10216_v2 }
 0x544   : > { %6816 = vmatmul.mubr.msk.f32.gmra.mxu1 %vm3906_vm8, %v4645_v22  ;;  %4547 = vmatprep.mubr.f32.mxu0 %v11617_v51 }
 0x545   : > { %5487 = vmatprep.mubr.f32.mxu1 %v11617_v51 }
 0x547   : > { %6775 = vmatmul.mubr.msk.f32.gmra.mxu0 %vm3906_vm8, %v10237_v33 }
 0x548   : > { %4553 = vmatprep.mubr.f32.mxu0 %v11617_v51 }
 0x54b   : > { %6776 = vmatmul.mubr.msk.f32.gmra.mxu0 %vm3906_vm8, %v4359_v21 }
 0x54c   : > { %5034 = vmatprep.mubr.f32.mxu0 %v11617_v51 }
 0x54f   : > { %6841 = vmatmul.mubr.msk.f32.vlgmr.msra.gmra.mxu0 %vm3906_vm8, %v9891_v46 }
 0x550   : > { %5040 = vmatprep.mubr.f32.mxu0 %v11617_v51 }
 0x553   : > { %6842 = vmatmul.mubr.msk.f32.gmra.mxu0 %vm3906_vm8, %v9930_v53 }
 0x554   : > { %5046 = vmatprep.mubr.f32.mxu0 %v11617_v51 }
 0x557   : > { %6843 = vmatmul.mubr.msk.f32.gmra.mxu0 %vm3906_vm8, %v9959_v62 }
 0x558   : > { %5052 = vmatprep.mubr.f32.mxu0 %v11617_v51 }
 0x55b   : > { %6844 = vmatmul.mubr.msk.f32.gmra.mxu0 %vm3906_vm8, %v9988_v60 }
 0x55c   : > { %5058 = vmatprep.mubr.f32.mxu0 %v11617_v51 }
 0x55f   : > { %6845 = vmatmul.mubr.msk.f32.gmra.mxu0 %vm3906_vm8, %v10017_v49 }
 0x560   : > { %5064 = vmatprep.mubr.f32.mxu0 %v11617_v51 }
 0x563   : > { %6846 = vmatmul.mubr.msk.f32.gmra.mxu0 %vm3906_vm8, %v10046_v16 }
 0x564   : > { %5070 = vmatprep.mubr.f32.mxu0 %v11617_v51 }
 0x567   : > { %6847 = vmatmul.mubr.msk.f32.gmra.mxu0 %vm3906_vm8, %v10075_v28 }
 0x568   : > { %5076 = vmatprep.mubr.f32.mxu0 %v11617_v51 }
 0x56b   : > { %6848 = vmatmul.mubr.msk.f32.gmra.mxu0 %vm3906_vm8, %v10101_v23 }
 0x56c   : > { %5082 = vmatprep.mubr.f32.mxu0 %v11617_v51 }
 0x56f   : > { %6849 = vmatmul.mubr.msk.f32.gmra.mxu0 %vm3906_vm8, %v10118_v35 }
 0x570   : > { %5088 = vmatprep.mubr.f32.mxu0 %v11617_v51 }
 0x573   : > { %6850 = vmatmul.mubr.msk.f32.gmra.mxu0 %vm3906_vm8, %v10141_v44 }
 0x574   : > { %5094 = vmatprep.mubr.f32.mxu0 %v11617_v51 }
 0x577   : > { %6851 = vmatmul.mubr.msk.f32.gmra.mxu0 %vm3906_vm8, %v10164_v37 }
 0x578   : > { %5100 = vmatprep.mubr.f32.mxu0 %v11617_v51 }
 0x57b   : > { %6852 = vmatmul.mubr.msk.f32.gmra.mxu0 %vm3906_vm8, %v10185_v7 }
 0x57c   : > { %5106 = vmatprep.mubr.f32.mxu0 %v11617_v51 }
 0x57f   : > { %6853 = vmatmul.mubr.msk.f32.gmra.mxu0 %vm3906_vm8, %v10202_v43 }
 0x580   : > { %5112 = vmatprep.mubr.f32.mxu0 %v11617_v51 }
 0x583   : > { %6854 = vmatmul.mubr.msk.f32.gmra.mxu0 %vm3906_vm8, %v10219_v24 }
 0x584   : > { %5118 = vmatprep.mubr.f32.mxu0 %v11617_v51 }
 0x587   : > { %6855 = vmatmul.mubr.msk.f32.gmra.mxu0 %vm3906_vm8, %v10242_v59 }
 0x588   : > { %v4211_v46 = vpop.f32.mrf.mxu1  ;;  %5124 = vmatprep.mubr.f32.mxu0 %v11617_v51 }
 0x58a   : > { %v4213_v53 = vpop.f32.mrf.mxu1 }
 0x58b   : > { %6856 = vmatmul.mubr.msk.f32.gmra.mxu0 %vm3906_vm8, %v4930_v57 }
 0x58c   : > { %v4217_v62 = vpop.f32.mrf.mxu1 }
 0x58e   : > { %v4219_v60 = vpop.f32.mrf.mxu1 }
 0x58f   : > { %v4012_v49 = vpop.f32.mrf.mxu0 }
 0x590   : > { %v10471_v16 = vadd.f32 %v4211_v46, %v4012_v49  ;;  %v4223_v28 = vpop.f32.mrf.mxu1 }
 0x591   : > { %v4014_v23 = vpop.f32.mrf.mxu0 }
 0x592   : > { %v10473_v35 = vadd.f32 %v4213_v53, %v4014_v23  ;;  %v4225_v44 = vpop.f32.mrf.mxu1 }
 0x593   : > { %v4018_v37 = vpop.f32.mrf.mxu0 }
 0x594   : > { %v10475_v8 = vadd.f32 %v4217_v62, %v4018_v37  ;;  %v4229_v7 = vpop.f32.mrf.mxu1 }
 0x595   : > { %v4020_v50 = vpop.f32.mrf.mxu0 }
 0x596   : > { %v10477_v43 = vadd.f32 %v4219_v60, %v4020_v50  ;;  %v4231_v2 = vpop.f32.mrf.mxu1 }
 0x597   : > { %v4024_v24 = vpop.f32.mrf.mxu0 }
 0x598   : > { %v10479_v29 = vadd.f32 %v4223_v28, %v4024_v24  ;;  %v4235_v21 = vpop.f32.mrf.mxu1 }
 0x599   : > { %v4026_v57 = vpop.f32.mrf.mxu0 }
 0x59a   : > { %v10481_v33 = vadd.f32 %v4225_v44, %v4026_v57  ;;  %v4237_v59 = vpop.f32.mrf.mxu1 }
 0x59b   : > { %v4030_v6 = vpop.f32.mrf.mxu0 }
 0x59c   : > { %v10483_v45 = vadd.f32 %v4229_v7, %v4030_v6  ;;  %v4241_v11 = vpop.f32.mrf.mxu1 }
 0x59d   : > { %v4032_v1 = vpop.f32.mrf.mxu0 }
 0x59e   : > { %v10485_v58 = vadd.f32 %v4231_v2, %v4032_v1  ;;  %v4243_v40 = vpop.f32.mrf.mxu1 }
 0x59f   : > { %v4036_v3 = vpop.f32.mrf.mxu0 }
 0x5a0   : > { %v10487_v15 = vadd.f32 %v4235_v21, %v4036_v3  ;;  %v4247_v18 = vpop.f32.mrf.mxu1 }
 0x5a1   : > { %v4038_v13 = vpop.f32.mrf.mxu0 }
 0x5a2   : > { %v10489_v42 = vadd.f32 %v4237_v59, %v4038_v13  ;;  %v4249_v5 = vpop.f32.mrf.mxu1 }
 0x5a3   : > { %v4042_v10 = vpop.f32.mrf.mxu0 }
 0x5a4   : > { %v10491_v63 = vadd.f32 %v4241_v11, %v4042_v10  ;;  %v4253_v17 = vpop.f32.mrf.mxu1 }
 0x5a5   : > { %v4044_v30 = vpop.f32.mrf.mxu0 }
 0x5a6   : > { %v10493_v31 = vadd.f32 %v4243_v40, %v4044_v30  ;;  %v4255_v27 = vpop.f32.mrf.mxu1 }
 0x5a7   : > { %v4048_v36 = vpop.f32.mrf.mxu0 }
 0x5a8   : > { %v10495_v14 = vadd.f32 %v4247_v18, %v4048_v36  ;;  %v4259_v4 = vpop.f32.mrf.mxu1 }
 0x5a9   : > { %v4050_v32 = vpop.f32.mrf.mxu0 }
 0x5aa   : > { %v10497_v0 = vadd.f32 %v4249_v5, %v4050_v32  ;;  %v4261_v61 = vpop.f32.mrf.mxu1 }
 0x5ab   : > { %v4054_v25 = vpop.f32.mrf.mxu0 }
 0x5ac   : > { %v10499_v54 = vadd.f32 %v4253_v17, %v4054_v25  ;;  %v4265_v47 = vpop.f32.mrf.mxu1 }
 0x5ad   : > { %v4056_v52 = vpop.f32.mrf.mxu0 }
 0x5ae   : > { %v10501_v39 = vadd.f32 %v4255_v27, %v4056_v52  ;;  %v4267_v48 = vpop.f32.mrf.mxu1 }
 0x5af   : > { %v4060_v55 = vpop.f32.mrf.mxu0 }
 0x5b0   : > { %v10503_v56 = vadd.f32 %v4259_v4, %v4060_v55  ;;  %v4271_v38 = vpop.f32.mrf.mxu1 }
 0x5b1   : > { %v4062_v20 = vpop.f32.mrf.mxu0 }
 0x5b2   : > { %v10505_v12 = vadd.f32 %v4261_v61, %v4062_v20  ;;  %v4273_v34 = vpop.f32.mrf.mxu1 }
 0x5b3   : > { %v4066_v9 = vpop.f32.mrf.mxu0 }
 0x5b4   : > { %v10507_v19 = vadd.f32 %v4265_v47, %v4066_v9  ;;  %v4277_v22 = vpop.f32.mrf.mxu1 }
 0x5b5   : > { %v4068_v26 = vpop.f32.mrf.mxu0 }
 0x5b6   : > { %v10509_v41 = vadd.f32 %v4267_v48, %v4068_v26  ;;  %v4279_v46 = vpop.f32.mrf.mxu1 }
 0x5b7   : > { %v4072_v53 = vpop.f32.mrf.mxu0 }
 0x5b8   : > { %v10511_v62 = vadd.f32 %v4271_v38, %v4072_v53  ;;  %v4283_v60 = vpop.f32.mrf.mxu1 }
 0x5b9   : > { %v4074_v49 = vpop.f32.mrf.mxu0 }
 0x5ba   : > { %v10513_v28 = vadd.f32 %v4273_v34, %v4074_v49  ;;  %v4285_v23 = vpop.f32.mrf.mxu1 }
 0x5bb   : > { %v4078_v44 = vpop.f32.mrf.mxu0 }
 0x5bc   : > { %v10515_v37 = vadd.f32 %v4277_v22, %v4078_v44  ;;  %v4289_v7 = vpop.f32.mrf.mxu1 }
 0x5bd   : > { %v4080_v50 = vpop.f32.mrf.mxu0 }
 0x5be   : > { %v10517_v2 = vadd.f32 %v4279_v46, %v4080_v50  ;;  %v4291_v24 = vpop.f32.mrf.mxu1 }
 0x5bf   : > { %v4084_v21 = vpop.f32.mrf.mxu0 }
 0x5c0   : > { %v10519_v57 = vadd.f32 %v4283_v60, %v4084_v21  ;;  %v4295_v59 = vpop.f32.mrf.mxu1 }
 0x5c1   : > { %v4086_v6 = vpop.f32.mrf.mxu0 }
 0x5c2   : > { %v10521_v11 = vadd.f32 %v4285_v23, %v4086_v6  ;;  %v4297_v1 = vpop.f32.mrf.mxu1 }
 0x5c3   : > { %v4090_v40 = vpop.f32.mrf.mxu0 }
 0x5c4   : > { %v10523_v3 = vadd.f32 %v4289_v7, %v4090_v40  ;;  %v10525_v18 = vpop.f32.mrf.mxu1 }
 0x5c5   : > { %v4092_v13 = vpop.f32.mrf.mxu0 }
 0x5c6   : > { %v10527_v5 = vadd.f32 %v4291_v24, %v4092_v13  ;;  %v10529_v10 = vpop.f32.mrf.mxu1 }
 0x5c7   : > { %v4096_v17 = vpop.f32.mrf.mxu0 }
 0x5c8   : > { %v10531_v30 = vadd.f32 %v4295_v59, %v4096_v17  ;;  %v4751_v27 = vpop.f32.mrf.mxu1 }
 0x5c9   : > { %v4098_v36 = vpop.f32.mrf.mxu0 }
 0x5ca   : > { %v10533_v4 = vadd.f32 %v4297_v1, %v4098_v36  ;;  %v4753_v32 = vpop.f32.mrf.mxu1 }
 0x5cb   : > { %v10535_v61 = vpop.f32.mrf.mxu0 }
 0x5cc   : > { %v4757_v25 = vpop.f32.mrf.mxu1 }
 0x5cd   : > { %v10537_v47 = vpop.f32.mrf.mxu0 }
 0x5ce   : > { %v4759_v52 = vpop.f32.mrf.mxu1 }
 0x5cf   : > { %v4465_v48 = vpop.f32.mrf.mxu0 }
 0x5d0   : > { %v4560_v55 = vadd.f32 %v4465_v48, %v10471_v16  ;;  %v4763_v38 = vpop.f32.mrf.mxu1 }
 0x5d1   : > { %v4467_v20 = vpop.f32.mrf.mxu0 }
 0x5d2   : > { %v4561_v34 = vadd.f32 %v4467_v20, %v10473_v35  ;;  %v10541_v9 = vadd.f32 %v4751_v27, %v4560_v55  ;;  %v4765_v22 = vpop.f32.mrf.mxu1 }
 0x5d3   : > { %v4471_v26 = vpop.f32.mrf.mxu0 }
 0x5d4   : > { %v4562_v46 = vadd.f32 %v4471_v26, %v10475_v8  ;;  %v10544_v53 = vadd.f32 %v4753_v32, %v4561_v34  ;;  %v4769_v44 = vpop.f32.mrf.mxu1 }
 0x5d5   : > { %v4473_v60 = vpop.f32.mrf.mxu0 }
 0x5d6   : > { %v4563_v49 = vadd.f32 %v4473_v60, %v10477_v43  ;;  %v10547_v23 = vadd.f32 %v4757_v25, %v4562_v46  ;;  %v4771_v59 = vpop.f32.mrf.mxu1 }
 0x5d7   : > { %v4477_v7 = vpop.f32.mrf.mxu0 }
 0x5d8   : > { %v4564_v16 = vadd.f32 %v4477_v7, %v10479_v29  ;;  %v10550_v50 = vadd.f32 %v4759_v52, %v4563_v49  ;;  %v4775_v17 = vpop.f32.mrf.mxu1 }
 0x5d9   : > { %v4479_v35 = vpop.f32.mrf.mxu0 }
 0x5da   : > { %v4565_v24 = vadd.f32 %v4479_v35, %v10481_v33  ;;  %v10553_v21 = vadd.f32 %v4763_v38, %v4564_v16  ;;  %v4777_v52 = vpop.f32.mrf.mxu1 }
 0x5db   : > { %v4483_v8 = vpop.f32.mrf.mxu0 }
 0x5dc   : > { %v4566_v6 = vadd.f32 %v4483_v8, %v10483_v45  ;;  %v10556_v1 = vadd.f32 %v4765_v22, %v4565_v24  ;;  %v10596_v16 = vpop.f32.mrf.mxu1 }
 0x5dd   : > { %v4485_v43 = vpop.f32.mrf.mxu0 }
 0x5de   : > { %v4567_v40 = vadd.f32 %v4485_v43, %v10485_v58  ;;  %v10559_v13 = vadd.f32 %v4769_v44, %v4566_v6  ;;  %v10604_v24 = vpop.f32.mrf.mxu1 }
 0x5df   : > { %v4489_v29 = vpop.f32.mrf.mxu0 }
 0x5e0   : > { %v4568_v27 = vadd.f32 %v4489_v29, %v10487_v15  ;;  %v10562_v36 = vadd.f32 %v4771_v59, %v4567_v40  ;;  %v10612_v6 = vpop.f32.mrf.mxu1 }
 0x5e1   : > { %v4491_v33 = vpop.f32.mrf.mxu0 }
 0x5e2   : > { %v4569_v32 = vadd.f32 %v4491_v33, %v10489_v42  ;;  %v10565_v25 = vadd.f32 %v4775_v17, %v4568_v27  ;;  %v10620_v17 = vpop.f32.mrf.mxu1 }
 0x5e3   : > { %v4495_v45 = vpop.f32.mrf.mxu0 }
 0x5e4   : > { %v10568_v48 = vadd.f32 %v4495_v45, %v10491_v63  ;;  %v10570_v55 = vadd.f32 %v4777_v52, %v4569_v32  ;;  %v10628_v33 = vpop.f32.mrf.mxu1 }
 0x5e5   : > { %v4497_v58 = vpop.f32.mrf.mxu0 }
 0x5e6   : > { %v10573_v38 = vadd.f32 %v4497_v58, %v10493_v31  ;;  %v10636_v45 = vpop.f32.mrf.mxu1 }
 0x5e7   : > { %v4501_v20 = vpop.f32.mrf.mxu0 }
 0x5e8   : > { %v10576_v15 = vadd.f32 %v4501_v20, %v10495_v14 }
 0x5e9   : > { %v4503_v34 = vpop.f32.mrf.mxu0 }
 0x5ea   : > { %v10579_v42 = vadd.f32 %v4503_v34, %v10497_v0  ;;  %v10645_v34 = vpop.f32.mrf.mxu1 }
 0x5eb   : > { %v4507_v22 = vpop.f32.mrf.mxu0 }
 0x5ec   : > { %v10582_v26 = vadd.f32 %v4507_v22, %v10499_v54 }
 0x5ed   : > { %v4509_v63 = vpop.f32.mrf.mxu0 }
 0x5ee   : > { %v10585_v46 = vadd.f32 %v4509_v63, %v10501_v39 }
 0x5ef   : > { %v4513_v60 = vpop.f32.mrf.mxu0 }
 0x5f0   : > { %v10588_v31 = vadd.f32 %v4513_v60, %v10503_v56 }
 0x5f1   : > { %v4515_v49 = vpop.f32.mrf.mxu0 }
 0x5f2   : > { %v10591_v14 = vadd.f32 %v4515_v49, %v10505_v12 }
 0x5f3   : > { %v4519_v44 = vpop.f32.mrf.mxu0 }
 0x5f4   : > { %v10594_v0 = vadd.f32 %v4519_v44, %v10507_v19 }
 0x5f5   : > { %v4521_v7 = vpop.f32.mrf.mxu0 }
 0x5f6   : > { %v10599_v54 = vadd.f32 %v4521_v7, %v10509_v41 }
 0x5f7   : > { %v4525_v39 = vpop.f32.mrf.mxu0 }
 0x5f8   : > { %v10602_v35 = vadd.f32 %v4525_v39, %v10511_v62 }
 0x5f9   : > { %v4527_v56 = vpop.f32.mrf.mxu0 }
 0x5fa   : > { %v10607_v12 = vadd.f32 %v4527_v56, %v10513_v28 }
 0x5fb   : > { %v4531_v59 = vpop.f32.mrf.mxu0 }
 0x5fc   : > { %v10610_v19 = vadd.f32 %v4531_v59, %v10515_v37 }
 0x5fd   : > { %v4533_v8 = vpop.f32.mrf.mxu0 }
 0x5fe   : > { %v10615_v41 = vadd.f32 %v4533_v8, %v10517_v2 }
 0x5ff   : > { %v4537_v43 = vpop.f32.mrf.mxu0 }
 0x600   : > { %v10618_v62 = vadd.f32 %v4537_v43, %v10519_v57 }
 0x601   : > { %v4539_v40 = vpop.f32.mrf.mxu0 }
 0x602   : > { %v10623_v28 = vadd.f32 %v4539_v40, %v10521_v11 }
 0x603   : > { %v4543_v29 = vpop.f32.mrf.mxu0 }
 0x604   : > { %v10626_v37 = vadd.f32 %v4543_v29, %v10523_v3  ;;  %v5163_v3 = vld [vmem:[#allocation5] sm:$0x3] }
 0x605   : > { %v4545_v27 = vpop.f32.mrf.mxu0 }
 0x606   : > { %v10631_v2 = vadd.f32 %v4545_v27, %v10527_v5  ;;  %v11621_v5 = vld [vmem:[#allocation112_spill] sm:$0xff] }
 0x607   : > { %v4549_v32 = vpop.f32.mrf.mxu0  ;;  %v11622_v63 = vsub.s32 0, %v11621_v5  ;;  %v11623_v44 = vsub.s32 1, %v11621_v5 }
 0x608   : > { %v10634_v57 = vadd.f32 %v4549_v32, %v10531_v30 }
 0x609   : > { %v4551_v52 = vpop.f32.mrf.mxu0  ;;  %v10649_v60 = vrot.slane %v5163_v3, %v11622_v63  ;;  %v10654_v7 = vrot.slane %v5163_v3, %v11623_v44 }
 0x60a   : > { %11618 = vst [vmem:[#allocation70_spill] sm:$0xff] %v10634_v57  ;;  %v10639_v11 = vadd.f32 %v4551_v52, %v10533_v4  ;;  %v10656_v4 = vpop.f32.mrf.mxu1  ;;  %v4856_v57 = vadd.f32 %v10596_v16, %v10568_v48 }
 0x60b   : > { %v10641_v58 = vpop.f32.mrf.mxu0 }
 0x60c   : > { %11619 = vst [vmem:[#allocation69_spill] sm:$0xff] %v10639_v11  ;;  %v10662_v29 = vpop.f32.mrf.mxu1 }
 0x60d   : > { %v10643_v20 = vpop.f32.mrf.mxu0 }
 0x60e   : > { %11620 = vst [vmem:[#allocation71_spill] sm:$0xff] %v10643_v20 }
 0x60f   : > { %v5036_v22 = vpop.f32.mrf.mxu0 }
 0x610   : > { %v5131_v30 = vadd.f32 %v5036_v22, %v10541_v9 }
 0x611   : > { %v5038_v49 = vpop.f32.mrf.mxu0 }
 0x612   : > { %v5132_v39 = vadd.f32 %v5038_v49, %v10544_v53  ;;  %v5175_v56 = vadd.f32 %v10649_v60, %v5131_v30  ;;  %v10668_v30 = vpop.f32.mrf.mxu1 }
 0x613   : > { %v5042_v59 = vpop.f32.mrf.mxu0 }
 0x614   : > { %v5133_v8 = vadd.f32 %v5042_v59, %v10547_v23  ;;  %v5176_v43 = vadd.f32 %v10654_v7, %v5132_v39  ;;  %v5207_v32 = vmax.f32 %v5175_v56, 0.0 }
 0x615   : > { %v5044_v40 = vpop.f32.mrf.mxu0 }
 0x616   : > { %v5177_v9 = vadd.f32 %v10649_v60, %v5133_v8  ;;  %v5134_v27 = vadd.f32 %v5044_v40, %v10550_v50  ;;  %v5208_v5 = vmax.f32 %v5176_v43, 0.0  ;;  %v5271_v59 = vrot.slane %v5207_v32, 1 }
 0x617   : > { %v5048_v52 = vpop.f32.mrf.mxu0 }
 0x618   : > { %v5209_v3 = vmax.f32 %v5177_v9, 0.0  ;;  %v5178_v22 = vadd.f32 %v10654_v7, %v5134_v27  ;;  %v5135_v53 = vadd.f32 %v5048_v52, %v10553_v21  ;;  %v5274_v27 = vrot.slane %v5208_v5, 1  ;;  %v10675_v52 = vpop.f32.mrf.mxu1 }
 0x619   : > { %v5050_v63 = vpop.f32.mrf.mxu0 }
 0x61a   : > { %v5272_v23 = vrot.slane %v5209_v3, 1  ;;  %v5210_v49 = vmax.f32 %v5178_v22, 0.0  ;;  %v5179_v44 = vadd.f32 %v10649_v60, %v5135_v53  ;;  %v5136_v39 = vadd.f32 %v5050_v63, %v10556_v1 }
 0x61b   : > { %v5054_v8 = vpop.f32.mrf.mxu0 }
 0x61c   : > { %v5275_v50 = vrot.slane %v5210_v49, 1  ;;  %v5211_v56 = vmax.f32 %v5179_v44, 0.0  ;;  %v5180_v40 = vadd.f32 %v10654_v7, %v5136_v39  ;;  %v5137_v9 = vadd.f32 %v5054_v8, %v10559_v13 }
 0x61d   : > { %v5056_v21 = vpop.f32.mrf.mxu0  ;;  %v5273_v43 = vsel %vm2914_vm1, %v5271_v59, %v5272_v23 }
 0x61e   : > { %v5277_v51 = vrot.slane %v5211_v56, 1  ;;  %v5212_v22 = vmax.f32 %v5180_v40, 0.0  ;;  %v5181_v53 = vadd.f32 %v10649_v60, %v5137_v9  ;;  %v5138_v1 = vadd.f32 %v5056_v21, %v10562_v36  ;;  %v10689_v36 = vpop.f32.mrf.mxu1 }
 0x61f   : > { %v5060_v63 = vpop.f32.mrf.mxu0  ;;  %v5276_v11 = vsel %vm2914_vm1, %v5274_v27, %v5275_v50  ;;  %v10680_v44 = vmax.f32 %v5207_v32, %v5273_v43 }
 0x620   : > { %v5279_v39 = vrot.slane %v5212_v22, 1  ;;  %v5213_v20 = vmax.f32 %v5181_v53, 0.0  ;;  %v5182_v13 = vadd.f32 %v10654_v7, %v5138_v1  ;;  %v5139_v8 = vadd.f32 %v5060_v63, %v10565_v25 }
 0x621   : > { %v5062_v59 = vpop.f32.mrf.mxu0  ;;  %v5278_v40 = vsel %vm2914_vm1, %v5272_v23, %v5277_v51  ;;  %v10687_v9 = vmax.f32 %v5208_v5, %v5276_v11  ;;  %v4857_v25 = vadd.f32 %v10604_v24, %v10573_v38 }
 0x622   : > { %v5281_v21 = vrot.slane %v5213_v20, 1  ;;  %v5214_v27 = vmax.f32 %v5182_v13, 0.0  ;;  %v5183_v32 = vadd.f32 %v10649_v60, %v5139_v8  ;;  %v5140_v43 = vadd.f32 %v5062_v59, %v10570_v55  ;;  %v10704_v59 = vpop.f32.mrf.mxu1 }
 0x623   : > { %v5066_v53 = vpop.f32.mrf.mxu0  ;;  %v5280_v1 = vsel %vm2914_vm1, %v5275_v50, %v5279_v39  ;;  %v10696_v63 = vmax.f32 %v5209_v3, %v5278_v40  ;;  %v4858_v13 = vadd.f32 %v10612_v6, %v10576_v15 }
 0x624   : > { %v5283_v48 = vrot.slane %v5214_v27, 1  ;;  %v5215_v16 = vmax.f32 %v5183_v32, 0.0  ;;  %v5184_v11 = vadd.f32 %v10654_v7, %v5140_v43  ;;  %v5141_v5 = vadd.f32 %v5066_v53, %v4856_v57 }
 0x625   : > { %v5068_v23 = vpop.f32.mrf.mxu0  ;;  %v5282_v8 = vsel %vm2914_vm1, %v5277_v51, %v5281_v21  ;;  %v10702_v55 = vmax.f32 %v5210_v49, %v5280_v1  ;;  %v4859_v32 = vadd.f32 %v10620_v17, %v10579_v42  ;;  %v4860_v1 = vadd.f32 %v10628_v33, %v10582_v26 }
 0x626   : > { %v5285_v38 = vrot.slane %v5215_v16, 1  ;;  %v5216_v24 = vmax.f32 %v5184_v11, 0.0  ;;  %v5185_v3 = vadd.f32 %v10649_v60, %v5141_v5  ;;  %v5142_v50 = vadd.f32 %v5068_v23, %v4857_v25  ;;  %v10718_v5 = vpop.f32.mrf.mxu1 }
 0x627   : > { %v5072_v40 = vpop.f32.mrf.mxu0  ;;  %v5284_v57 = vsel %vm2914_vm1, %v5279_v39, %v5283_v48  ;;  %v10710_v43 = vmax.f32 %v5211_v56, %v5282_v8  ;;  %v4861_v8 = vadd.f32 %v10636_v45, %v10585_v46 }
 0x628   : > { %v5287_v15 = vrot.slane %v5216_v24, 1  ;;  %v5217_v6 = vmax.f32 %v5185_v3, 0.0  ;;  %v5186_v51 = vadd.f32 %v10654_v7, %v5142_v50  ;;  %v5143_v49 = vadd.f32 %v5072_v40, %v4858_v13 }
 0x629   : > { %v5074_v53 = vpop.f32.mrf.mxu0  ;;  %v5286_v11 = vsel %vm2914_vm1, %v5281_v21, %v5285_v38  ;;  %v10716_v25 = vmax.f32 %v5212_v22, %v5284_v57  ;;  %v4862_v40 = vadd.f32 %v10645_v34, %v10588_v31 }
 0x62a   : > { %v5289_v42 = vrot.slane %v5217_v6, 1  ;;  %v5218_v17 = vmax.f32 %v5186_v51, 0.0  ;;  %v5187_v56 = vadd.f32 %v10649_v60, %v5143_v49  ;;  %v5144_v39 = vadd.f32 %v5074_v53, %v4859_v32  ;;  %v10732_v51 = vpop.f32.mrf.mxu1 }
 0x62b   : > { %v5078_v23 = vpop.f32.mrf.mxu0  ;;  %v5288_v13 = vsel %vm2914_vm1, %v5283_v48, %v5287_v15  ;;  %v10724_v3 = vmax.f32 %v5213_v20, %v5286_v11  ;;  %v4863_v53 = vadd.f32 %v10656_v4, %v10591_v14 }
 0x62c   : > { %v5291_v26 = vrot.slane %v5218_v17, 1  ;;  %v5219_v33 = vmax.f32 %v5187_v56, 0.0  ;;  %v5188_v22 = vadd.f32 %v10654_v7, %v5144_v39  ;;  %v5145_v21 = vadd.f32 %v5078_v23, %v4860_v1 }
 0x62d   : > { %v5080_v50 = vpop.f32.mrf.mxu0  ;;  %v5290_v57 = vsel %vm2914_vm1, %v5285_v38, %v5289_v42  ;;  %v10730_v32 = vmax.f32 %v5214_v27, %v5288_v13  ;;  %v4864_v39 = vadd.f32 %v10662_v29, %v10594_v0  ;;  %v4825_v13 = vpop.f32.mrf.mxu1 }
 0x62e   : > { %v5293_v46 = vrot.slane %v5219_v33, 1  ;;  %v5220_v45 = vmax.f32 %v5188_v22, 0.0  ;;  %v5189_v20 = vadd.f32 %v10649_v60, %v5145_v21  ;;  %v5146_v48 = vadd.f32 %v5080_v50, %v4861_v8 }
 0x62f   : > { %v5084_v49 = vpop.f32.mrf.mxu0  ;;  %v5292_v1 = vsel %vm2914_vm1, %v5287_v15, %v5291_v26  ;;  %v10738_v11 = vmax.f32 %v5215_v16, %v5290_v57  ;;  %v4865_v21 = vadd.f32 %v10668_v30, %v10599_v54 }
 0x630   : > { %v5295_v31 = vrot.slane %v5220_v45, 1  ;;  %v5221_v34 = vmax.f32 %v5189_v20, 0.0  ;;  %v5190_v27 = vadd.f32 %v10654_v7, %v5146_v48  ;;  %v5147_v38 = vadd.f32 %v5084_v49, %v4862_v40 }
 0x631   : > { %v5086_v56 = vpop.f32.mrf.mxu0  ;;  %v5294_v23 = vsel %vm2914_vm1, %v5289_v42, %v5293_v46  ;;  %v10744_v8 = vmax.f32 %v5216_v24, %v5292_v1  ;;  %v4866_v20 = vadd.f32 %v10675_v52, %v10602_v35 }
 0x632   : > { %v5297_v22 = vrot.slane %v5221_v34, 1  ;;  %v5222_v14 = vmax.f32 %v5190_v27, 0.0  ;;  %v5191_v4 = vadd.f32 %v10649_v60, %v5147_v38  ;;  %v5148_v16 = vadd.f32 %v5086_v56, %v4863_v53  ;;  %v4829_v53 = vpop.f32.mrf.mxu1 }
 0x633   : > { %v5090_v15 = vpop.f32.mrf.mxu0  ;;  %v5296_v50 = vsel %vm2914_vm1, %v5291_v26, %v5295_v31  ;;  %v10750_v40 = vmax.f32 %v5217_v6, %v5294_v23  ;;  %v4867_v27 = vadd.f32 %v10689_v36, %v10607_v12  ;;  %v4868_v23 = vadd.f32 %v10704_v59, %v10610_v19 }
 0x634   : > { %v5299_v57 = vrot.slane %v5222_v14, 1  ;;  %v5223_v0 = vmax.f32 %v5191_v4, 0.0  ;;  %v5192_v29 = vadd.f32 %v10654_v7, %v5148_v16  ;;  %v5149_v24 = vadd.f32 %v5090_v15, %v4864_v39  ;;  %v4831_v15 = vpop.f32.mrf.mxu1 }
 0x635   : > { %v5092_v42 = vpop.f32.mrf.mxu0  ;;  %v5298_v48 = vsel %vm2914_vm1, %v5293_v46, %v5297_v22  ;;  %v10756_v49 = vmax.f32 %v5218_v17, %v5296_v50  ;;  %v4869_v50 = vadd.f32 %v10718_v5, %v10615_v41 }
 0x636   : > { %v5301_v1 = vrot.slane %v5223_v0, 1  ;;  %v5224_v54 = vmax.f32 %v5192_v29, 0.0  ;;  %v5193_v30 = vadd.f32 %v10649_v60, %v5149_v24  ;;  %v5150_v6 = vadd.f32 %v5092_v42, %v4865_v21 }
 0x637   : > { %v5096_v26 = vpop.f32.mrf.mxu0  ;;  %v5300_v38 = vsel %vm2914_vm1, %v5295_v31, %v5299_v57  ;;  %v10762_v56 = vmax.f32 %v5219_v33, %v5298_v48 }
 0x638   : > { %v5303_v39 = vrot.slane %v5224_v54, 1  ;;  %v5225_v35 = vmax.f32 %v5193_v30, 0.0  ;;  %v5194_v52 = vadd.f32 %v10654_v7, %v5150_v6  ;;  %v5151_v17 = vadd.f32 %v5096_v26, %v4866_v20  ;;  %v4835_v6 = vpop.f32.mrf.mxu1 }
 0x639   : > { %v5098_v46 = vpop.f32.mrf.mxu0  ;;  %v5302_v4 = vsel %vm2914_vm1, %v5297_v22, %v5301_v1  ;;  %v10768_v16 = vmax.f32 %v5220_v45, %v5300_v38  ;;  %v4870_v20 = vadd.f32 %v10732_v51, %v10618_v62 }
 0x63a   : > { %v5305_v21 = vrot.slane %v5225_v35, 1  ;;  %v5226_v12 = vmax.f32 %v5194_v52, 0.0  ;;  %v5195_v36 = vadd.f32 %v10649_v60, %v5151_v17  ;;  %v5152_v33 = vadd.f32 %v5098_v46, %v4867_v27 }
 0x63b   : > { %v5102_v31 = vpop.f32.mrf.mxu0  ;;  %v5304_v29 = vsel %vm2914_vm1, %v5299_v57, %v5303_v39  ;;  %v10774_v24 = vmax.f32 %v5221_v34, %v5302_v4  ;;  %v4871_v27 = vadd.f32 %v4825_v13, %v10623_v28  ;;  %v4837_v28 = vpop.f32.mrf.mxu1 }
 0x63c   : > { %v5307_v42 = vrot.slane %v5226_v12, 1  ;;  %v5227_v19 = vmax.f32 %v5195_v36, 0.0  ;;  %v5196_v59 = vadd.f32 %v10654_v7, %v5152_v33  ;;  %v5153_v45 = vadd.f32 %v5102_v31, %v4868_v23 }
 0x63d   : > { %v5104_v22 = vpop.f32.mrf.mxu0  ;;  %v5306_v48 = vsel %vm2914_vm1, %v5301_v1, %v5305_v21  ;;  %v10780_v30 = vmax.f32 %v5222_v14, %v5304_v29  ;;  %v4302_v14 = vadd.f32 %v10525_v18, %v10535_v61  ;;  %v4872_v23 = vadd.f32 %v4829_v53, %v10626_v37 }
 0x63e   : > { %v5309_v26 = vrot.slane %v5227_v19, 1  ;;  %v5228_v41 = vmax.f32 %v5196_v59, 0.0  ;;  %v5197_v5 = vadd.f32 %v10649_v60, %v5153_v45  ;;  %v5154_v34 = vadd.f32 %v5104_v22, %v4869_v50  ;;  %v11624_v22 = vld [vmem:[#allocation70_spill] sm:$0xff] }
 0x63f   : > { %v5108_v57 = vpop.f32.mrf.mxu0  ;;  %v5308_v38 = vsel %vm2914_vm1, %v5303_v39, %v5307_v42  ;;  %v10785_v52 = vmax.f32 %v5223_v0, %v5306_v48  ;;  %v4304_v31 = vadd.f32 %v10529_v10, %v10537_v47  ;;  %v4873_v29 = vadd.f32 %v4831_v15, %v10631_v2  ;;  %v4841_v47 = vpop.f32.mrf.mxu1 }
 0x640   : > { %v5311_v17 = vrot.slane %v5228_v41, 1  ;;  %v5229_v46 = vmax.f32 %v5197_v5, 0.0  ;;  %v5198_v62 = vadd.f32 %v10654_v7, %v5154_v34  ;;  %v5155_v51 = vadd.f32 %v5108_v57, %v4870_v20  ;;  %v11625_v5 = vld [vmem:[#allocation71_spill] sm:$0xff] }
 0x641   : > { %v5110_v1 = vpop.f32.mrf.mxu0  ;;  %v5310_v4 = vsel %vm2914_vm1, %v5305_v21, %v5309_v26  ;;  %v10792_v36 = vmax.f32 %v5224_v54, %v5308_v38  ;;  %v4590_v59 = vadd.f32 %v10641_v58, %v4302_v14  ;;  %v4874_v20 = vadd.f32 %v4835_v6, %v11624_v22 }
 0x642   : > { %v5313_v13 = vrot.slane %v5229_v46, 1  ;;  %v5230_v39 = vmax.f32 %v5198_v62, 0.0  ;;  %v5199_v0 = vadd.f32 %v10649_v60, %v5155_v51  ;;  %v5156_v33 = vadd.f32 %v5110_v1, %v4871_v27  ;;  %v11626_v27 = vld [vmem:[#allocation69_spill] sm:$0xff] }
 0x643   : > { %v5114_v50 = vpop.f32.mrf.mxu0  ;;  %v5312_v18 = vsel %vm2914_vm1, %v5307_v42, %v5311_v17  ;;  %v10799_v61 = vmax.f32 %v5225_v35, %v5310_v4  ;;  %v4591_v34 = vadd.f32 %v11625_v5, %v4304_v31  ;;  %v4875_v38 = vadd.f32 %v4837_v28, %v11626_v27 }
 0x644   : > { %v5315_v37 = vrot.slane %v5230_v39, 1  ;;  %v5231_v53 = vmax.f32 %v5199_v0, 0.0  ;;  %v5200_v54 = vadd.f32 %v10654_v7, %v5156_v33  ;;  %v5157_v21 = vadd.f32 %v5114_v50, %v4872_v23  ;;  %v4843_v0 = vpop.f32.mrf.mxu1 }
 0x645   : > { %v5116_v45 = vpop.f32.mrf.mxu0  ;;  %v5314_v48 = vsel %vm2914_vm1, %v5309_v26, %v5313_v13  ;;  %v10805_v10 = vmax.f32 %v5226_v12, %v5312_v18  ;;  %v4876_v1 = vadd.f32 %v4841_v47, %v4590_v59  ;;  %v4877_v18 = vadd.f32 %v4843_v0, %v4591_v34 }
 0x646   : > { %v5317_v2 = vrot.slane %v5231_v53, 1  ;;  %v5232_v15 = vmax.f32 %v5200_v54, 0.0  ;;  %v5201_v35 = vadd.f32 %v10649_v60, %v5157_v21  ;;  %v5158_v42 = vadd.f32 %v5116_v45, %v4873_v29 }
 0x647   : > { %v5120_v57 = vpop.f32.mrf.mxu0  ;;  %v5316_v58 = vsel %vm2914_vm1, %v5311_v17, %v5315_v37  ;;  %v5385_v62 = vmax.f32 %v5227_v19, %v5314_v48 }
 0x648   : > { %v5319_v51 = vrot.slane %v5232_v15, 1  ;;  %v5233_v6 = vmax.f32 %v5201_v35, 0.0  ;;  %v5202_v26 = vadd.f32 %v10654_v7, %v5158_v42  ;;  %v5159_v12 = vadd.f32 %v5120_v57, %v4874_v20 }
 0x649   : > { %v5122_v14 = vpop.f32.mrf.mxu0  ;;  %v5318_v23 = vsel %vm2914_vm1, %v5313_v13, %v5317_v2  ;;  %v5386_v4 = vmax.f32 %v5228_v41, %v5316_v58 }
 0x64a   : > { %v5321_v33 = vrot.slane %v5233_v6, 1  ;;  %v5234_v50 = vmax.f32 %v5202_v26, 0.0  ;;  %v5203_v31 = vadd.f32 %v10649_v60, %v5159_v12  ;;  %v5160_v29 = vadd.f32 %v5122_v14, %v4875_v38 }
 0x64b   : > { %v5126_v28 = vpop.f32.mrf.mxu0  ;;  %v5320_v19 = vsel %vm2914_vm1, %v5315_v37, %v5319_v51  ;;  %v5387_v17 = vmax.f32 %v5229_v46, %v5318_v23 }
 0x64c   : > { %v5323_v54 = vrot.slane %v5234_v50, 1  ;;  %v5235_v21 = vmax.f32 %v5203_v31, 0.0  ;;  %v5204_v45 = vadd.f32 %v10654_v7, %v5160_v29  ;;  %v5161_v22 = vadd.f32 %v5126_v28, %v4876_v1  ;;  %v6880_v28 = vld [vmem:[%s11350_s9 + $0x98] sm:$0xff] }
 0x64d   : > { %v5128_v59 = vpop.f32.mrf.mxu0  ;;  %v5322_v13 = vsel %vm2914_vm1, %v5317_v2, %v5321_v33  ;;  %v5388_v41 = vmax.f32 %v5230_v39, %v5320_v19  ;;  %7031 = vmatpush3.msra.mxu0 %v6880_v28  ;;  %v6899_v28 = vld [vmem:[%s11350_s9 + $0x120] sm:$0xff] }
 0x64e   : > { %v5325_v20 = vrot.slane %v5235_v21, 1  ;;  %v5236_v48 = vmax.f32 %v5204_v45, 0.0  ;;  %v5205_v47 = vadd.f32 %v10649_v60, %v5161_v22  ;;  %v5162_v35 = vadd.f32 %v5128_v59, %v4877_v18  ;;  %v6879_v18 = vld [vmem:[%s11350_s9 + $0x90] sm:$0xff]  ;;  %v6876_v22 = vld [vmem:[%s11350_s9 + $0x78] sm:$0xff] }
 0x64f   : > { %v5324_v42 = vsel %vm2914_vm1, %v5319_v51, %v5323_v54  ;;  %v5389_v5 = vmax.f32 %v5231_v53, %v5322_v13  ;;  %v6875_v13 = vld [vmem:[%s11350_s9 + $0x70] sm:$0xff] }
 0x650   : > { %v5327_v34 = vrot.slane %v5236_v48, 1  ;;  %v5237_v37 = vmax.f32 %v5205_v47, 0.0  ;;  %v5206_v46 = vadd.f32 %v10654_v7, %v5162_v35  ;;  %v5326_v57 = vsel %vm2914_vm1, %v5321_v33, %v5325_v20  ;;  %v5397_v7 = vld [vmem:[#allocation7] sm:$0xff] }
 0x651   : > { %v5391_v27 = vmax.f32 %v5233_v6, %v5326_v57  ;;  %v5390_v38 = vmax.f32 %v5232_v15, %v5324_v42  ;;  %v5574_v15 = vld [vmem:[%s11349_s8] sm:$0xff] }
 0x652   : > { %v5329_v58 = vrot.slane %v5237_v37, 1  ;;  %v5238_v26 = vmax.f32 %v5206_v46, 0.0  ;;  %v5328_v39 = vsel %vm2914_vm1, %v5323_v54, %v5327_v34  ;;  %v5590_v6 = vld [vmem:[%s11349_s8 + $0x80] sm:$0xff] }
 0x653   : > { %v5392_v2 = vmax.f32 %v5234_v50, %v5328_v39  ;;  %v5707_v57 = vld [vmem:[%s11350_s9 + $0x40] sm:$0xff]  ;;  %v5706_v39 = vld [vmem:[%s11350_s9 + $0x38] sm:$0xff] }
 0x654   : > { %v5331_v12 = vrot.slane %v5238_v26, 1  ;;  %v5330_v60 = vsel %vm2914_vm1, %v5325_v20, %v5329_v58  ;;  %v5395_v51 = vmax.f32 %v5237_v37, %v5329_v58  ;;  %v6873_v20 = vld [vmem:[%s11350_s9 + $0x60] sm:$0xff]  ;;  %v5708_v37 = vld [vmem:[%s11350_s9 + $0x48] sm:$0xff] }
 0x655   : > { %v5393_v14 = vmax.f32 %v5235_v21, %v5330_v60  ;;  %v6877_v21 = vld [vmem:[%s11350_s9 + $0x80] sm:$0xff] }
 0x656   : > { %v5396_v1 = vmax.f32 %v5238_v26, %v5331_v12  ;;  %v5332_v53 = vsel %vm2914_vm1, %v5327_v34, %v5331_v12  ;;  %v5705_v12 = vld [vmem:[%s11350_s9 + $0x30] sm:$0xff] }
 0x657   : > { %v5394_v23 = vmax.f32 %v5236_v48, %v5332_v53 }
 0x658   : > { %6857 = vmatprep.subr.msk.mxu1 %vm3250_vm3, %v5396_v1 }
 0x659   : > { %6858 = vmatpush1.msk.msra.mxu1 %vm3250_vm3, %v5395_v51  ;;  %v5704_v51 = vld [vmem:[%s11350_s9 + $0x28] sm:$0xff] }
 0x65a   : > { %5425 = vmatprep.subr.mxu1 %v5394_v23 }
 0x65b   : > { %5426 = vmatpush1.msra.mxu1 %v5393_v14 }
 0x65c   : > { %5427 = vmatprep.subr.mxu1 %v5392_v2 }
 0x65d   : > { %5428 = vmatpush1.msra.mxu1 %v5391_v27 }
 0x65e   : > { %5429 = vmatprep.subr.mxu1 %v5390_v38 }
 0x65f   : > { %5430 = vmatpush1.msra.mxu1 %v5389_v5 }
 0x660   : > { %5431 = vmatprep.subr.mxu1 %v5388_v41  ;;  %v6874_v41 = vld [vmem:[%s11350_s9 + $0x68] sm:$0xff] }
 0x661   : > { %5432 = vmatpush1.msra.mxu1 %v5387_v17  ;;  %v6878_v17 = vld [vmem:[%s11350_s9 + $0x88] sm:$0xff] }
 0x662   : > { %5433 = vmatprep.subr.mxu1 %v5386_v4 }
 0x663   : > { %5434 = vmatpush1.msra.mxu1 %v5385_v62  ;;  %v5591_v62 = vld [vmem:[%s11349_s8 + $0x88] sm:$0xff] }
 0x664   : > { %5435 = vmatprep.subr.mxu1 %v10805_v10  ;;  %v5575_v10 = vld [vmem:[%s11349_s8 + $0x8] sm:$0xff] }
 0x665   : > { %5436 = vmatpush1.msra.mxu1 %v10799_v61  ;;  %v5576_v61 = vld [vmem:[%s11349_s8 + $0x10] sm:$0xff] }
 0x666   : > { %5437 = vmatprep.subr.mxu1 %v10792_v36  ;;  %v5577_v36 = vld [vmem:[%s11349_s8 + $0x18] sm:$0xff] }
 0x667   : > { %5438 = vmatpush1.msra.mxu1 %v10785_v52  ;;  %v5578_v52 = vld [vmem:[%s11349_s8 + $0x20] sm:$0xff] }
 0x668   : > { %5439 = vmatprep.subr.mxu1 %v10780_v30  ;;  %v5579_v30 = vld [vmem:[%s11349_s8 + $0x28] sm:$0xff] }
 0x669   : > { %5440 = vmatpush1.msra.mxu1 %v10774_v24  ;;  %v5580_v24 = vld [vmem:[%s11349_s8 + $0x30] sm:$0xff] }
 0x66a   : > { %5441 = vmatprep.subr.mxu1 %v10768_v16  ;;  %v5581_v16 = vld [vmem:[%s11349_s8 + $0x38] sm:$0xff] }
 0x66b   : > { %5442 = vmatpush1.msra.mxu1 %v10762_v56  ;;  %v5582_v56 = vld [vmem:[%s11349_s8 + $0x40] sm:$0xff] }
 0x66c   : > { %5443 = vmatprep.subr.mxu1 %v10756_v49  ;;  %v5583_v49 = vld [vmem:[%s11349_s8 + $0x48] sm:$0xff] }
 0x66d   : > { %5444 = vmatpush1.msra.mxu1 %v10750_v40  ;;  %v5584_v40 = vld [vmem:[%s11349_s8 + $0x50] sm:$0xff] }
 0x66e   : > { %5445 = vmatprep.subr.mxu1 %v10744_v8  ;;  %v5585_v8 = vld [vmem:[%s11349_s8 + $0x58] sm:$0xff] }
 0x66f   : > { %5446 = vmatpush1.msra.mxu1 %v10738_v11  ;;  %v11627_v11 = vmov 0.0  }
 0x670   : > { %5447 = vmatprep.subr.mxu1 %v10730_v32  ;;  %v5586_v32 = vld [vmem:[%s11349_s8 + $0x60] sm:$0xff]  ;;  %7032 = vmatprep.subr.mxu0 %v11627_v11 }
 0x671   : > { %5448 = vmatpush1.msra.mxu1 %v10724_v3  ;;  %v5398_v3 = vld [vmem:[#allocation7 + $0x8] sm:$0xff]  ;;  %7033 = vmatpush3.msra.mxu0 %v6879_v18 }
 0x672   : > { %5449 = vmatprep.subr.mxu1 %v10716_v25  ;;  %v5587_v25 = vld [vmem:[%s11349_s8 + $0x68] sm:$0xff]  ;;  %7034 = vmatprep.subr.mxu0 %v11627_v11 }
 0x673   : > { %5450 = vmatpush1.msra.mxu1 %v10710_v43  ;;  %v5399_v43 = vld [vmem:[#allocation7 + $0x10] sm:$0xff]  ;;  %7035 = vmatpush3.msra.mxu0 %v6878_v17 }
 0x674   : > { %5451 = vmatprep.subr.mxu1 %v10702_v55  ;;  %v5588_v55 = vld [vmem:[%s11349_s8 + $0x70] sm:$0xff]  ;;  %7036 = vmatprep.subr.mxu0 %v11627_v11  ;;  %v6898_v17 = vld [vmem:[%s11350_s9 + $0x118] sm:$0xff] }
 0x675   : > { %5452 = vmatpush1.msra.mxu1 %v10696_v63  ;;  %v5400_v63 = vld [vmem:[#allocation7 + $0x18] sm:$0xff]  ;;  %7037 = vmatpush3.msra.mxu0 %v6877_v21  ;;  %v6884_v21 = vld [vmem:[%s11350_s9 + $0xb0] sm:$0xff] }
 0x676   : > { %5453 = vmatprep.subr.mxu1 %v10687_v9  ;;  %v5589_v9 = vld [vmem:[%s11349_s8 + $0x78] sm:$0xff]  ;;  %7038 = vmatprep.subr.mxu0 %v11627_v11 }
 0x677   : > { %5454 = vmatpush1.msra.mxu1 %v10680_v44  ;;  %v5401_v44 = vld [vmem:[#allocation7 + $0x20] sm:$0xff]  ;;  %7039 = vmatpush3.msra.mxu0 %v6876_v22 }
 0x678   : > { %6859 = vmatmul.mubr.msk.f32.vlgmr.msra.gmra.mxu1 %vm3201_vm2, %v5397_v7  ;;  %5608 = vmatprep.subr.mxu1 %v11627_v11  ;;  %v5703_v7 = vld [vmem:[%s11350_s9 + $0x20] sm:$0xff] }
 0x679   : > { %5493 = vmatprep.mubr.f32.mxu1 %v11627_v11  ;;  %5609 = vmatpush1.msra.mxu1 %v5589_v9  ;;  %v5702_v9 = vld [vmem:[%s11350_s9 + $0x18] sm:$0xff] }
 0x67a   : > { %5610 = vmatprep.subr.mxu1 %v11627_v11  ;;  %7040 = vmatprep.subr.mxu0 %v11627_v11 }
 0x67b   : > { %5611 = vmatpush1.msra.mxu1 %v5588_v55  ;;  %7041 = vmatpush3.msra.mxu0 %v6875_v13  ;;  %v6896_v13 = vld [vmem:[%s11350_s9 + $0x108] sm:$0xff] }
 0x67c   : > { %6860 = vmatmul.mubr.msk.f32.gmra.mxu1 %vm3201_vm2, %v5398_v3  ;;  %5612 = vmatprep.subr.mxu1 %v11627_v11 }
 0x67d   : > { %5499 = vmatprep.mubr.f32.mxu1 %v11627_v11  ;;  %5613 = vmatpush1.msra.mxu1 %v5587_v25  ;;  %v5701_v25 = vld [vmem:[%s11350_s9 + $0x10] sm:$0xff] }
 0x67e   : > { %5614 = vmatprep.subr.mxu1 %v11627_v11  ;;  %7042 = vmatprep.subr.mxu0 %v11627_v11 }
 0x67f   : > { %5615 = vmatpush1.msra.mxu1 %v5586_v32  ;;  %7043 = vmatpush3.msra.mxu0 %v6874_v41 }
 0x680   : > { %6861 = vmatmul.mubr.msk.f32.gmra.mxu1 %vm3201_vm2, %v5399_v43  ;;  %5616 = vmatprep.subr.mxu1 %v11627_v11 }
 0x681   : > { %5505 = vmatprep.mubr.f32.mxu1 %v11627_v11  ;;  %5617 = vmatpush1.msra.mxu1 %v5585_v8 }
 0x682   : > { %5618 = vmatprep.subr.mxu1 %v11627_v11  ;;  %7044 = vmatprep.subr.mxu0 %v11627_v11 }
 0x683   : > { %5619 = vmatpush1.msra.mxu1 %v5584_v40  ;;  %7045 = vmatpush3.msra.mxu0 %v6873_v20  ;;  %v6882_v20 = vld [vmem:[%s11350_s9 + $0xa0] sm:$0xff] }
 0x684   : > { %6862 = vmatmul.mubr.msk.f32.gmra.mxu1 %vm3201_vm2, %v5400_v63  ;;  %5620 = vmatprep.subr.mxu1 %v11627_v11 }
 0x685   : > { %5511 = vmatprep.mubr.f32.mxu1 %v11627_v11  ;;  %5621 = vmatpush1.msra.mxu1 %v5583_v49  ;;  %v5700_v49 = vld [vmem:[%s11350_s9 + $0x8] sm:$0xff] }
 0x686   : > { %5622 = vmatprep.subr.mxu1 %v11627_v11  ;;  %7046 = vmatprep.subr.mxu0 %v11627_v11 }
 0x687   : > { %5623 = vmatpush1.msra.mxu1 %v5582_v56  ;;  %v5699_v56 = vld [vmem:[%s11350_s9] sm:$0xff]  ;;  %7050 = vmatprep.mubr.msk.f32.mxu0 %vm7453_vm13, %v11627_v11 }
 0x688   : > { %6863 = vmatmul.mubr.msk.f32.gmra.mxu1 %vm3201_vm2, %v5401_v44  ;;  %5624 = vmatprep.subr.mxu1 %v11627_v11 }
 0x689   : > { %5625 = vmatpush1.msra.mxu1 %v5581_v16  ;;  %v6872_v16 = vld [vmem:[%s11350_s9 + $0x58] sm:$0xff] }
 0x68a   : > { %5626 = vmatprep.subr.mxu1 %v11627_v11  ;;  %7047 = vmatpush3.msra.mxu0 %v6872_v16  ;;  %v6232_v16 = vld [vmem:[%s11354_s13 + $0x20] sm:$0xff] }
 0x68b   : > { %5627 = vmatpush1.msra.mxu1 %v5580_v24  ;;  %7048 = vmatprep.subr.mxu0 %v11627_v11  ;;  %v6871_v24 = vld [vmem:[%s11350_s9 + $0x50] sm:$0xff] }
 0x68c   : > { %5628 = vmatprep.subr.mxu1 %v11627_v11  ;;  %7049 = vmatpush3.msra.mxu0 %v6871_v24  ;;  %v6231_v24 = vld [vmem:[%s11354_s13 + $0x18] sm:$0xff] }
 0x68d   : > { %5629 = vmatpush1.msra.mxu1 %v5579_v30  ;;  %7076 = vmatprep.subr.mxu0 %v11627_v11  ;;  %v6891_v30 = vld [vmem:[%s11350_s9 + $0xe8] sm:$0xff] }
 0x68e   : > { %5630 = vmatprep.subr.mxu1 %v11627_v11 }
 0x68f   : > { %5631 = vmatpush1.msra.mxu1 %v5578_v52 }
 0x690   : > { %5632 = vmatprep.subr.mxu1 %v11627_v11 }
 0x691   : > { %5633 = vmatpush1.msra.mxu1 %v5577_v36  ;;  %v6890_v36 = vld [vmem:[%s11350_s9 + $0xe0] sm:$0xff] }
 0x692   : > { %5634 = vmatprep.subr.mxu1 %v11627_v11 }
 0x693   : > { %5635 = vmatpush1.msra.mxu1 %v5576_v61 }
 0x694   : > { %5636 = vmatprep.subr.mxu1 %v11627_v11 }
 0x695   : > { %5637 = vmatpush1.msra.mxu1 %v5575_v10  ;;  %v6889_v10 = vld [vmem:[%s11350_s9 + $0xd8] sm:$0xff] }
 0x696   : > { %5638 = vmatprep.subr.mxu1 %v11627_v11 }
 0x697   : > { %5639 = vmatpush1.msra.mxu1 %v5574_v15  ;;  %v6902_v15 = vld [vmem:[%s11350_s9 + $0x138] sm:$0xff] }
 0x698   : > { %5668 = vmatprep.subr.mxu1 %v11627_v11 }
 0x699   : > { %5669 = vmatpush2.msra.mxu1 %v5591_v62 }
 0x69a   : > { %5670 = vmatprep.subr.mxu1 %v11627_v11 }
 0x69b   : > { %5671 = vmatpush2.msra.mxu1 %v5590_v6  ;;  %v6888_v6 = vld [vmem:[%s11350_s9 + $0xd0] sm:$0xff] }
 0x69c   : > { %7007 = vmatprep.subr.mxu1 %v11627_v11 }
 0x738   : > { %v5489_v4 = vpop.f32.mrf.mxu1 }
 0x739   : > { %5528 = vrot.lane.b32.xlu0 %v5489_v4, %s7452_s6 }
 0x73a   : > { %v5491_v0 = vpop.f32.mrf.mxu1 }
 0x73b   : > { %5530 = vrot.lane.b32.xlu1 %v5491_v0, %s7452_s6 }
 0x73c   : > { %v5495_v33 = vpop.f32.mrf.mxu1 }
 0x73d   : > { %5532 = vrot.lane.b32.xlu0 %v5495_v33, %s7452_s6 }
 0x73e   : > { %v5497_v50 = vpop.f32.mrf.mxu1 }
 0x73f   : > { %5534 = vrot.lane.b32.xlu1 %v5497_v50, %s7452_s6 }
 0x740   : > { %v10932_v31 = vpop.f32.mrf.mxu1 }
 0x741   : > { %5536 = vrot.lane.b32.xlu0 %v10932_v31, %s7452_s6 }
 0x742   : > { %v10936_v29 = vpop.f32.mrf.mxu1 }
 0x743   : > { %5538 = vrot.lane.b32.xlu1 %v10936_v29, %s7452_s6 }
 0x744   : > { %v10946_v19 = vpop.f32.mrf.mxu1 }
 0x745   : > { %5540 = vrot.lane.b32.xlu0 %v10946_v19, %s7452_s6 }
 0x746   : > { %v10954_v54 = vpop.f32.mrf.mxu1 }
 0x747   : > { %5542 = vrot.lane.b32.xlu1 %v10954_v54, %s7452_s6 }
 0x748   : > { %v10962_v45 = vpop.f32.mrf.mxu1 }
 0x749   : > { %5544 = vrot.lane.b32.xlu0 %v10962_v45, %s7452_s6 }
 0x74a   : > { %v10970_v59 = vpop.f32.mrf.mxu1 }
 0x74b   : > { %5546 = vrot.lane.b32.xlu1 %v10970_v59, %s7452_s6  ;;  %s6337_s6 = sshll.u32 %s541_s26, 4  ;;  %s6338_s6 = int_to_ptr.vmem [resolvable:$true] %s6337_s6 }
 0x74c   : > { %s7370_s24 = scalar_lea.vmem %s6338_s6, 128  ;;  %p7377_p2 = scmp.lt.s32.totalorder %s6338_s6, %s7375_s22 }
 0x74d   : > { %p7371_p8 = scmp.ne.s32.totalorder %s6338_s6, %s7370_s24  ;;  %p7378_p9 = scmp.lt.s32.totalorder %s7376_s25, %s7370_s24 }
 0x74f   : > { %p7372_p0 = pnand %p7371_p8, %p11628_p11  ;;  %p7379_p3 = por %p7378_p9, %p7377_p2 }
 0x751   : > { %p7373_p1 = pneg %p7372_p0 }
 0x753   : > { %p7380_p4 = pnand %p7379_p3, %p7373_p1 }
 0x7ab   : > { %v5529_v48 = vpop.permute.xlu0 %5528 }
 0x7ad   : > { %v5531_v47 = vpop.permute.xlu1 %5530 }
 0x7ae   : > { %v5549_v35 = vsel %vm5548_vm11, %v5529_v48, %v5531_v47  ;;  %v5565_v42 = vmax.f32 %v5491_v0, %v5531_v47  ;;  %v6895_v48 = vld [vmem:[%s11350_s9 + $0x100] sm:$0xff] }
 0x7af   : > { %v5564_v5 = vmax.f32 %v5489_v4, %v5549_v35  ;;  %v5533_v34 = vpop.permute.xlu0 %5532  ;;  %v6901_v4 = vld [vmem:[%s11350_s9 + $0x130] sm:$0xff]  ;;  %v6894_v35 = vld [vmem:[%s11350_s9 + $0xf8] sm:$0xff] }
 0x7b0   : > { %6864 = vmatprep.mubr.msk.f32.mxu1 %vm5592_vm12, %v5565_v42  ;;  %v6913_v42 = vld [vmem:[%s11350_s9 + $0x188] sm:$0xff] }
 0x7b1   : > { %5673 = vmatmul.mubr.f32.vlgmr.msra.gmra.mxu1 %v5564_v5  ;;  %v5535_v46 = vpop.permute.xlu1 %5534  ;;  %v6893_v5 = vld [vmem:[%s11350_s9 + $0xf0] sm:$0xff] }
 0x7b2   : > { %v5550_v27 = vsel %vm5548_vm11, %v5533_v34, %v5535_v46  ;;  %v5567_v38 = vmax.f32 %v5497_v50, %v5535_v46  ;;  %7008 = vmatpush3.msra.mxu1 %v5708_v37  ;;  %v6900_v50 = vld [vmem:[%s11350_s9 + $0x128] sm:$0xff]  ;;  %v6912_v34 = vld [vmem:[%s11350_s9 + $0x180] sm:$0xff]  ;;  %v6911_v37 = vld [vmem:[%s11350_s9 + $0x178] sm:$0xff] }
 0x7b3   : > { %v5566_v58 = vmax.f32 %v5495_v33, %v5550_v27  ;;  %v5537_v26 = vpop.permute.xlu0 %5536  ;;  %7009 = vmatprep.subr.mxu1 %v11627_v11  ;;  %v6887_v33 = vld [vmem:[%s11350_s9 + $0xc8] sm:$0xff]  ;;  %v6910_v46 = vld [vmem:[%s11350_s9 + $0x170] sm:$0xff]  ;;  %v6908_v27 = vld [vmem:[%s11350_s9 + $0x160] sm:$0xff] }
 0x7b4   : > { %6865 = vmatprep.mubr.msk.f32.mxu1 %vm5592_vm12, %v5567_v38  ;;  %7010 = vmatpush3.msra.mxu1 %v5707_v57  ;;  %v6909_v57 = vld [vmem:[%s11350_s9 + $0x168] sm:$0xff]  ;;  %v6907_v38 = vld [vmem:[%s11350_s9 + $0x158] sm:$0xff] }
 0x7b5   : > { %5678 = vmatmul.mubr.f32.gmra.mxu1 %v5566_v58  ;;  %v5539_v2 = vpop.permute.xlu1 %5538  ;;  %7011 = vmatprep.subr.mxu1 %v11627_v11  ;;  %v6906_v58 = vld [vmem:[%s11350_s9 + $0x150] sm:$0xff] }
 0x7b6   : > { %v5551_v60 = vsel %vm5548_vm11, %v5537_v26, %v5539_v2  ;;  %v5569_v14 = vmax.f32 %v10936_v29, %v5539_v2  ;;  %7012 = vmatpush3.msra.mxu1 %v5706_v39  ;;  %v6886_v29 = vld [vmem:[%s11350_s9 + $0xc0] sm:$0xff]  ;;  %v6905_v26 = vld [vmem:[%s11350_s9 + $0x148] sm:$0xff]  ;;  %v6145_v2 = vld [vmem:[%s11352_s11 + $0x70] sm:$0xff] }
 0x7b7   : > { %v5568_v1 = vmax.f32 %v10932_v31, %v5551_v60  ;;  %v5541_v53 = vpop.permute.xlu0 %5540  ;;  %7013 = vmatprep.subr.mxu1 %v11627_v11  ;;  %v6904_v39 = vld [vmem:[%s11350_s9 + $0x140] sm:$0xff] }
 0x7b8   : > { %6866 = vmatprep.mubr.msk.f32.mxu1 %vm5592_vm12, %v5569_v14  ;;  %7014 = vmatpush3.msra.mxu1 %v5705_v12  ;;  %v6144_v12 = vld [vmem:[%s11352_s11 + $0x68] sm:$0xff]  ;;  %v6143_v60 = vld [vmem:[%s11352_s11 + $0x60] sm:$0xff]  ;;  %v6142_v14 = vld [vmem:[%s11352_s11 + $0x58] sm:$0xff] }
 0x7b9   : > { %5683 = vmatmul.mubr.f32.gmra.mxu1 %v5568_v1  ;;  %v5543_v23 = vpop.permute.xlu1 %5542  ;;  %7015 = vmatprep.subr.mxu1 %v11627_v11  ;;  %v6141_v1 = vld [vmem:[%s11352_s11 + $0x50] sm:$0xff] }
 0x7ba   : > { %v5552_v3 = vsel %vm5548_vm11, %v5541_v53, %v5543_v23  ;;  %v5571_v43 = vmax.f32 %v10954_v54, %v5543_v23  ;;  %7016 = vmatpush3.msra.mxu1 %v5704_v51  ;;  %v6140_v53 = vld [vmem:[%s11352_s11 + $0x48] sm:$0xff]  ;;  %v6139_v51 = vld [vmem:[%s11352_s11 + $0x40] sm:$0xff]  ;;  %v6138_v23 = vld [vmem:[%s11352_s11 + $0x38] sm:$0xff] }
 0x7bb   : > { %v5570_v63 = vmax.f32 %v10946_v19, %v5552_v3  ;;  %v5545_v44 = vpop.permute.xlu0 %5544  ;;  %7017 = vmatprep.subr.mxu1 %v11627_v11  ;;  %v6885_v19 = vld [vmem:[%s11350_s9 + $0xb8] sm:$0xff]  ;;  %v6136_v3 = vld [vmem:[%s11352_s11 + $0x28] sm:$0xff] }
 0x7bc   : > { %6867 = vmatprep.mubr.msk.f32.mxu1 %vm5592_vm12, %v5571_v43  ;;  %7018 = vmatpush3.msra.mxu1 %v5703_v7  ;;  %v6137_v7 = vld [vmem:[%s11352_s11 + $0x30] sm:$0xff]  ;;  %v6135_v43 = vld [vmem:[%s11352_s11 + $0x20] sm:$0xff] }
 0x7bd   : > { %5688 = vmatmul.mubr.f32.gmra.mxu1 %v5570_v63  ;;  %v5547_v55 = vpop.permute.xlu1 %5546  ;;  %7019 = vmatprep.subr.mxu1 %v11627_v11  ;;  %v6134_v63 = vld [vmem:[%s11352_s11 + $0x18] sm:$0xff] }
 0x7be   : > { %v5553_v32 = vsel %vm5548_vm11, %v5545_v44, %v5547_v55  ;;  %v5573_v8 = vmax.f32 %v10970_v59, %v5547_v55  ;;  %7020 = vmatpush3.msra.mxu1 %v5702_v9  ;;  %v6883_v59 = vld [vmem:[%s11350_s9 + $0xa8] sm:$0xff]  ;;  %v6133_v44 = vld [vmem:[%s11352_s11 + $0x10] sm:$0xff]  ;;  %v6131_v55 = vld [vmem:[%s11352_s11] sm:$0xff] }
 0x7bf   : > { %v5572_v40 = vmax.f32 %v10962_v45, %v5553_v32  ;;  %7021 = vmatprep.subr.mxu1 %v11627_v11  ;;  %v6897_v45 = vld [vmem:[%s11350_s9 + $0x110] sm:$0xff]  ;;  %v6132_v9 = vld [vmem:[%s11352_s11 + $0x8] sm:$0xff] }
 0x7c0   : > { %6868 = vmatprep.mubr.msk.f32.mxu1 %vm5592_vm12, %v5573_v8  ;;  %7022 = vmatpush3.msra.mxu1 %v5701_v25  ;;  %v6238_v25 = vld [vmem:[%s11354_s13 + $0x50] sm:$0xf]  ;;  %v6237_v32 = vld [vmem:[%s11354_s13 + $0x48] sm:$0xff]  ;;  %v6236_v8 = vld [vmem:[%s11354_s13 + $0x40] sm:$0xff] }
 0x7c1   : > { %5693 = vmatmul.mubr.f32.gmra.mxu1 %v5572_v40  ;;  %7023 = vmatprep.subr.mxu1 %v11627_v11  ;;  %v6235_v40 = vld [vmem:[%s11354_s13 + $0x38] sm:$0xff] }
 0x7c2   : > { %7024 = vmatpush3.msra.mxu1 %v5700_v49  ;;  %7027 = vmatprep.mubr.msk.f32.mxu1 %vm7453_vm13, %v11627_v11  ;;  %v6234_v49 = vld [vmem:[%s11354_s13 + $0x30] sm:$0xff] }
 0x7c3   : > { %7025 = vmatprep.subr.mxu1 %v11627_v11 }
 0x7c4   : > { %7026 = vmatpush3.msra.mxu1 %v5699_v56  ;;  %v6233_v56 = vld [vmem:[%s11354_s13 + $0x28] sm:$0xff] }
 0x7c5   : > { %7053 = vmatprep.subr.mxu1 %v11627_v11 }
 0x871   : > { %v5674_v52 = vpop.f32.mrf.mxu1 }
 0x872   : > { %7028 = vmatmul.mubr.msk.f32.vlgmr.msra.gmra.mxu1 %vm5709_vm14, %v5674_v52 }
 0x873   : > { %7054 = vmatpush3.msra.mxu1 %v6891_v30  ;;  %v5676_v61 = vpop.f32.mrf.mxu1  ;;  %7073 = vmatprep.mubr.msk.f32.mxu1 %vm7453_vm13, %v11627_v11 }
 0x874   : > { %7055 = vmatprep.subr.mxu1 %v11627_v11 }
 0x875   : > { %7056 = vmatpush3.msra.mxu1 %v6890_v36  ;;  %v5679_v62 = vpop.f32.mrf.mxu1 }
 0x876   : > { %7057 = vmatprep.subr.mxu1 %v11627_v11  ;;  %7051 = vmatmul.mubr.msk.f32.vlgmr.msra.gmra.mxu0 %vm5709_vm14, %v5679_v62 }
 0x877   : > { %7058 = vmatpush3.msra.mxu1 %v6889_v10  ;;  %7077 = vmatpush3.msra.mxu0 %v6902_v15  ;;  %v5681_v0 = vpop.f32.mrf.mxu1 }
 0x878   : > { %7059 = vmatprep.subr.mxu1 %v11627_v11  ;;  %7078 = vmatprep.subr.mxu0 %v11627_v11 }
 0x879   : > { %7060 = vmatpush3.msra.mxu1 %v6888_v6  ;;  %7079 = vmatpush3.msra.mxu0 %v6901_v4  ;;  %v5684_v31 = vpop.f32.mrf.mxu1  ;;  %v6870_v4 = vld [vmem:[#allocation8] ss:$0 sm:$0xff] }
 0x87a   : > { %7061 = vmatprep.subr.mxu1 %v11627_v11  ;;  %7080 = vmatprep.subr.mxu0 %v11627_v11 }
 0x87b   : > { %7062 = vmatpush3.msra.mxu1 %v6887_v33  ;;  %7081 = vmatpush3.msra.mxu0 %v6900_v50  ;;  %v5686_v18 = vpop.f32.mrf.mxu1 }
 0x87c   : > { %7063 = vmatprep.subr.mxu1 %v11627_v11  ;;  %7082 = vmatprep.subr.mxu0 %v11627_v11 }
 0x87d   : > { %7064 = vmatpush3.msra.mxu1 %v6886_v29  ;;  %7083 = vmatpush3.msra.mxu0 %v6899_v28  ;;  %v5689_v54 = vpop.f32.mrf.mxu1 }
 0x87e   : > { %7065 = vmatprep.subr.mxu1 %v11627_v11  ;;  %7084 = vmatprep.subr.mxu0 %v11627_v11 }
 0x87f   : > { %7066 = vmatpush3.msra.mxu1 %v6885_v19  ;;  %7085 = vmatpush3.msra.mxu0 %v6898_v17  ;;  %v5691_v22 = vpop.f32.mrf.mxu1  ;;  %v6230_v17 = vld [vmem:[%s11354_s13 + $0x10] sm:$0xff] }
 0x880   : > { %7067 = vmatprep.subr.mxu1 %v11627_v11  ;;  %7086 = vmatprep.subr.mxu0 %v11627_v11 }
 0x881   : > { %7068 = vmatpush3.msra.mxu1 %v6884_v21  ;;  %7087 = vmatpush3.msra.mxu0 %v6897_v45  ;;  %v5694_v41 = vpop.f32.mrf.mxu1  ;;  %v6228_v21 = vld [vmem:[%s11354_s13] sm:$0xff] }
 0x882   : > { %7069 = vmatprep.subr.mxu1 %v11627_v11  ;;  %7088 = vmatprep.subr.mxu0 %v11627_v11  ;;  %v6915_v45 = vld [vmem:[%s11353_s12] ss:$0 sm:$0xff] }
 0x883   : > { %7070 = vmatpush3.msra.mxu1 %v6883_v59  ;;  %7089 = vmatpush3.msra.mxu0 %v6896_v13  ;;  %v5696_v47 = vpop.f32.mrf.mxu1 }
 0x884   : > { %7071 = vmatprep.subr.mxu1 %v11627_v11  ;;  %7090 = vmatprep.subr.mxu0 %v11627_v11 }
 0x885   : > { %7072 = vmatpush3.msra.mxu1 %v6882_v20  ;;  %7091 = vmatpush3.msra.mxu0 %v6895_v48 }
 0x886   : > { %7074 = vmatmul.mubr.msk.f32.vlgmr.msra.gmra.mxu1 %vm5709_vm14, %v5684_v31  ;;  %7092 = vmatprep.subr.mxu0 %v11627_v11 }
 0x887   : > { %7099 = vmatprep.subr.mxu1 %v11627_v11  ;;  %7093 = vmatpush3.msra.mxu0 %v6894_v35 }
 0x888   : > { %7100 = vmatpush3.msra.mxu1 %v6913_v42  ;;  %7094 = vmatprep.subr.mxu0 %v11627_v11 }
 0x889   : > { %7101 = vmatprep.subr.mxu1 %v11627_v11  ;;  %7095 = vmatpush3.msra.mxu0 %v6893_v5 }
 0x88a   : > { %7096 = vmatprep.mubr.msk.f32.mxu0 %vm7453_vm13, %v11627_v11  ;;  %7102 = vmatpush3.msra.mxu1 %v6912_v34 }
 0x88b   : > { %7097 = vmatmul.mubr.msk.f32.vlgmr.msra.gmra.mxu0 %vm5709_vm14, %v5689_v54  ;;  %7103 = vmatprep.subr.mxu1 %v11627_v11  ;;  %v6229_v54 = vld [vmem:[%s11354_s13 + $0x8] sm:$0xff] }
 0x88c   : > { %7104 = vmatpush3.msra.mxu1 %v6911_v37  ;;  %7119 = vmatprep.mubr.msk.f32.mxu1 %vm7453_vm13, %v11627_v11 }
 0x88d   : > { %7105 = vmatprep.subr.mxu1 %v11627_v11  ;;  %7122 = vmatprep.subr.mxu0 %v11627_v11 }
 0x88e   : > { %7106 = vmatpush3.msra.mxu1 %v6910_v46  ;;  %7152 = vmatprep.mubr.msk.f32.mxu0 %vm7453_vm13, %v11627_v11 }
 0x88f   : > { %7107 = vmatprep.subr.mxu1 %v11627_v11  ;;  %7123 = vmatpush3.msra.mxu0 %v6145_v2 }
 0x890   : > { %7108 = vmatpush3.msra.mxu1 %v6909_v57  ;;  %7124 = vmatprep.subr.mxu0 %v11627_v11 }
 0x891   : > { %7109 = vmatprep.subr.mxu1 %v11627_v11  ;;  %7125 = vmatpush3.msra.mxu0 %v6144_v12 }
 0x892   : > { %7110 = vmatpush3.msra.mxu1 %v6908_v27  ;;  %7126 = vmatprep.subr.mxu0 %v11627_v11 }
 0x893   : > { %7111 = vmatprep.subr.mxu1 %v11627_v11  ;;  %7127 = vmatpush3.msra.mxu0 %v6143_v60 }
 0x894   : > { %7112 = vmatpush3.msra.mxu1 %v6907_v38  ;;  %7128 = vmatprep.subr.mxu0 %v11627_v11 }
 0x895   : > { %7113 = vmatprep.subr.mxu1 %v11627_v11  ;;  %7129 = vmatpush3.msra.mxu0 %v6142_v14 }
 0x896   : > { %7114 = vmatpush3.msra.mxu1 %v6906_v58  ;;  %7130 = vmatprep.subr.mxu0 %v11627_v11 }
 0x897   : > { %7115 = vmatprep.subr.mxu1 %v11627_v11  ;;  %7131 = vmatpush3.msra.mxu0 %v6141_v1 }
 0x898   : > { %7116 = vmatpush3.msra.mxu1 %v6905_v26  ;;  %7132 = vmatprep.subr.mxu0 %v11627_v11 }
 0x899   : > { %7117 = vmatprep.subr.mxu1 %v11627_v11  ;;  %7133 = vmatpush3.msra.mxu0 %v6140_v53 }
 0x89a   : > { %7118 = vmatpush3.msra.mxu1 %v6904_v39  ;;  %7134 = vmatprep.subr.mxu0 %v11627_v11 }
 0x89b   : > { %7120 = vmatmul.mubr.msk.f32.vlgmr.msra.gmra.mxu1 %vm5709_vm14, %v5694_v41  ;;  %7155 = vmatprep.subr.mxu1 %v11627_v11 }
 0x89c   : > { %7177 = vmatprep.mubr.msk.f32.mxu1 %vm7453_vm13, %v11627_v11  ;;  %7135 = vmatpush3.msra.mxu0 %v6139_v51 }
 0x89d   : > { %7136 = vmatprep.subr.mxu0 %v11627_v11  ;;  %7156 = vmatpush3.msk.msra.mxu1 %vm3939_vm5, %v6238_v25 }
 0x89e   : > { %7137 = vmatpush3.msra.mxu0 %v6138_v23  ;;  %7157 = vmatprep.subr.mxu1 %v11627_v11 }
 0x89f   : > { %7138 = vmatprep.subr.mxu0 %v11627_v11  ;;  %7158 = vmatpush3.msra.mxu1 %v6237_v32 }
 0x8a0   : > { %7139 = vmatpush3.msra.mxu0 %v6137_v7  ;;  %7159 = vmatprep.subr.mxu1 %v11627_v11 }
 0x8a1   : > { %7140 = vmatprep.subr.mxu0 %v11627_v11  ;;  %7160 = vmatpush3.msra.mxu1 %v6236_v8 }
 0x8a2   : > { %7141 = vmatpush3.msra.mxu0 %v6136_v3  ;;  %7161 = vmatprep.subr.mxu1 %v11627_v11 }
 0x8a3   : > { %7142 = vmatprep.subr.mxu0 %v11627_v11  ;;  %7162 = vmatpush3.msra.mxu1 %v6235_v40 }
 0x8a4   : > { %7143 = vmatpush3.msra.mxu0 %v6135_v43  ;;  %7163 = vmatprep.subr.mxu1 %v11627_v11 }
 0x8a5   : > { %7144 = vmatprep.subr.mxu0 %v11627_v11  ;;  %7164 = vmatpush3.msra.mxu1 %v6234_v49 }
 0x8a6   : > { %7145 = vmatpush3.msra.mxu0 %v6134_v63  ;;  %7165 = vmatprep.subr.mxu1 %v11627_v11 }
 0x8a7   : > { %7146 = vmatprep.subr.mxu0 %v11627_v11  ;;  %7166 = vmatpush3.msra.mxu1 %v6233_v56 }
 0x8a8   : > { %7147 = vmatpush3.msra.mxu0 %v6133_v44  ;;  %7167 = vmatprep.subr.mxu1 %v11627_v11 }
 0x8a9   : > { %7148 = vmatprep.subr.mxu0 %v11627_v11  ;;  %7168 = vmatpush3.msra.mxu1 %v6232_v16 }
 0x8aa   : > { %7149 = vmatpush3.msra.mxu0 %v6132_v9  ;;  %7169 = vmatprep.subr.mxu1 %v11627_v11 }
 0x8ab   : > { %7150 = vmatprep.subr.mxu0 %v11627_v11  ;;  %7170 = vmatpush3.msra.mxu1 %v6231_v24 }
 0x8ac   : > { %7151 = vmatpush3.msra.mxu0 %v6131_v55  ;;  %7171 = vmatprep.subr.mxu1 %v11627_v11 }
 0x8ad   : > { %7172 = vmatpush3.msra.mxu1 %v6230_v17 }
 0x8ae   : > { %7173 = vmatprep.subr.mxu1 %v11627_v11 }
 0x8af   : > { %7174 = vmatpush3.msra.mxu1 %v6229_v54 }
 0x8b0   : > { %7175 = vmatprep.subr.mxu1 %v11627_v11  ;;  %v6917_v11 = vld [vmem:[%s11355_s14] ss:$0 sm:$0xff] }
 0x8b1   : > { %7176 = vmatpush3.msra.mxu1 %v6228_v21 }
 0x932   : > { %v5779_v30 = vpop.f32.mrf.mxu1 }
 0x933   : > { %v5789_v0 = vadd.f32 %v6870_v4, %v5779_v30 }
 0x934   : > { %v7029_v52 = vpop.f32.mrf.mxu1 }
 0x936   : > { %v5870_v36 = vpop.f32.mrf.mxu0 }
 0x937   : > { %v5874_v33 = vadd.f32 %v5870_v36, %v5789_v0 }
 0x938   : > { %v7052_v61 = vpop.f32.mrf.mxu0 }
 0x946   : > { %v5955_v10 = vpop.f32.mrf.mxu1 }
 0x947   : > { %v5959_v50 = vadd.f32 %v5955_v10, %v5874_v33 }
 0x948   : > { %v7075_v15 = vpop.f32.mrf.mxu1 }
 0x94b   : > { %v6040_v62 = vpop.f32.mrf.mxu0 }
 0x94c   : > { %v6044_v31 = vadd.f32 %v6040_v62, %v5959_v50 }
 0x94d   : > { %v7098_v6 = vpop.f32.mrf.mxu0 }
 0x95b   : > { %v6125_v29 = vpop.f32.mrf.mxu1 }
 0x95c   : > { %v6129_v28 = vadd.f32 %v6125_v29, %v6044_v31 }
 0x95d   : > { %v7121_v18 = vpop.f32.mrf.mxu1 }
 0x95e   : > { %v6130_v19 = vmax.f32 %v6129_v28, 0.0 }
 0x960   : > { %7153 = vmatmul.mubr.msk.f32.vlgmr.msra.gmra.mxu0 %vm6153_vm15, %v6130_v19 }
 0xa20   : > { %v6223_v22 = vpop.f32.mrf.mxu0 }
 0xa21   : > { %v6224_v59 = vadd.f32 %v6915_v45, %v6223_v22 }
 0xa22   : > { %v7154_v13 = vpop.f32.mrf.mxu0 }
 0xa23   : > { %v6227_v41 = vmax.f32 %v6224_v59, 0.0 }
 0xa25   : > { %7178 = vmatmul.mubr.msk.f32.vlgmr.msra.gmra.mxu1 %vm3906_vm8, %v6227_v41 }
 0xae5   : > { %v6318_v20 = vpop.f32.mrf.mxu1 }
 0xae6   : > { %v6319_v48 = vadd.f32 %v6917_v11, %v6318_v20 }
 0xae7   : > { %v7179_v47 = vpop.f32.mrf.mxu1 }
 0xae8   : > { %6322 = vst [vmem:[%s541_s26] sm:$0xff] %v6319_v48 }
 0xae9   : > { %7383 = shalt.err (!%p7380_p4)
}
 0xaea   : > { %s7384_s20 = scalar_lea.hbm %s11306_s27, 128  ;;  %s7388_s26 = scalar_lea.hbm %s11356_s15, 256 }
 0xaeb   : > { %p7385_p13 = scmp.ne.s32.totalorder %s11306_s27, %s7384_s20  ;;  %p7389_p10 = scmp.lt.s32.totalorder %s11306_s27, %s11356_s15 }
 0xaec   : > { %p7390_p12 = scmp.lt.s32.totalorder %s7388_s26, %s7384_s20 }
 0xaed   : > { %p7386_p5 = pnand %p7385_p13, %p11628_p11 }
 0xaee   : > { %p7391_p7 = por %p7390_p12, %p7389_p10 }
 0xaef   : > { %p7387_p6 = pneg %p7386_p5 }
 0xaf1   : > { %p7392_p8 = pnand %p7391_p7, %p7387_p6 }
 0xaf3   : > { %7395 = shalt.err (!%p7392_p8)
}
 0xaf4   : > { %7196 = dma.vmem_to_hbm [thread:$0]  (%p11628_p11), %s6338_s6, 128, %s11306_s27, %s6324_s16  }
 0xaf5 PF: > { %s11629_s24 = sld [smem:[#allocation18_spill]]  ;;  %p7223_p0 = scmp.ge.s32.totalorder %s7442_s21, 2 }
 0xaf6   : > { %s6349_s2 = sand.u32 1, %s7430_s18  }
 0xaf7   : > { %s6350_s22 = scalar_lea.sflag [#allocation4], %s6349_s2 }
 0xafb   : > { %p11630_p1 = scmp.ne.s32.totalorder %s11629_s24, 0 }
 0xafd   : > { %p7212_p2 = pnand %p7223_p0, %p11630_p1 }
 0xaff   : > { %p7213_p9 = pneg %p7212_p2 }
 0xb01   : > { %7425 = dma.done.wait (%p7213_p9), %s6350_s22, 128  }
 0xb02   : > { %7427 = vsyncadd (%p7213_p9), %s6350_s22, 4294967168  ;;  %s11631_s21 = sld [smem:[#allocation16_spill]]  ;;  %s11634_s18 = smov %s7434_s19 }
 0xb03   : > { %s11632_s25 = sld [smem:[#allocation15_spill]] }
 0xb04   : > { %s11633_s20 = sld [smem:[#allocation17_spill]] }
 0xb08   : > { %p28_p3 = scmp.ge.s32.totalorder %s11631_s21, 4  }
 0xb09   : > { %s11635_s19 = smov %s11632_s25 }
 0xb0a   :  { %30 = sbr.rel (!%p28_p3) target bundleno = 9 (0x9), region = 144 }
 0xb0f   :  { %6355 = vsyncpa [#allocation3], 1 }
 0xb10   :  { %6357 = vsyncpa [#allocation3 + $0x1], 1 }
 0xb11   :  { %6358 = vsyncpa [#allocation6], 1 }
 0xb12   :  { %6359 = vsyncpa [#allocation9], 1 }
 0xb13   :  { %6360 = vsyncpa [#allocation4], 1 }
 0xb14   :  { %6362 = vsyncpa [#allocation4 + $0x1], 1 }

</bundles_post_ra>
